<compile_context>
chip_gen: v7x
topology: tpu7x:2x2x1
jax: 0.10.0
libtpu: 0.0.40
codegen_flags: <defaults>
</compile_context>

<pallas_src>
import functools

import jax
import jax.numpy as jnp
import numpy as np
from jax.experimental import pallas as pl
from jax.experimental.pallas import tpu as pltpu


def _ceil_to(x, m):
    return -(-int(x) // int(m)) * int(m)


def _detect_tpu():
    """Best-effort chip query; safe fallbacks if the query is unavailable."""
    vmem_bytes = 64 * 1024 * 1024          # conservative fallback: v7x physical VMEM
    kind = ""
    try:
        vmem_bytes = int(pltpu.get_tpu_info().vmem_capacity_bytes)
    except Exception:
        pass
    try:
        kind = jax.devices()[0].device_kind.lower()
    except Exception:
        pass
    is_v5 = "v5" in kind                   # bf16-only MXU generation -> prefer split
    # v4 / v7x expose 2 TensorCores behind one device ("megacore"); keep the
    # grid >= ~4 steps so the "parallel" axis actually splits across both TCs.
    is_megacore = ("v4" in kind) or ("7" in kind)
    return vmem_bytes, is_v5, is_megacore


def _vmem_bytes_estimate(tok_block, w_pad, k_total, tab_itemsize, out_itemsize):
    out_blk = tok_block * w_pad * out_itemsize      # output block
    x_blk = tok_block * 512                         # (tok,1) f32 occupies 512 B / 128-lane row
    tab_blk = k_total * w_pad * tab_itemsize        # resident table (double-buffered by default)
    onehot_tmp = tok_block * k_total * 4            # bool -> f32 one-hot live temporary
    return 2 * out_blk + 2 * x_blk + 2 * tab_blk + onehot_tmp + (2 << 20)


def _quantize(x, vmin, vmax, bins):
    """Reference / wrapper quantization (same formula as the kernel).

    Matches torch for finite x: trunc-toward-zero cast, clamp to [0, bins-1],
    NaN -> bins.  (+/-Inf / huge |x| go through a saturating int cast followed
    by the clamp — implementation-defined vs torch's int64 cast, same caveat
    as the in-kernel path.)  q is returned as int32 (torch uses int64).
    """
    scaled = (x - vmin) / (vmax - vmin) * bins
    q = jnp.clip(scaled.astype(jnp.int32), 0, bins - 1)
    return jnp.where(jnp.isnan(x), jnp.int32(bins), q)


def _binned_embedding_kernel(x_ref, tab_ref, emb_ref, *,
                             vmin, vmax, bins, k_pad, n_terms, exact_f32):
    # x_ref:   (TOK_BLOCK, 1)           f32
    # tab_ref: (n_terms*K_pad, W_pad)   f32 (n_terms==1) or bf16 hi/mid/lo (n_terms==3)
    # emb_ref: (TOK_BLOCK, W_pad)       f32 or bf16
    x = x_ref[...]                                        # (TOK, 1)
    scaled = (x - vmin) / (vmax - vmin) * bins
    # float->int cast truncates toward zero (matches torch .to(long)); after the
    # clamp, trunc vs floor are indistinguishable.  NaN is fixed up explicitly.
    q = jnp.clip(scaled.astype(jnp.int32), 0, bins - 1)
    q = jnp.where(jnp.isnan(x), jnp.int32(bins), q)       # NaN -> "default" bin

    tok = x.shape[0]
    k_total = n_terms * k_pad
    # One-hot tiled along the lane (K) axis: column t*k_pad + k is hot iff k == q.
    # One (TOK, n_terms*K_pad) x (n_terms*K_pad, W_pad) dot then gathers AND sums
    # the split terms inside the MXU: no VPU accumulator, no (TOK, W_pad) f32
    # live temporary, result stored straight to the output block.
    lane_ids = jax.lax.broadcasted_iota(jnp.int32, (tok, k_total), 1)
    bin_ids = lane_ids % k_pad if n_terms > 1 else lane_ids
    onehot = (bin_ids == q).astype(jnp.float32).astype(tab_ref.dtype)   # exact 0/1

    precision = jax.lax.Precision.HIGHEST if exact_f32 else jax.lax.Precision.DEFAULT
    emb_ref[...] = jnp.dot(onehot, tab_ref[...],
                           preferred_element_type=jnp.float32,
                           precision=precision).astype(emb_ref.dtype)


def prepare_binned_table(embed_table, *, bins, use_bf16_split):
    """Pad (and optionally hi/mid/lo bf16-split) the table once per table.

    The result only depends on the weights; hoist it out of the per-call path
    and pass it to binned_embedding via prepared_tab=.
    """
    W = int(embed_table.shape[1])
    assert embed_table.shape[0] == bins + 1
    w_pad = _ceil_to(max(W, 128), 128)
    k_pad = _ceil_to(bins + 1, 128)
    if use_bf16_split:
        # Near-exact 3-term bf16 split (covers ~24 significand bits over three
        # rounding steps; ~1e-7 relative in practice, NOT bit-exact for all f32).
        t = embed_table.astype(jnp.float32)
        hi = t.astype(jnp.bfloat16)
        r = t - hi.astype(jnp.float32)
        mid = r.astype(jnp.bfloat16)
        r = r - mid.astype(jnp.float32)
        lo = r.astype(jnp.bfloat16)
        terms, tab_dtype = [hi, mid, lo], jnp.bfloat16
    else:
        terms, tab_dtype = [embed_table.astype(jnp.float32)], jnp.float32
    n_terms = len(terms)
    tab = jnp.zeros((n_terms * k_pad, w_pad), tab_dtype)
    for i, term in enumerate(terms):
        tab = tab.at[i * k_pad:i * k_pad + bins + 1, :W].set(term.astype(tab_dtype))
    meta = dict(W=W, w_pad=w_pad, k_pad=k_pad, n_terms=n_terms,
                tab_dtype=tab_dtype, bins=int(bins),
                use_bf16_split=bool(use_bf16_split))
    return tab, meta


def binned_embedding(x, embed_table, *, vmin=0.0, vmax=1.0, bins=32,
                     tok_block=8192, return_quantized=False,
                     mxu_bf16_split=None, out_dtype=jnp.float32,
                     prepared_tab=None):
    """Pallas implementation of BinnedEmbedding.forward.

    x:              float array, any leading shape (e.g. [B, T])
    embed_table:    [bins + 1, W] float32 (nn.Embedding weight)
    mxu_bf16_split: None -> auto (True on v5-family, False on v6e/v7x)
    out_dtype:      jnp.float32 (default, matches torch) or jnp.bfloat16
    returns:        x.shape + [W] embeddings (and optionally int32 quantized idx)
    """
    vmem_bytes, is_v5, is_megacore = _detect_tpu()

    if prepared_tab is None:
        if mxu_bf16_split is None:
            mxu_bf16_split = is_v5
        prepared_tab = prepare_binned_table(embed_table, bins=bins,
                                            use_bf16_split=mxu_bf16_split)
    tab, meta = prepared_tab
    assert meta["bins"] == int(bins)
    W, w_pad, k_pad, n_terms = meta["W"], meta["w_pad"], meta["k_pad"], meta["n_terms"]
    k_total = n_terms * k_pad
    tab_itemsize = jnp.dtype(meta["tab_dtype"]).itemsize
    exact_f32 = (n_terms == 1)          # pin HIGHEST precision for the f32 gather

    out_dtype = jnp.dtype(out_dtype)
    out_itemsize = out_dtype.itemsize

    orig_shape = x.shape
    n = 1
    for d in orig_shape:
        n *= int(d)
    x_flat = x.reshape(n, 1).astype(jnp.float32)

    # --- tile sizing (chip-aware) --------------------------------------------
    tok_block = max(8, (int(tok_block) // 8) * 8)
    tok_block = min(tok_block, _ceil_to(n, 8))            # don't over-allocate tiny n
    if is_megacore:
        # keep >= ~4 grid steps so the parallel axis splits across both TCs
        tok_block = min(tok_block, max(256, _ceil_to(pl.cdiv(n, 4), 8)))
    soft_budget = max(24 << 20, int(0.70 * vmem_bytes))
    est = _vmem_bytes_estimate(tok_block, w_pad, k_total, tab_itemsize, out_itemsize)
    while tok_block > 256 and est > soft_budget:
        tok_block = max(256, ((tok_block // 2) // 8) * 8)
        est = _vmem_bytes_estimate(tok_block, w_pad, k_total, tab_itemsize, out_itemsize)
    vmem_limit = int(min(vmem_bytes, max(32 << 20, int(1.25 * est))))

    # Ragged last block is masked by Pallas: no wrapper-side pad of x and no
    # output un-pad pass (the output array is exactly (n, w_pad)).
    grid = (pl.cdiv(n, tok_block),)

    kernel = functools.partial(
        _binned_embedding_kernel,
        vmin=float(vmin), vmax=float(vmax), bins=int(bins),
        k_pad=k_pad, n_terms=n_terms, exact_f32=exact_f32,
    )

    cost = pl.CostEstimate(
        flops=2 * n * k_total * w_pad,
        transcendentals=0,
        bytes_accessed=n * 4 + n * w_pad * out_itemsize + int(tab.size) * tab_itemsize,
    )

    embs_flat = pl.pallas_call(
        kernel,
        out_shape=jax.ShapeDtypeStruct((n, w_pad), out_dtype),
        grid_spec=pltpu.PrefetchScalarGridSpec(
            num_scalar_prefetch=0,
            grid=grid,
            in_specs=[
                pl.BlockSpec((tok_block, 1), lambda i: (i, 0)),
                # Constant block index: the table is fetched once and stays
                # resident across the whole grid.
                pl.BlockSpec((k_total, w_pad), lambda i: (0, 0)),
            ],
            out_specs=pl.BlockSpec((tok_block, w_pad), lambda i: (i, 0)),
        ),
        compiler_params=pltpu.CompilerParams(
            # "parallel" lets megacore chips split the token blocks across TCs.
            dimension_semantics=("parallel",),
            vmem_limit_bytes=vmem_limit,
        ),
        cost_estimate=cost,
    )(x_flat, tab)

    if w_pad != W:
        embs_flat = embs_flat[:, :W]   # slow fallback path only (W % 128 != 0)
    embs = embs_flat.reshape(orig_shape + (W,))

    if return_quantized:
        # Lane-dense, trivially cheap (n*4 bytes) elementwise op in XLA; the
        # kernel itself never stores a lane-sparse int32 stream.
        q = _quantize(x.astype(jnp.float32), float(vmin), float(vmax), int(bins))
        return embs, q
    return embs


def _reference(x, embed_table, vmin=0.0, vmax=1.0, bins=32):
    q = _quantize(x, vmin, vmax, bins)
    return embed_table[q], q


if __name__ == "__main__":
    key = jax.random.PRNGKey(0)
    kx, kt = jax.random.split(key)

    B, T = 2, 200          # n = 400 tokens: exercises the ragged last block
    bins, width = 32, 512  # module defaults (width=512 keeps the output lane-dense)
    vmin, vmax = 0.0, 1.0

    # Inputs in [-0.2, 1.2] so both clamp edges are exercised; sprinkle NaNs.
    x = jax.random.uniform(kx, (B, T), jnp.float32, minval=-0.2, maxval=1.2)
    x = x.at[0, 3].set(jnp.nan).at[1, 100].set(jnp.nan)

    # Deterministic "Embedding" weight init (synthetic, not a checkpoint).
    embed_table = jax.random.normal(kt, (bins + 1, width), jnp.float32)

    ref_embs, ref_q = _reference(x, embed_table, vmin, vmax, bins)

    # 1) Exact f32 path, small tok_block -> multi-step grid + ragged last block,
    #    q requested.
    embs, q = binned_embedding(x, embed_table, vmin=vmin, vmax=vmax, bins=bins,
                               tok_block=256, return_quantized=True,
                               mxu_bf16_split=False)
    embs = jax.block_until_ready(embs)
    np.testing.assert_array_equal(np.asarray(q), np.asarray(ref_q))
    np.testing.assert_allclose(np.asarray(embs), np.asarray(ref_embs),
                               rtol=1e-6, atol=1e-6)

    # 2) Exact f32 path, default (large, chip-capped) tok_block.
    embs2 = jax.block_until_ready(
        binned_embedding(x, embed_table, vmin=vmin, vmax=vmax, bins=bins,
                         mxu_bf16_split=False))
    np.testing.assert_allclose(np.asarray(embs2), np.asarray(ref_embs),
                               rtol=1e-6, atol=1e-6)

    # 3) v5e-friendly 3-term bf16 hi/mid/lo table split (single concatenated-K dot),
    #    with the table prepared once out of the call path.
    prepared = prepare_binned_table(embed_table, bins=bins, use_bf16_split=True)
    embs3 = jax.block_until_ready(
        binned_embedding(x, embed_table, vmin=vmin, vmax=vmax, bins=bins,
                         prepared_tab=prepared))
    np.testing.assert_allclose(np.asarray(embs3), np.asarray(ref_embs),
                               rtol=1e-5, atol=1e-5)

    # 4) Auto chip selection + bf16 output (HBM-write-bound -> ~2x fewer bytes).
    embs4 = jax.block_until_ready(
        binned_embedding(x, embed_table, vmin=vmin, vmax=vmax, bins=bins,
                         out_dtype=jnp.bfloat16))
    np.testing.assert_allclose(np.asarray(embs4.astype(jnp.float32)),
                               np.asarray(ref_embs), rtol=1e-2, atol=1e-2)

    print("KERNEL_OK")
</pallas_src>

<mosaic_0001>
module attributes {stable_mosaic.version = 11 : i64} {
  func.func @_binned_embedding_kernel(%arg0: i32, %arg1: memref<256x1xf32, #tpu.memory_space<vmem>>, %arg2: memref<128x512xf32, #tpu.memory_space<vmem>>, %arg3: memref<256x512xf32, #tpu.memory_space<vmem>>) attributes {dimension_semantics = [#tpu.dimension_semantics<parallel>], iteration_bounds = array<i64: 2>, scalar_prefetch = 0 : i64, scratch_operands = 0 : i64, tpu.core_type = #tpu.core_type<tc>, window_params = [{transform_indices = @transform_0, window_bounds = array<i64: 256, 1>}, {pipeline_mode = #tpu.pipeline_mode<synchronous>, transform_indices = @transform_1, window_bounds = array<i64: 128, 512>}, {transform_indices = @transform_2, window_bounds = array<i64: 256, 512>}]} {
    %c0 = arith.constant 0 : index
    %c0_0 = arith.constant 0 : index
    %0 = vector.load %arg1[%c0, %c0_0] : memref<256x1xf32, #tpu.memory_space<vmem>>, vector<256x1xf32>
    %cst = arith.constant 0.000000e+00 : f32
    %1 = vector.broadcast %cst : f32 to vector<256x1xf32>
    %2 = arith.subf %0, %1 : vector<256x1xf32>
    %cst_1 = arith.constant 1.000000e+00 : f32
    %3 = vector.broadcast %cst_1 : f32 to vector<256x1xf32>
    %4 = arith.divf %2, %3 : vector<256x1xf32>
    %cst_2 = arith.constant 3.200000e+01 : f32
    %5 = vector.broadcast %cst_2 : f32 to vector<256x1xf32>
    %6 = arith.mulf %4, %5 : vector<256x1xf32>
    %7 = arith.fptosi %6 : vector<256x1xf32> to vector<256x1xi32>
    %c0_i32 = arith.constant 0 : i32
    %c31_i32 = arith.constant 31 : i32
    %8 = vector.broadcast %c0_i32 : i32 to vector<256x1xi32>
    %9 = arith.maxsi %8, %7 : vector<256x1xi32>
    %10 = vector.broadcast %c31_i32 : i32 to vector<256x1xi32>
    %11 = arith.minsi %10, %9 : vector<256x1xi32>
    %12 = arith.cmpf one, %0, %0 : vector<256x1xf32>
    %c32_i32 = arith.constant 32 : i32
    %13 = vector.broadcast %c32_i32 : i32 to vector<256x1xi32>
    %14 = arith.select %12, %13, %11 : vector<256x1xi1>, vector<256x1xi32>
    %15 = tpu.iota {dimensions = array<i32: 1>} : vector<256x128xi32>
    %16 = vector.broadcast %14 : vector<256x1xi32> to vector<256x128xi32>
    %17 = arith.cmpi eq, %15, %16 : vector<256x128xi32>
    %18 = arith.extui %17 : vector<256x128xi1> to vector<256x128xi32>
    %19 = arith.sitofp %18 : vector<256x128xi32> to vector<256x128xf32>
    %c0_3 = arith.constant 0 : index
    %c0_4 = arith.constant 0 : index
    %20 = vector.load %arg2[%c0_3, %c0_4] : memref<128x512xf32, #tpu.memory_space<vmem>>, vector<128x512xf32>
    %cst_5 = arith.constant dense<0.000000e+00> : vector<256x512xf32>
    %21 = tpu.matmul %19, %20, %cst_5 {dimension_numbers = #tpu.dot_dimension_numbers<[1], [0], [0], [1], [0, 0, 1, 1], [], []>, precision = #tpu.contract_precision<fp32>} : vector<256x128xf32>, vector<128x512xf32>, vector<256x512xf32> -> vector<256x512xf32>
    %c0_6 = arith.constant 0 : index
    %c0_7 = arith.constant 0 : index
    %22 = vector.load %arg3[%c0_6, %c0_7] : memref<256x512xf32, #tpu.memory_space<vmem>>, vector<256x512xf32>
    tpu.vector_store %arg3[%c0_6, %c0_7], %21 {strides = array<i32>} : memref<256x512xf32, #tpu.memory_space<vmem>>, vector<256x512xf32>,
    return
  }
  func.func @transform_0(%arg0: i32) -> (i32, i32) {
    %c0_i32 = arith.constant 0 : i32
    %c0_i32_0 = arith.constant 0 : i32
    return %arg0, %c0_i32 : i32, i32
  }
  func.func @transform_1(%arg0: i32) -> (i32, i32) {
    %c0_i32 = arith.constant 0 : i32
    %c0_i32_0 = arith.constant 0 : i32
    %c0_i32_1 = arith.constant 0 : i32
    return %c0_i32, %c0_i32_0 : i32, i32
  }
  func.func @transform_2(%arg0: i32) -> (i32, i32) {
    %c0_i32 = arith.constant 0 : i32
    %c0_i32_0 = arith.constant 0 : i32
    return %arg0, %c0_i32 : i32, i32
  }
}

</mosaic_0001>

<bundles_post_ra>
// kernel: tpu_custom_call.1
= control target key start
LH: loop header
LB: loop body
LE: loop exit
PB: predicated region body
PF: predicated region fallthrough
CT: control target
= control target key end

     0   :  { %7 = vsyncpa [#allocation3], 0  ;;  %s10156_s0 = inlined_call_operand.vmem [shape: f32[400,1], index: 0, kind: input, shape index: {}]   ;;  %s10157_s1 = inlined_call_operand.hbm [shape: f32[128,512], index: 1, kind: input, shape index: {}]   ;;  %s10158_s2 = inlined_call_operand.hbm [shape: f32[400,512], index: 2, kind: output, shape index: {}]  }
   0x1   :  { %8 = vsyncpa [#allocation4], 0 }
   0x2   :  { %10 = vsyncpa [#allocation4 + $0x1], 0  ;;  %s7216_s9 = smov 0   ;;  %s7218_s10 = smov 0  }
   0x3   :  { %s7220_s11 = smov 0   ;;  %s7222_s12 = smov 0  }
   0x4 LB: > { %s7237_s13 = sadd.s32 4294967295, %s7190_s12   ;;  %s5703_s14 = sadd.s32 4294967294, %s7190_s12   ;;  %s7190_s12 = sphi %s7222_s12, %s11300_s12   ;;  %s7186_s11 = sphi %s7220_s11, %s11299_s11   ;;  %s7182_s10 = sphi %s7218_s10, %s11298_s10   ;;  %s7178_s9 = sphi %s7216_s9, %s11297_s9  }
   0x5   : > { %s7241_s15 = sadd.s32 1, %s7190_s12   ;;  %s70_s16 = sadd.s32 1, %s7186_s11 }
   0x6   : > { %s67_s17 = ssub.s32 %s7190_s12, %s7241_s15  ;;  %p80_p0 = scmp.ne.s32.totalorder %s7186_s11, %s7182_s10 }
   0x7   : > { %p68_p1 = scmp.eq.s32.totalorder %s67_s17, 0  ;;  %p81_p2 = scmp.eq.s32.totalorder %s7237_s13, 1 }
   0x8   : > { %p86_p3 = scmp.ne.s32.totalorder %s7182_s10, %s7178_s9  ;;  %p87_p4 = scmp.eq.s32.totalorder %s5703_s14, 1 }
   0x9   : > { %s7252_s18 = scalar_select %p68_p1, %s7186_s11, %s70_s16  }
   0xa   : > { %p7254_p5 = por %p81_p2, %p80_p0  ;;  %p7258_p6 = por %p87_p4, %p86_p3 }
   0xb   : > { %p5704_p7 = scmp.ge.s32.totalorder %s7190_s12, 1  ;;  %p94_p8 = scmp.lt.s32.totalorder %s7190_s12, 3 }
   0xc   : > { %s10626_s19 = scalar_select %p7254_p5, 1, 0 }
   0xd   : > { %s10627_s20 = scalar_select %p7258_p6, 1, 0 }
   0xe   : > { %p10159_p9 = scmp.eq.s32.totalorder %s7237_s13, 0  ;;  %p7265_p10 = pnand %p5704_p7, %p94_p8 }
   0xf   : > { %s7192_s22 = smov [#allocation2]   ;;  %s7096_s27 = scalar_lea.hbm %s10157_s1, 8192 }
  0x10   : > { %s10628_s21 = scalar_select %p7265_p10, 1, 0 }
  0x11   : > { %s106_s23 = sshll.u32 %s7192_s22, 4  ;;  %p7043_p11 = pneg %p7265_p10  ;;  %s107_s23 = int_to_ptr.vmem [resolvable:$true] %s106_s23 }
  0x12   : > { %p7097_p13 = scmp.ne.s32.totalorder %s10157_s1, %s7096_s27  ;;  %p7103_p3 = scmp.lt.u32.totalorder %s7096_s27, %s10157_s1 }
  0x13   : > { %p7273_p12 = pnand %p10159_p9, %p7043_p11 }
  0x15   : > { %p7098_p0 = pneg %p7273_p12 }
  0x17   : > { %p7099_p1 = pnand %p7098_p0, %p7097_p13 }
  0x19   : > { %p7100_p2 = pneg %p7099_p1 }
  0x1b   : > { %p7105_p4 = pnand %p7103_p3, %p7100_p2 }
  0x1d   : > { %7108 = shalt.err (!%p7105_p4)
}
  0x1e   : > { %s7109_s4 = scalar_lea.vmem %s107_s23, 8192  ;;  %p7117_p9 = scmp.lt.s32.totalorder %s107_s23, %s107_s23 }
  0x1f   : > { %p7110_p7 = scmp.ne.s32.totalorder %s107_s23, %s7109_s4  ;;  %p7118_p6 = scmp.lt.s32.totalorder %s7109_s4, %s7109_s4 }
  0x21   : > { %p7112_p8 = pnand %p7110_p7, %p7098_p0  ;;  %p7119_p5 = por %p7118_p6, %p7117_p9 }
  0x23   : > { %p7113_p11 = pneg %p7112_p8 }
  0x25   : > { %p7120_p10 = pnand %p7119_p5, %p7113_p11 }
  0x27   : > { %7123 = shalt.err (!%p7120_p10)
}
  0x28   : > { %s7193_s5 = smov 512   ;;  %s7194_s6 = smov 32  }
  0x29   : > { %7046 = dma.hbm_to_vmem [thread:$0]  (!%p7273_p12), %s10157_s1, 8192, %s107_s23, [#allocation3], %s7193_s5, %s7193_s5, %s7194_s6  }
  0x2a   : > { %p10630_p13 = scmp.ne.s32.totalorder %s10628_s21, 0 }
  0x2c   : > { %139 = sbr.rel (%p10630_p13) target bundleno = 1223 (0x4c7), region = 28 }
  0x33   : > { %p10631_p1 = scmp.eq.s32.totalorder %s7237_s13, 0 }
  0x35   : > { %7169 = dma.done.wait (%p10631_p1), [#allocation3], 8192   ;;  %p10632_p0 = pmov %p10631_p1 }
  0x36   : > { %s7300_s14 = sshll.u32 %s7237_s13, 5  ;;  %v7195_v0 = vmov 0   ;;  %s162_s24 = sand.u32 1, %s7182_s10  }
  0x37   : > { %7171 = vsyncadd (%p10632_p0), [#allocation3], 4294959104  ;;  %7095 = vset.pattern.permute.xlu1 %v7195_v0  ;;  %7094 = vset.pattern.permute.xlu0 %v7195_v0  ;;  %p170_p5 = scmp.lt.s32.totalorder %s7300_s14, 49  ;;  %s5709_s25 = sshll.u32 %s162_s24, 10 }
  0x38   : > { %s9963_s26 = scalar_lea.vmem [#allocation5], %s5709_s25  ;;  %s10095_s27 = scalar_lea.sflag [#allocation4], %s162_s24 }
  0x39   : > { %s171_s16 = scalar_select %p170_p5, %s7300_s14, 49 }
  0x3a   : > { %p11295_p6 = scmp.ne.s32.totalorder %s10626_s19, 0 }
  0x3b   : > { %s5711_s17 = sshll.u32 %s171_s16, 3  ;;  %s5616_s28 = ssub.s32 (%p11295_p6), 50, %s7300_s14 }
  0x3c   : > { %s7307_s23 = scalar_lea.vmem %s10156_s0, %s5711_s17  ;;  %p5617_p9 = scmp.lt.s32.totalorder (%p11295_p6), %s5616_s28, 32 }
  0x3d   : > { %v187_v1 = vld [vmem:[%s7307_s23 + $0x10] sm:$0xff]  ;;  %v185_v2 = vld [vmem:[%s7307_s23] sm:$0xff]  ;;  %v188_v3 = vld [vmem:[%s7307_s23 + $0x18] sm:$0xff] }
  0x3e   : > { %v219_v4 = vmul.f32 32.0, %v187_v1  ;;  %v217_v5 = vmul.f32 32.0, %v185_v2  ;;  %v186_v6 = vld [vmem:[%s7307_s23 + $0x8] sm:$0xff]  ;;  %v7317_v8 = vld [vmem:[%s7307_s23 + $0x20] sm:$0xff]  ;;  %vm411_vm0 = vcmp.ne.f32.partialorder %v187_v1, %v187_v1  ;;  %vm409_vm1 = vcmp.ne.f32.partialorder %v185_v2, %v185_v2  ;;  %v7320_v11 = vld [vmem:[%s7307_s23 + $0x38] sm:$0xff] }
  0x3f   : > { %v7314_v7 = vld [vmem:[%s7307_s23 + $0x28] sm:$0xff]  ;;  %v220_v9 = vmul.f32 32.0, %v188_v3  ;;  %v218_v10 = vmul.f32 32.0, %v186_v6  ;;  %vm412_vm2 = vcmp.ne.f32.partialorder %v188_v3, %v188_v3  ;;  %vm410_vm3 = vcmp.ne.f32.partialorder %v186_v6, %v186_v6  ;;  %v191_v33 = vld [vmem:[%s7307_s23 + $0x30] sm:$0xff]  ;;  %v193_v46 = vld [vmem:[%s7307_s23 + $0x40] sm:$0xff] }
  0x40   : > { %v6978_v12 = vtrunc.f32 %v219_v4  ;;  %v6974_v13 = vtrunc.f32 %v217_v5  ;;  %v222_v14 = vmul.f32 32.0, %v7314_v7  ;;  %v221_v17 = vmul.f32 32.0, %v7317_v8  ;;  %v7333_v38 = vld [vmem:[%s7307_s23 + $0x48] sm:$0xff]  ;;  %v196_v53 = vld [vmem:[%s7307_s23 + $0x58] sm:$0xff]  ;;  %v195_v57 = vld [vmem:[%s7307_s23 + $0x50] sm:$0xff] }
  0x41   : > { %v6980_v15 = vtrunc.f32 %v220_v9  ;;  %v6976_v16 = vtrunc.f32 %v218_v10  ;;  %v224_v21 = vmul.f32 32.0, %v7320_v11  ;;  %vm414_vm4 = vcmp.ne.f32.partialorder %v7314_v7, %v7314_v7  ;;  %v198_v5 = vld [vmem:[%s7307_s23 + $0x68] sm:$0xff] }
  0x42   : > { %v6979_v18 = vcvt.f32.s32 %v6978_v12  ;;  %v6975_v19 = vcvt.f32.s32 %v6974_v13  ;;  %v6984_v20 = vtrunc.f32 %v222_v14  ;;  %v6982_v24 = vtrunc.f32 %v221_v17 }
  0x43   : > { %v6981_v22 = vcvt.f32.s32 %v6980_v15  ;;  %v6977_v23 = vcvt.f32.s32 %v6976_v16  ;;  %vm413_vm7 = vcmp.ne.f32.partialorder %v7317_v8, %v7317_v8  ;;  %v6988_v26 = vtrunc.f32 %v224_v21  ;;  %v197_v8 = vld [vmem:[%s7307_s23 + $0x60] sm:$0xff] }
  0x44   : > { %vm285_vm5 = vcmp.gt.s32.totalorder %v6979_v18, 0  ;;  %vm281_vm6 = vcmp.gt.s32.totalorder %v6975_v19, 0  ;;  %v6985_v25 = vcvt.f32.s32 %v6984_v20  ;;  %v6983_v40 = vcvt.f32.s32 %v6982_v24  ;;  %v200_v20 = vld [vmem:[%s7307_s23 + $0x78] sm:$0xff]  ;;  %v199_v24 = vld [vmem:[%s7307_s23 + $0x70] sm:$0xff] }
  0x45   : > { %v286_v27 = vsel %vm285_vm5, %v6979_v18, 0  ;;  %v282_v28 = vsel %vm281_vm6, %v6975_v19, 0  ;;  %vm287_vm8 = vcmp.gt.s32.totalorder %v6981_v22, 0  ;;  %vm283_vm9 = vcmp.gt.s32.totalorder %v6977_v23, 0 }
  0x46   : > { %vm349_vm10 = vcmp.lt.s32.totalorder %v286_v27, 31  ;;  %vm345_vm11 = vcmp.lt.s32.totalorder %v282_v28, 31  ;;  %v288_v29 = vsel %vm287_vm8, %v6981_v22, 0  ;;  %v284_v30 = vsel %vm283_vm9, %v6977_v23, 0 }
  0x47   : > { %v350_v31 = vsel %vm349_vm10, %v286_v27, 31  ;;  %v346_v32 = vsel %vm345_vm11, %v282_v28, 31  ;;  %vm351_vm12 = vcmp.lt.s32.totalorder %v288_v29, 31  ;;  %vm347_vm13 = vcmp.lt.s32.totalorder %v284_v30, 31 }
  0x48   : > { %v443_v34 = vsel %vm411_vm0, 32, %v350_v31  ;;  %v441_v35 = vsel %vm409_vm1, 32, %v346_v32  ;;  %v352_v36 = vsel %vm351_vm12, %v288_v29, 31  ;;  %v348_v37 = vsel %vm347_vm13, %v284_v30, 31  ;;  %v202_v31 = vld [vmem:[%s7307_s23 + $0x88] sm:$0xff] }
  0x49   : > { %482 = vperm.xlu1 %7095, %v443_v34   ;;  %476 = vperm.xlu0 %7094, %v441_v35   ;;  %v444_v39 = vsel %vm412_vm2, 32, %v352_v36  ;;  %vm291_vm14 = vcmp.gt.s32.totalorder %v6985_v25, 0  ;;  %vm416_vm15 = vcmp.ne.f32.partialorder %v7320_v11, %v7320_v11  ;;  %v442_v41 = vsel %vm410_vm3, 32, %v348_v37 }
  0x4a   : > { %v292_v42 = vsel %vm291_vm14, %v6985_v25, 0  ;;  %v6989_v43 = vcvt.f32.s32 %v6988_v26  ;;  %v223_v44 = vmul.f32 32.0, %v191_v33  ;;  %vm289_vm1 = vcmp.gt.s32.totalorder %v6983_v40, 0 }
  0x4b   : > { %vm355_vm0 = vcmp.lt.s32.totalorder %v292_v42, 31  ;;  %vm415_vm5 = vcmp.ne.f32.partialorder %v191_v33, %v191_v33  ;;  %v226_v45 = vmul.f32 32.0, %v7333_v38  ;;  %v290_v48 = vsel %vm289_vm1, %v6983_v40, 0 }
  0x4c   : > { %v356_v47 = vsel %vm355_vm0, %v292_v42, 31  ;;  %vm295_vm2 = vcmp.gt.s32.totalorder %v6989_v43, 0  ;;  %v6986_v49 = vtrunc.f32 %v223_v44  ;;  %vm353_vm3 = vcmp.lt.s32.totalorder %v290_v48, 31  ;;  %v204_v42 = vld [vmem:[%s7307_s23 + $0x98] sm:$0xff] }
  0x4d   : > { %485 = vperm.xlu1 %7095, %v444_v39   ;;  %479 = vperm.xlu0 %7094, %v442_v41   ;;  %v446_v50 = vsel %vm414_vm4, 32, %v356_v47  ;;  %v296_v51 = vsel %vm295_vm2, %v6989_v43, 0  ;;  %v6992_v52 = vtrunc.f32 %v226_v45  ;;  %v354_v54 = vsel %vm353_vm3, %v290_v48, 31  ;;  %v201_v39 = vld [vmem:[%s7307_s23 + $0x80] sm:$0xff] }
  0x4e   : > { %vm359_vm6 = vcmp.lt.s32.totalorder %v296_v51, 31  ;;  %v6987_v55 = vcvt.f32.s32 %v6986_v49  ;;  %v225_v56 = vmul.f32 32.0, %v193_v46  ;;  %v445_v58 = vsel %vm413_vm7, 32, %v354_v54  ;;  %v203_v54 = vld [vmem:[%s7307_s23 + $0x90] sm:$0xff] }
  0x4f   : > { %v360_v59 = vsel %vm359_vm6, %v296_v51, 31  ;;  %v6993_v60 = vcvt.f32.s32 %v6992_v52  ;;  %vm418_vm8 = vcmp.ne.f32.partialorder %v7333_v38, %v7333_v38  ;;  %vm417_vm9 = vcmp.ne.f32.partialorder %v193_v46, %v193_v46 }
  0x50   : > { %vm293_vm4 = vcmp.gt.s32.totalorder %v6987_v55, 0  ;;  %v6990_v61 = vtrunc.f32 %v225_v56  ;;  %v228_v62 = vmul.f32 32.0, %v196_v53  ;;  %v448_v63 = vsel %vm416_vm15, 32, %v360_v59 }
  0x51   : > { %491 = vperm.xlu1 %7095, %v446_v50   ;;  %488 = vperm.xlu0 %7094, %v445_v58   ;;  %v294_v0 = vsel %vm293_vm4, %v6987_v55, 0  ;;  %vm299_vm10 = vcmp.gt.s32.totalorder %v6993_v60, 0  ;;  %v227_v1 = vmul.f32 32.0, %v195_v57  ;;  %vm420_vm12 = vcmp.ne.f32.partialorder %v196_v53, %v196_v53 }
  0x52   : > { %vm357_vm7 = vcmp.lt.s32.totalorder %v294_v0, 31  ;;  %v300_v2 = vsel %vm299_vm10, %v6993_v60, 0  ;;  %v6991_v3 = vcvt.f32.s32 %v6990_v61  ;;  %v6996_v4 = vtrunc.f32 %v228_v62 }
  0x53   : > { %v358_v6 = vsel %vm357_vm7, %v294_v0, 31  ;;  %vm363_vm11 = vcmp.lt.s32.totalorder %v300_v2, 31  ;;  %v6994_v7 = vtrunc.f32 %v227_v1  ;;  %vm419_vm14 = vcmp.ne.f32.partialorder %v195_v57, %v195_v57  ;;  %v206_v57 = vld [vmem:[%s7307_s23 + $0xa8] sm:$0xff] }
  0x54   : > { %v447_v9 = vsel %vm415_vm5, 32, %v358_v6  ;;  %v364_v10 = vsel %vm363_vm11, %v300_v2, 31  ;;  %vm297_vm13 = vcmp.gt.s32.totalorder %v6991_v3, 0  ;;  %v6997_v11 = vcvt.f32.s32 %v6996_v4 }
  0x55   : > { %497 = vperm.xlu1 %7095, %v448_v63   ;;  %494 = vperm.xlu0 %7094, %v447_v9   ;;  %v298_v12 = vsel %vm297_vm13, %v6991_v3, 0  ;;  %v6995_v13 = vcvt.f32.s32 %v6994_v7  ;;  %v230_v14 = vmul.f32 32.0, %v198_v5  ;;  %v450_v15 = vsel %vm418_vm8, 32, %v364_v10  ;;  %v205_v3 = vld [vmem:[%s7307_s23 + $0xa0] sm:$0xff]  ;;  %v208_v9 = vld [vmem:[%s7307_s23 + $0xb8] sm:$0xff] }
  0x56   : > { %vm361_vm15 = vcmp.lt.s32.totalorder %v298_v12, 31  ;;  %vm303_vm0 = vcmp.gt.s32.totalorder %v6997_v11, 0  ;;  %v229_v16 = vmul.f32 32.0, %v197_v8  ;;  %vm422_vm3 = vcmp.ne.f32.partialorder %v198_v5, %v198_v5 }
  0x57   : > { %v362_v17 = vsel %vm361_vm15, %v298_v12, 31  ;;  %v304_v18 = vsel %vm303_vm0, %v6997_v11, 0  ;;  %vm301_vm1 = vcmp.gt.s32.totalorder %v6995_v13, 0  ;;  %v7000_v19 = vtrunc.f32 %v230_v14 }
  0x58   : > { %v449_v21 = vsel %vm417_vm9, 32, %v362_v17  ;;  %vm367_vm5 = vcmp.lt.s32.totalorder %v304_v18, 31  ;;  %v302_v22 = vsel %vm301_vm1, %v6995_v13, 0  ;;  %v6998_v23 = vtrunc.f32 %v229_v16  ;;  %v207_v13 = vld [vmem:[%s7307_s23 + $0xb0] sm:$0xff] }
  0x59   : > { %503 = vperm.xlu1 %7095, %v450_v15   ;;  %500 = vperm.xlu0 %7094, %v449_v21   ;;  %v368_v25 = vsel %vm367_vm5, %v304_v18, 31  ;;  %vm365_vm2 = vcmp.lt.s32.totalorder %v302_v22, 31  ;;  %v7001_v26 = vcvt.f32.s32 %v7000_v19  ;;  %v232_v30 = vmul.f32 32.0, %v200_v20 }
  0x5a   : > { %v452_v27 = vsel %vm420_vm12, 32, %v368_v25  ;;  %v366_v28 = vsel %vm365_vm2, %v302_v22, 31  ;;  %v6999_v29 = vcvt.f32.s32 %v6998_v23  ;;  %vm421_vm8 = vcmp.ne.f32.partialorder %v197_v8, %v197_v8  ;;  %v210_v25 = vld [vmem:[%s7307_s23 + $0xc8] sm:$0xff] }
  0x5b   : > { %v451_v32 = vsel %vm419_vm14, 32, %v366_v28  ;;  %vm307_vm6 = vcmp.gt.s32.totalorder %v7001_v26, 0  ;;  %v231_v33 = vmul.f32 32.0, %v199_v24  ;;  %v7004_v35 = vtrunc.f32 %v232_v30  ;;  %v209_v28 = vld [vmem:[%s7307_s23 + $0xc0] sm:$0xff] }
  0x5c   : > { %v308_v34 = vsel %vm307_vm6, %v7001_v26, 0  ;;  %vm305_vm4 = vcmp.gt.s32.totalorder %v6999_v29, 0  ;;  %vm424_vm9 = vcmp.ne.f32.partialorder %v200_v20, %v200_v20  ;;  %v234_v38 = vmul.f32 32.0, %v202_v31 }
  0x5d   : > { %509 = vperm.xlu1 %7095, %v452_v27   ;;  %506 = vperm.xlu0 %7094, %v451_v32   ;;  %vm371_vm10 = vcmp.lt.s32.totalorder %v308_v34, 31  ;;  %v306_v36 = vsel %vm305_vm4, %v6999_v29, 0  ;;  %v7002_v37 = vtrunc.f32 %v231_v33  ;;  %v7005_v41 = vcvt.f32.s32 %v7004_v35 }
  0x5e   : > { %v372_v40 = vsel %vm371_vm10, %v308_v34, 31  ;;  %vm369_vm7 = vcmp.lt.s32.totalorder %v306_v36, 31  ;;  %vm423_vm11 = vcmp.ne.f32.partialorder %v199_v24, %v199_v24  ;;  %v7008_v46 = vtrunc.f32 %v234_v38 }
  0x5f   : > { %v454_v43 = vsel %vm422_vm3, 32, %v372_v40  ;;  %v370_v44 = vsel %vm369_vm7, %v306_v36, 31  ;;  %v7003_v45 = vcvt.f32.s32 %v7002_v37  ;;  %vm311_vm12 = vcmp.gt.s32.totalorder %v7005_v41, 0  ;;  %v212_v40 = vld [vmem:[%s7307_s23 + $0xd8] sm:$0xff] }
  0x60   : > { %v453_v47 = vsel %vm421_vm8, 32, %v370_v44  ;;  %vm426_vm13 = vcmp.ne.f32.partialorder %v202_v31, %v202_v31  ;;  %v233_v48 = vmul.f32 32.0, %v201_v39  ;;  %v312_v49 = vsel %vm311_vm12, %v7005_v41, 0  ;;  %v211_v44 = vld [vmem:[%s7307_s23 + $0xd0] sm:$0xff] }
  0x61   : > { %515 = vperm.xlu1 %7095, %v454_v43   ;;  %512 = vperm.xlu0 %7094, %v453_v47   ;;  %vm309_vm14 = vcmp.gt.s32.totalorder %v7003_v45, 0  ;;  %v7009_v50 = vcvt.f32.s32 %v7008_v46  ;;  %v236_v51 = vmul.f32 32.0, %v204_v42  ;;  %vm375_vm15 = vcmp.lt.s32.totalorder %v312_v49, 31 }
  0x62   : > { %v310_v52 = vsel %vm309_vm14, %v7003_v45, 0  ;;  %v7006_v53 = vtrunc.f32 %v233_v48  ;;  %vm425_vm0 = vcmp.ne.f32.partialorder %v201_v39, %v201_v39  ;;  %v376_v55 = vsel %vm375_vm15, %v312_v49, 31 }
  0x63   : > { %vm373_vm1 = vcmp.lt.s32.totalorder %v310_v52, 31  ;;  %vm315_vm5 = vcmp.gt.s32.totalorder %v7009_v50, 0  ;;  %v7012_v56 = vtrunc.f32 %v236_v51  ;;  %v456_v58 = vsel %vm424_vm9, 32, %v376_v55  ;;  %v214_v51 = vld [vmem:[%s7307_s23 + $0xe8] sm:$0xff] }
  0x64   : > { %v374_v59 = vsel %vm373_vm1, %v310_v52, 31  ;;  %v316_v60 = vsel %vm315_vm5, %v7009_v50, 0  ;;  %v7007_v61 = vcvt.f32.s32 %v7006_v53  ;;  %v235_v0 = vmul.f32 32.0, %v203_v54 }
  0x65   : > { %521 = vperm.xlu1 %7095, %v456_v58   ;;  %v455_v62 = vsel %vm423_vm11, 32, %v374_v59  ;;  %vm379_vm2 = vcmp.lt.s32.totalorder %v316_v60, 31  ;;  %v7013_v63 = vcvt.f32.s32 %v7012_v56  ;;  %vm428_vm6 = vcmp.ne.f32.partialorder %v204_v42, %v204_v42  ;;  %v7391_v59 = vld [vmem:[%s7307_s23 + $0xe0] sm:$0xff] }
  0x66   : > { %518 = vperm.xlu0 %7094, %v455_v62   ;;  %v380_v1 = vsel %vm379_vm2, %v316_v60, 31  ;;  %vm313_vm3 = vcmp.gt.s32.totalorder %v7007_v61, 0  ;;  %v238_v2 = vmul.f32 32.0, %v206_v57  ;;  %v7010_v6 = vtrunc.f32 %v235_v0  ;;  %v7394_v62 = vld [vmem:[%s7307_s23 + $0xf8] sm:$0xff] }
  0x67   : > { %v458_v4 = vsel %vm426_vm13, 32, %v380_v1  ;;  %v314_v5 = vsel %vm313_vm3, %v7007_v61, 0  ;;  %vm319_vm8 = vcmp.gt.s32.totalorder %v7013_v63, 0  ;;  %vm427_vm9 = vcmp.ne.f32.partialorder %v203_v54, %v203_v54 }
  0x68   : > { %vm377_vm4 = vcmp.lt.s32.totalorder %v314_v5, 31  ;;  %v320_v7 = vsel %vm319_vm8, %v7013_v63, 0  ;;  %v7016_v8 = vtrunc.f32 %v238_v2  ;;  %v7011_v11 = vcvt.f32.s32 %v7010_v6 }
  0x69   : > { %527 = vperm.xlu1 %7095, %v458_v4   ;;  %v378_v10 = vsel %vm377_vm4, %v314_v5, 31  ;;  %vm383_vm10 = vcmp.lt.s32.totalorder %v320_v7, 31  ;;  %v237_v12 = vmul.f32 32.0, %v205_v3  ;;  %vm430_vm7 = vcmp.ne.f32.partialorder %v206_v57, %v206_v57 }
  0x6a   : > { %v457_v14 = vsel %vm425_vm0, 32, %v378_v10  ;;  %v384_v15 = vsel %vm383_vm10, %v320_v7, 31  ;;  %v7017_v16 = vcvt.f32.s32 %v7016_v8  ;;  %vm317_vm11 = vcmp.gt.s32.totalorder %v7011_v11, 0  ;;  %v7401_v10 = vld [vmem:[%s7307_s23 + $0xf0] sm:$0xff] }
  0x6b   : > { %524 = vperm.xlu0 %7094, %v457_v14   ;;  %v460_v17 = vsel %vm428_vm6, 32, %v384_v15  ;;  %v7014_v18 = vtrunc.f32 %v237_v12  ;;  %v240_v19 = vmul.f32 32.0, %v208_v9  ;;  %v318_v20 = vsel %vm317_vm11, %v7011_v11, 0 }
  0x6c   : > { %vm323_vm12 = vcmp.gt.s32.totalorder %v7017_v16, 0  ;;  %vm429_vm13 = vcmp.ne.f32.partialorder %v205_v3, %v205_v3  ;;  %v239_v21 = vmul.f32 32.0, %v207_v13  ;;  %vm381_vm14 = vcmp.lt.s32.totalorder %v318_v20, 31 }
  0x6d   : > { %533 = vperm.xlu1 %7095, %v460_v17   ;;  %v324_v22 = vsel %vm323_vm12, %v7017_v16, 0  ;;  %v7015_v23 = vcvt.f32.s32 %v7014_v18  ;;  %v7020_v24 = vtrunc.f32 %v240_v19  ;;  %v382_v26 = vsel %vm381_vm14, %v318_v20, 31 }
  0x6e   : > { %vm387_vm15 = vcmp.lt.s32.totalorder %v324_v22, 31  ;;  %vm432_vm0 = vcmp.ne.f32.partialorder %v208_v9, %v208_v9  ;;  %v7018_v27 = vtrunc.f32 %v239_v21  ;;  %v459_v29 = vsel %vm427_vm9, 32, %v382_v26  ;;  %v7408_v21 = vld [vmem:[#allocation2 + $0x28] sm:$0xff] }
  0x6f   : > { %v388_v30 = vsel %vm387_vm15, %v324_v22, 31  ;;  %vm321_vm1 = vcmp.gt.s32.totalorder %v7015_v23, 0  ;;  %v7021_v31 = vcvt.f32.s32 %v7020_v24  ;;  %530 = vperm.xlu0 %7094, %v459_v29   ;;  %v242_v35 = vmul.f32 32.0, %v210_v25  ;;  %v7413_v24 = vld [vmem:[#allocation2 + $0x18] sm:$0xff] }
  0x70   : > { %v462_v32 = vsel %vm430_vm7, 32, %v388_v30  ;;  %v322_v33 = vsel %vm321_vm1, %v7015_v23, 0  ;;  %v7019_v34 = vcvt.f32.s32 %v7018_v27  ;;  %vm431_vm3 = vcmp.ne.f32.partialorder %v207_v13, %v207_v13  ;;  %v7403_v13 = vld [vmem:[#allocation2 + $0x8] sm:$0xff]  ;;  %v7419_v30 = vld [vmem:[#allocation2 + $0x38] sm:$0xff] }
  0x71   : > { %539 = vperm.xlu1 %7095, %v462_v32   ;;  %vm385_vm5 = vcmp.lt.s32.totalorder %v322_v33, 31  ;;  %vm327_vm2 = vcmp.gt.s32.totalorder %v7021_v31, 0  ;;  %v241_v36 = vmul.f32 32.0, %v209_v28  ;;  %v7024_v39 = vtrunc.f32 %v242_v35  ;;  %v671_v35 = vld [vmem:[#allocation2 + $0x20] sm:$0xff] }
  0x72   : > { %v386_v37 = vsel %vm385_vm5, %v322_v33, 31  ;;  %v328_v38 = vsel %vm327_vm2, %v7021_v31, 0  ;;  %vm325_vm6 = vcmp.gt.s32.totalorder %v7019_v34, 0  ;;  %v244_v50 = vmul.f32 32.0, %v212_v40 }
  0x73   : > { %v461_v41 = vsel %vm429_vm13, 32, %v386_v37  ;;  %vm391_vm8 = vcmp.lt.s32.totalorder %v328_v38, 31  ;;  %v326_v42 = vsel %vm325_vm6, %v7019_v34, 0  ;;  %v7022_v43 = vtrunc.f32 %v241_v36  ;;  %v667_v34 = vld [vmem:[#allocation2] sm:$0xff]  ;;  %v669_v36 = vld [vmem:[#allocation2 + $0x10] sm:$0xff] }
  0x74   : > { %536 = vperm.xlu0 %7094, %v461_v41   ;;  %v392_v45 = vsel %vm391_vm8, %v328_v38, 31  ;;  %vm389_vm4 = vcmp.lt.s32.totalorder %v326_v42, 31  ;;  %v7025_v46 = vcvt.f32.s32 %v7024_v39  ;;  %vm434_vm10 = vcmp.ne.f32.partialorder %v210_v25, %v210_v25 }
  0x75   : > { %v464_v47 = vsel %vm432_vm0, 32, %v392_v45  ;;  %v390_v48 = vsel %vm389_vm4, %v326_v42, 31  ;;  %v7023_v49 = vcvt.f32.s32 %v7022_v43  ;;  %v243_v53 = vmul.f32 32.0, %v211_v44 }
  0x76   : > { %545 = vperm.xlu1 %7095, %v464_v47   ;;  %v463_v52 = vsel %vm431_vm3, 32, %v390_v48  ;;  %vm331_vm9 = vcmp.gt.s32.totalorder %v7025_v46, 0  ;;  %vm433_vm11 = vcmp.ne.f32.partialorder %v209_v28, %v209_v28  ;;  %v7028_v55 = vtrunc.f32 %v244_v50  ;;  %v676_v47 = vld [vmem:[#allocation2 + $0x48] sm:$0xff] }
  0x77   : > { %v332_v54 = vsel %vm331_vm9, %v7025_v46, 0  ;;  %vm329_vm7 = vcmp.gt.s32.totalorder %v7023_v49, 0  ;;  %v7026_v57 = vtrunc.f32 %v243_v53  ;;  %v246_v58 = vmul.f32 32.0, %v214_v51  ;;  %v680_v48 = vld [vmem:[#allocation2 + $0x68] sm:$0xff]  ;;  %v675_v53 = vld [vmem:[#allocation2 + $0x40] sm:$0xff] }
  0x78   : > { %542 = vperm.xlu0 %7094, %v463_v52   ;;  %vm395_vm12 = vcmp.lt.s32.totalorder %v332_v54, 31  ;;  %v330_v56 = vsel %vm329_vm7, %v7023_v49, 0  ;;  %v7029_v61 = vcvt.f32.s32 %v7028_v55  ;;  %vm436_vm14 = vcmp.ne.f32.partialorder %v212_v40, %v212_v40  ;;  %v673_v40 = vld [vmem:[#allocation2 + $0x30] sm:$0xff]  ;;  %v682_v52 = vld [vmem:[#allocation2 + $0x78] sm:$0xff] }
  0x79   : > { %v396_v60 = vsel %vm395_vm12, %v332_v54, 31  ;;  %vm393_vm13 = vcmp.lt.s32.totalorder %v330_v56, 31  ;;  %v7027_v1 = vcvt.f32.s32 %v7026_v57  ;;  %v7032_v2 = vtrunc.f32 %v246_v58  ;;  %v679_v58 = vld [vmem:[#allocation2 + $0x60] sm:$0xff] }
  0x7a   : > { %v466_v63 = vsel %vm434_vm10, 32, %v396_v60  ;;  %v394_v0 = vsel %vm393_vm13, %v330_v56, 31  ;;  %vm335_vm15 = vcmp.gt.s32.totalorder %v7029_v61, 0  ;;  %vm435_vm0 = vcmp.ne.f32.partialorder %v211_v44, %v211_v44  ;;  %v681_v60 = vld [vmem:[#allocation2 + $0x70] sm:$0xff] }
  0x7b   : > { %551 = vperm.xlu1 %7095, %v466_v63   ;;  %v465_v3 = vsel %vm433_vm11, 32, %v394_v0  ;;  %v245_v4 = vmul.f32 32.0, %v7391_v59  ;;  %v336_v5 = vsel %vm335_vm15, %v7029_v61, 0  ;;  %vm333_vm1 = vcmp.gt.s32.totalorder %v7027_v1, 0 }
  0x7c   : > { %548 = vperm.xlu0 %7094, %v465_v3   ;;  %v7033_v6 = vcvt.f32.s32 %v7032_v2  ;;  %v248_v7 = vmul.f32 32.0, %v7394_v62  ;;  %vm399_vm5 = vcmp.lt.s32.totalorder %v336_v5, 31  ;;  %v334_v8 = vsel %vm333_vm1, %v7027_v1, 0 }
  0x7d   : > { %vm438_vm2 = vcmp.ne.f32.partialorder %v214_v51, %v214_v51  ;;  %v7030_v9 = vtrunc.f32 %v245_v4  ;;  %v400_v11 = vsel %vm399_vm5, %v336_v5, 31  ;;  %vm397_vm3 = vcmp.lt.s32.totalorder %v334_v8, 31  ;;  %v678_v51 = vld [vmem:[#allocation2 + $0x58] sm:$0xff] }
  0x7e   : > { %vm339_vm6 = vcmp.gt.s32.totalorder %v7033_v6, 0  ;;  %v7036_v12 = vtrunc.f32 %v248_v7  ;;  %v468_v14 = vsel %vm436_vm14, 32, %v400_v11  ;;  %v398_v15 = vsel %vm397_vm3, %v334_v8, 31 }
  0x7f   : > { %v340_v16 = vsel %vm339_vm6, %v7033_v6, 0  ;;  %v7031_v17 = vcvt.f32.s32 %v7030_v9  ;;  %557 = vperm.xlu1 %7095, %v468_v14   ;;  %v467_v18 = vsel %vm435_vm0, 32, %v398_v15  ;;  %v247_v20 = vmul.f32 32.0, %v7401_v10  ;;  %v7462_v9 = vld [vmem:[#allocation2 + $0x88] sm:$0xff] }
  0x80   : > { %vm403_vm8 = vcmp.lt.s32.totalorder %v340_v16, 31  ;;  %v7037_v19 = vcvt.f32.s32 %v7036_v12  ;;  %554 = vperm.xlu0 %7094, %v467_v18   ;;  %vm437_vm9 = vcmp.ne.f32.partialorder %v7391_v59, %v7391_v59  ;;  %v731_v23 = vand.u32 4294901760, %v7403_v13  ;;  %v677_v59 = vld [vmem:[#allocation2 + $0x50] sm:$0xff]  ;;  %v7472_v15 = vld [vmem:[#allocation2 + $0xa8] sm:$0xff] }
  0x81   : > { %v404_v22 = vsel %vm403_vm8, %v340_v16, 31  ;;  %vm337_vm4 = vcmp.gt.s32.totalorder %v7031_v17, 0  ;;  %v7034_v27 = vtrunc.f32 %v247_v20  ;;  %vm440_vm11 = vcmp.ne.f32.partialorder %v7394_v62, %v7394_v62  ;;  %v7474_v16 = vld [vmem:[#allocation2 + $0x98] sm:$0xff] }
  0x82   : > { %v470_v25 = vsel %vm438_vm2, 32, %v404_v22  ;;  %v338_v26 = vsel %vm337_vm4, %v7031_v17, 0  ;;  %vm343_vm10 = vcmp.gt.s32.totalorder %v7037_v19, 0  ;;  %v10173_v29 = vand.u32 4294901760, %v7408_v21  ;;  %v7476_v17 = vld [vmem:[#allocation2 + $0xb8] sm:$0xff] }
  0x83   : > { %vm401_vm7 = vcmp.lt.s32.totalorder %v338_v26, 31  ;;  %v344_v28 = vsel %vm343_vm10, %v7037_v19, 0  ;;  %563 = vperm.xlu1 %7095, %v470_v25   ;;  %v7035_v32 = vcvt.f32.s32 %v7034_v27  ;;  %v10172_v33 = vand.u32 4294901760, %v7413_v24  ;;  %v683_v25 = vld [vmem:[#allocation2 + $0x80] sm:$0xff] }
  0x84   : > { %v402_v31 = vsel %vm401_vm7, %v338_v26, 31  ;;  %vm407_vm12 = vcmp.lt.s32.totalorder %v344_v28, 31  ;;  %v7429_v39 = vpack.c.bf16 %v10173_v29, %v731_v23  ;;  %vm439_vm14 = vcmp.ne.f32.partialorder %v7401_v10, %v7401_v10  ;;  %v687_v26 = vld [vmem:[#allocation2 + $0xa0] sm:$0xff] }
  0x85   : > { %v469_v37 = vsel %vm437_vm9, 32, %v402_v31  ;;  %v408_v38 = vsel %vm407_vm12, %v344_v28, 31  ;;  %vm341_vm13 = vcmp.gt.s32.totalorder %v7035_v32, 0  ;;  %v10171_v42 = vand.u32 4294901760, %v7419_v30 }
  0x86   : > { %10633 = vst [vmem:[#allocation8_spill] sm:$0xff] %v7429_v39  ;;  %560 = vperm.xlu0 %7094, %v469_v37   ;;  %v472_v41 = vsel %vm440_vm11, 32, %v408_v38  ;;  %v342_v43 = vsel %vm341_vm13, %v7035_v32, 0  ;;  %5951 = vmatprep.subr.bf16.mxu0 %v7429_v39  ;;  %v733_v44 = vand.u32 4294901760, %v667_v34  ;;  %v737_v45 = vand.u32 4294901760, %v671_v35  ;;  %v720_v39 = vld [vmem:[#allocation2 + $0x1a8] sm:$0xff] }
  0x87   : > { %v3107_v46 = vand.u32 4294901760, %v669_v36  ;;  %569 = vperm.xlu1 %7095, %v472_v41   ;;  %vm405_vm15 = vcmp.lt.s32.totalorder %v342_v43, 31  ;;  %v7442_v49 = vpack.c.bf16 %v10171_v42, %v10172_v33  ;;  %v3111_v50 = vand.u32 4294901760, %v673_v40 }
  0x88   : > { %v406_v54 = vsel %vm405_vm15, %v342_v43, 31  ;;  %v7444_v55 = vpack.c.bf16 %v737_v45, %v733_v44  ;;  %v7446_v56 = vsub.f32 %v667_v34, %v733_v44  ;;  %v7448_v57 = vsub.f32 %v671_v35, %v737_v45  ;;  %v7495_v34 = vld [vmem:[#allocation2 + $0x90] sm:$0xff]  ;;  %v7506_v44 = vld [vmem:[#allocation2 + $0xc8] sm:$0xff] }
  0x89   : > { %10634 = vst [vmem:[#allocation9_spill] sm:$0xff] %v7442_v49  ;;  %v471_v61 = vsel %vm439_vm14, 32, %v406_v54  ;;  %6143 = vmatprep.subr.bf16.mxu1 %v7442_v49  ;;  %v7454_v62 = vpack.c.bf16 %v3111_v50, %v3107_v46  ;;  %v7456_v63 = vsub.f32 %v669_v36, %v3107_v46  ;;  %v7458_v0 = vsub.f32 %v673_v40, %v3111_v50  ;;  %v7503_v40 = vld [vmem:[#allocation2 + $0xb0] sm:$0xff]  ;;  %v7508_v45 = vld [vmem:[#allocation2 + $0xe8] sm:$0xff]  ;;  %v7510_v46 = vld [vmem:[#allocation2 + $0xd8] sm:$0xff] }
  0x8a   : > { %10635 = vst [vmem:[#allocation10_spill] sm:$0xff] %v7444_v55  ;;  %10636 = vst [vmem:[#allocation11_spill] sm:$0xff] %v7446_v56  ;;  %566 = vperm.xlu0 %7094, %v471_v61   ;;  %5953 = vmatpush1.bf16.msra.mxu0 %v7444_v55  ;;  %v739_v1 = vand.u32 4294901760, %v676_v47  ;;  %v743_v2 = vand.u32 4294901760, %v680_v48  ;;  %v3113_v3 = vand.u32 4294901760, %v678_v51  ;;  %v3117_v4 = vand.u32 4294901760, %v682_v52 }
  0x8b   : > { %10637 = vst [vmem:[#allocation12_spill] sm:$0xff] %v7448_v57  ;;  %10638 = vst [vmem:[#allocation13_spill] sm:$0xff] %v7454_v62  ;;  %6145 = vmatpush1.bf16.msra.mxu1 %v7454_v62  ;;  %v741_v5 = vand.u32 4294901760, %v675_v53  ;;  %v745_v6 = vand.u32 4294901760, %v679_v58  ;;  %v3115_v7 = vand.u32 4294901760, %v677_v59  ;;  %v3119_v8 = vand.u32 4294901760, %v681_v60 }
  0x8c   : > { %10639 = vst [vmem:[#allocation14_spill] sm:$0xff] %v7456_v63  ;;  %10640 = vst [vmem:[#allocation15_spill] sm:$0xff] %v7458_v0  ;;  %v7464_v10 = vpack.c.bf16 %v743_v2, %v739_v1  ;;  %v7466_v11 = vsub.f32 %v676_v47, %v739_v1  ;;  %v7468_v12 = vsub.f32 %v680_v48, %v743_v2  ;;  %v10168_v32 = vand.u32 4294901760, %v7462_v9  ;;  %v709_v55 = vld [vmem:[#allocation2 + $0x150] sm:$0xff] }
  0x8d   : > { %v7470_v14 = vpack.c.bf16 %v3117_v4, %v3113_v3  ;;  %v7478_v18 = vsub.f32 %v678_v51, %v3113_v3  ;;  %v7480_v19 = vsub.f32 %v682_v52, %v3117_v4  ;;  %v7482_v20 = vpack.c.bf16 %v745_v6, %v741_v5  ;;  %v7525_v51 = vld [vmem:[#allocation2 + $0xf8] sm:$0xff]  ;;  %v691_v52 = vld [vmem:[#allocation2 + $0xc0] sm:$0xff]  ;;  %v713_v49 = vld [vmem:[#allocation2 + $0x170] sm:$0xff] }
  0x8e   : > { %10641 = vst [vmem:[#allocation16_spill] sm:$0xff] %v7464_v10  ;;  %10642 = vst [vmem:[#allocation17_spill] sm:$0xff] %v7466_v11  ;;  %v7484_v22 = vsub.f32 %v675_v53, %v741_v5  ;;  %5955 = vmatprep.subr.bf16.mxu0 %v7464_v10  ;;  %v7488_v27 = vsub.f32 %v679_v58, %v745_v6  ;;  %v7490_v28 = vpack.c.bf16 %v3119_v8, %v3115_v7  ;;  %v695_v53 = vld [vmem:[#allocation2 + $0xe0] sm:$0xff]  ;;  %v7541_v6 = vld [vmem:[#allocation2 + $0xd0] sm:$0xff] }
  0x8f   : > { %10643 = vst [vmem:[#allocation18_spill] sm:$0xff] %v7468_v12  ;;  %10644 = vst [vmem:[#allocation19_spill] sm:$0xff] %v7470_v14  ;;  %6147 = vmatprep.subr.bf16.mxu1 %v7470_v14  ;;  %v7492_v31 = vsub.f32 %v677_v59, %v3115_v7  ;;  %5957 = vmatpush1.bf16.msra.mxu0 %v7482_v20  ;;  %v7498_v35 = vsub.f32 %v681_v60, %v3119_v8  ;;  %v10167_v36 = vand.u32 4294901760, %v7472_v15  ;;  %v7543_v7 = vld [vmem:[#allocation2 + $0xf0] sm:$0xff] }
  0x90   : > { %10645 = vst [vmem:[#allocation20_spill] sm:$0xff] %v7478_v18  ;;  %10646 = vst [vmem:[#allocation21_spill] sm:$0xff] %v7480_v19  ;;  %v10164_v37 = vand.u32 4294901760, %v7474_v16  ;;  %v10161_v38 = vand.u32 4294901760, %v7476_v17  ;;  %6149 = vmatpush1.bf16.msra.mxu1 %v7490_v28  ;;  %v749_v41 = vand.u32 4294901760, %v683_v25  ;;  %v753_v43 = vand.u32 4294901760, %v687_v26 }
  0x91   : > { %10647 = vst [vmem:[#allocation22_spill] sm:$0xff] %v7482_v20  ;;  %10648 = vst [vmem:[#allocation23_spill] sm:$0xff] %v7484_v22  ;;  %v7516_v47 = vpack.c.bf16 %v10167_v36, %v10168_v32  ;;  %v10163_v50 = vand.u32 4294901760, %v7495_v34  ;;  %v10162_v60 = vand.u32 4294901760, %v7503_v40  ;;  %v10166_v61 = vand.u32 4294901760, %v7506_v44  ;;  %v707_v20 = vld [vmem:[#allocation2 + $0x140] sm:$0xff] }
  0x92   : > { %10649 = vst [vmem:[#allocation24_spill] sm:$0xff] %v7488_v27  ;;  %10650 = vst [vmem:[#allocation25_spill] sm:$0xff] %v7490_v28  ;;  %v7522_v48 = vpack.c.bf16 %v10161_v38, %v10164_v37  ;;  %v7527_v54 = vpack.c.bf16 %v753_v43, %v749_v41  ;;  %v7529_v58 = vsub.f32 %v683_v25, %v749_v41  ;;  %v10165_v1 = vand.u32 4294901760, %v7508_v45  ;;  %v7559_v41 = vld [vmem:[#allocation2 + $0x128] sm:$0xff]  ;;  %v703_v37 = vld [vmem:[#allocation2 + $0x120] sm:$0xff] }
  0x93   : > { %10651 = vst [vmem:[#allocation26_spill] sm:$0xff] %v7492_v31  ;;  %10652 = vst [vmem:[#allocation27_spill] sm:$0xff] %v7498_v35  ;;  %v7531_v59 = vsub.f32 %v687_v26, %v753_v43  ;;  %5959 = vmatprep.subr.bf16.mxu0 %v7516_v47  ;;  %v10170_v2 = vand.u32 4294901760, %v7510_v46  ;;  %v10169_v3 = vand.u32 4294901760, %v7525_v51  ;;  %v757_v4 = vand.u32 4294901760, %v691_v52  ;;  %v7557_v26 = vld [vmem:[#allocation2 + $0x108] sm:$0xff] }
  0x94   : > { %10653 = vst [vmem:[#allocation28_spill] sm:$0xff] %v7516_v47  ;;  %10654 = vst [vmem:[#allocation29_spill] sm:$0xff] %v7522_v48  ;;  %6151 = vmatprep.subr.bf16.mxu1 %v7522_v48  ;;  %5961 = vmatpush1.bf16.msra.mxu0 %v7527_v54  ;;  %v761_v5 = vand.u32 4294901760, %v695_v53  ;;  %v7549_v8 = vpack.c.bf16 %v10162_v60, %v10163_v50  ;;  %v7555_v25 = vpack.c.bf16 %v10165_v1, %v10166_v61  ;;  %v7561_v43 = vld [vmem:[#allocation2 + $0x118] sm:$0xff]  ;;  %v699_v50 = vld [vmem:[#allocation2 + $0x100] sm:$0xff] }
  0x95   : > { %10655 = vst [vmem:[#allocation30_spill] sm:$0xff] %v7527_v54  ;;  %10656 = vst [vmem:[#allocation31_spill] sm:$0xff] %v7529_v58  ;;  %v7567_v38 = vpack.c.bf16 %v10169_v3, %v10170_v2  ;;  %v7569_v60 = vld [vmem:[#allocation2 + $0x138] sm:$0xff]  ;;  %v7575_v61 = vsub.f32 %v691_v52, %v757_v4  ;;  %v765_v52 = vand.u32 4294901760, %v699_v50  ;;  %v7590_v32 = vsub.f32 %v7403_v13, %v731_v23 }
  0x96   : > { %10657 = vst [vmem:[#allocation32_spill] sm:$0xff] %v7531_v59  ;;  %10658 = vst [vmem:[#allocation33_spill] sm:$0xff] %v7549_v8  ;;  %6153 = vmatpush1.bf16.msra.mxu1 %v7549_v8  ;;  %5963 = vmatprep.subr.bf16.mxu0 %v7555_v25  ;;  %v7573_v1 = vpack.c.bf16 %v761_v5, %v757_v4  ;;  %v7577_v36 = vsub.f32 %v695_v53, %v761_v5  ;;  %v769_v4 = vand.u32 4294901760, %v703_v37  ;;  %v701_v53 = vld [vmem:[#allocation2 + $0x110] sm:$0xff]  ;;  %v710_v8 = vld [vmem:[#allocation2 + $0x158] sm:$0xff] }
  0x97   : > { %10659 = vst [vmem:[#allocation34_spill] sm:$0xff] %v7555_v25  ;;  %10660 = vst [vmem:[#allocation35_spill] sm:$0xff] %v7567_v38  ;;  %6155 = vmatprep.subr.bf16.mxu1 %v7567_v38  ;;  %v705_v5 = vld [vmem:[#allocation2 + $0x130] sm:$0xff]  ;;  %v10664_v3 = vand.u32 4294901760, %v7541_v6  ;;  %v10665_v2 = vand.u32 4294901760, %v7543_v7  ;;  %v10667_v33 = vand.u32 4294901760, %v7557_v26 }
  0x98   : > { %10661 = vst [vmem:[#allocation36_spill] sm:$0xff] %v7573_v1  ;;  %10662 = vst [vmem:[#allocation37_spill] sm:$0xff] %v7575_v61  ;;  %5965 = vmatpush1.bf16.msra.mxu0 %v7573_v1  ;;  %v10668_v1 = vand.u32 4294901760, %v7559_v41  ;;  %v708_v38 = vld [vmem:[#allocation2 + $0x148] sm:$0xff]  ;;  %v10670_v54 = vand.u32 4294901760, %v7408_v21  ;;  %v10672_v23 = vand.u32 4294901760, %v7413_v24 }
  0x99   : > { %10663 = vst [vmem:[#allocation38_spill] sm:$0xff] %v7577_v36  ;;  %v7596_v42 = vpack.c.bf16 %v10665_v2, %v10664_v3  ;;  %v712_v25 = vld [vmem:[#allocation2 + $0x168] sm:$0xff]  ;;  %v10674_v2 = vand.u32 4294901760, %v7419_v30  ;;  %v714_v28 = vld [vmem:[#allocation2 + $0x178] sm:$0xff]  ;;  %v771_v14 = vand.u32 4294901760, %v708_v38  ;;  %v773_v62 = vand.u32 4294901760, %v707_v20 }
  0x9a   : > { %v7602_v29 = vpack.c.bf16 %v10668_v1, %v10667_v33  ;;  %v7607_v13 = vsub.f32 %v7408_v21, %v10670_v54  ;;  %v7612_v48 = vsub.f32 %v7413_v24, %v10672_v23  ;;  %v10676_v33 = vand.u32 4294901760, %v7561_v43  ;;  %v711_v21 = vld [vmem:[#allocation2 + $0x160] sm:$0xff]  ;;  %v722_v36 = vld [vmem:[#allocation2 + $0x1b8] sm:$0xff] }
  0x9b   : > { %10666 = vst [vmem:[#allocation39_spill] sm:$0xff] %v7596_v42  ;;  %v7617_v3 = vsub.f32 %v7419_v30, %v10674_v2  ;;  %v10677_v1 = vand.u32 4294901760, %v7569_v60  ;;  %6157 = vmatpush1.bf16.msra.mxu1 %v7596_v42  ;;  %v7627_v24 = vpack.c.bf16 %v769_v4, %v765_v52  ;;  %v7629_v54 = vsub.f32 %v699_v50, %v765_v52  ;;  %v719_v61 = vld [vmem:[#allocation2 + $0x1a0] sm:$0xff] }
  0x9c   : > { %10669 = vst [vmem:[#allocation40_spill] sm:$0xff] %v7602_v29  ;;  %10671 = vst [vmem:[#allocation41_spill] sm:$0xff] %v7607_v13  ;;  %5967 = vmatprep.subr.bf16.mxu0 %v7602_v29  ;;  %v7631_v23 = vsub.f32 %v703_v37, %v769_v4  ;;  %v3139_v30 = vand.u32 4294901760, %v701_v53  ;;  %v3143_v2 = vand.u32 4294901760, %v705_v5  ;;  %v3149_v42 = vand.u32 4294901760, %v714_v28 }
  0x9d   : > { %10673 = vst [vmem:[#allocation42_spill] sm:$0xff] %v7612_v48  ;;  %10675 = vst [vmem:[#allocation43_spill] sm:$0xff] %v7617_v3  ;;  %v7623_v47 = vpack.c.bf16 %v10677_v1, %v10676_v33  ;;  %v775_v33 = vand.u32 4294901760, %v712_v25  ;;  %v3145_v1 = vand.u32 4294901760, %v710_v8  ;;  %5969 = vmatpush1.bf16.msra.mxu0 %v7627_v24  ;;  %v777_v29 = vand.u32 4294901760, %v711_v21 }
  0x9e   : > { %10679 = vst [vmem:[#allocation45_spill] sm:$0xff] %v7627_v24  ;;  %10680 = vst [vmem:[#allocation46_spill] sm:$0xff] %v7629_v54  ;;  %v7635_v10 = vsub.f32 %v701_v53, %v3139_v30  ;;  %v7637_v50 = vpack.c.bf16 %v3143_v2, %v3139_v30  ;;  %v7639_v37 = vsub.f32 %v705_v5, %v3143_v2  ;;  %v715_v30 = vld [vmem:[#allocation2 + $0x180] sm:$0xff] }
  0x9f   : > { %10678 = vst [vmem:[#allocation44_spill] sm:$0xff] %v7623_v47  ;;  %10681 = vst [vmem:[#allocation47_spill] sm:$0xff] %v7631_v23  ;;  %6159 = vmatprep.subr.bf16.mxu1 %v7623_v47  ;;  %v7641_v52 = vpack.c.bf16 %v775_v33, %v771_v14  ;;  %v7643_v4 = vsub.f32 %v708_v38, %v771_v14  ;;  %v716_v47 = vld [vmem:[#allocation2 + $0x188] sm:$0xff]  ;;  %v718_v23 = vld [vmem:[#allocation2 + $0x198] sm:$0xff]  ;;  %v7645_v54 = vsub.f32 %v712_v25, %v775_v33 }
  0xa0   : > { %10682 = vst [vmem:[#allocation48_spill] sm:$0xff] %v7635_v10  ;;  %10683 = vst [vmem:[#allocation49_spill] sm:$0xff] %v7637_v50  ;;  %v7647_v53 = vpack.c.bf16 %v3149_v42, %v3145_v1  ;;  %v7649_v24 = vsub.f32 %v710_v8, %v3145_v1  ;;  %v7651_v10 = vsub.f32 %v714_v28, %v3149_v42  ;;  %6161 = vmatpush1.bf16.msra.mxu1 %v7637_v50 }
  0xa1   : > { %10684 = vst [vmem:[#allocation50_spill] sm:$0xff] %v7639_v37  ;;  %10685 = vst [vmem:[#allocation51_spill] sm:$0xff] %v7641_v52  ;;  %5971 = vmatprep.subr.bf16.mxu0 %v7641_v52  ;;  %v7655_v14 = vpack.c.bf16 %v777_v29, %v773_v62  ;;  %v7657_v38 = vsub.f32 %v707_v20, %v773_v62  ;;  %v7659_v5 = vsub.f32 %v711_v21, %v777_v29  ;;  %v727_v37 = vld [vmem:[#allocation2 + $0x1e0] sm:$0xff] }
  0xa2   : > { %10686 = vst [vmem:[#allocation52_spill] sm:$0xff] %v7643_v4  ;;  %10687 = vst [vmem:[#allocation53_spill] sm:$0xff] %v7645_v54  ;;  %v3147_v25 = vand.u32 4294901760, %v709_v55  ;;  %6163 = vmatprep.subr.bf16.mxu1 %v7647_v53  ;;  %v3151_v8 = vand.u32 4294901760, %v713_v49  ;;  %v779_v2 = vand.u32 4294901760, %v716_v47  ;;  %v783_v42 = vand.u32 4294901760, %v720_v39 }
  0xa3   : > { %10688 = vst [vmem:[#allocation54_spill] sm:$0xff] %v7647_v53  ;;  %10689 = vst [vmem:[#allocation55_spill] sm:$0xff] %v7649_v24  ;;  %v3153_v28 = vand.u32 4294901760, %v718_v23  ;;  %5973 = vmatpush1.bf16.msra.mxu0 %v7655_v14  ;;  %v3157_v1 = vand.u32 4294901760, %v722_v36  ;;  %v781_v50 = vand.u32 4294901760, %v715_v30  ;;  %v785_v52 = vand.u32 4294901760, %v719_v61 }
  0xa4   : > { %10690 = vst [vmem:[#allocation56_spill] sm:$0xff] %v7651_v10  ;;  %10691 = vst [vmem:[#allocation57_spill] sm:$0xff] %v7655_v14  ;;  %v7663_v33 = vsub.f32 %v709_v55, %v3147_v25  ;;  %v717_v10 = vld [vmem:[#allocation2 + $0x190] sm:$0xff]  ;;  %v7665_v62 = vpack.c.bf16 %v3151_v8, %v3147_v25  ;;  %v7667_v29 = vsub.f32 %v713_v49, %v3151_v8  ;;  %v724_v53 = vld [vmem:[#allocation2 + $0x1c8] sm:$0xff] }
  0xa5   : > { %10692 = vst [vmem:[#allocation58_spill] sm:$0xff] %v7657_v38  ;;  %10693 = vst [vmem:[#allocation59_spill] sm:$0xff] %v7659_v5  ;;  %v721_v24 = vld [vmem:[#allocation2 + $0x1b0] sm:$0xff]  ;;  %v7669_v20 = vpack.c.bf16 %v783_v42, %v779_v2  ;;  %v7671_v21 = vsub.f32 %v716_v47, %v779_v2  ;;  %v728_v5 = vld [vmem:[#allocation2 + $0x1e8] sm:$0xff]  ;;  %v7673_v54 = vsub.f32 %v720_v39, %v783_v42  ;;  %v3155_v39 = vand.u32 4294901760, %v717_v10 }
  0xa6   : > { %10694 = vst [vmem:[#allocation60_spill] sm:$0xff] %v7663_v33  ;;  %10695 = vst [vmem:[#allocation61_spill] sm:$0xff] %v7665_v62  ;;  %v726_v38 = vld [vmem:[#allocation2 + $0x1d8] sm:$0xff]  ;;  %v7675_v55 = vpack.c.bf16 %v3157_v1, %v3153_v28  ;;  %v7677_v14 = vsub.f32 %v718_v23, %v3153_v28  ;;  %v7679_v33 = vsub.f32 %v722_v36, %v3157_v1  ;;  %v723_v25 = vld [vmem:[#allocation2 + $0x1c0] sm:$0xff]  ;;  %6165 = vmatpush1.bf16.msra.mxu1 %v7665_v62 }
  0xa7   : > { %10696 = vst [vmem:[#allocation62_spill] sm:$0xff] %v7669_v20  ;;  %v730_v4 = vld [vmem:[#allocation2 + $0x1f8] sm:$0xff]  ;;  %5975 = vmatprep.subr.bf16.mxu0 %v7669_v20  ;;  %v7683_v49 = vpack.c.bf16 %v785_v52, %v781_v50  ;;  %v7685_v47 = vsub.f32 %v715_v30, %v781_v50  ;;  %v7687_v8 = vsub.f32 %v719_v61, %v785_v52  ;;  %v3159_v23 = vand.u32 4294901760, %v721_v24  ;;  %v729_v30 = vld [vmem:[#allocation2 + $0x1f0] sm:$0xff] }
  0xa8   : > { %10697 = vst [vmem:[#allocation63_spill] sm:$0xff] %v7675_v55  ;;  %10698 = vst [vmem:[#allocation64_spill] sm:$0xff] %v7677_v14  ;;  %6167 = vmatprep.subr.bf16.mxu1 %v7675_v55  ;;  %v787_v2 = vand.u32 4294901760, %v724_v53  ;;  %v791_v36 = vand.u32 4294901760, %v728_v5  ;;  %v3161_v42 = vand.u32 4294901760, %v726_v38  ;;  %v7691_v28 = vsub.f32 %v717_v10, %v3155_v39 }
  0xa9   : > { %10699 = vst [vmem:[#allocation65_spill] sm:$0xff] %v7679_v33  ;;  %10700 = vst [vmem:[#allocation66_spill] sm:$0xff] %v7683_v49  ;;  %5977 = vmatpush1.bf16.msra.mxu0 %v7683_v49  ;;  %v3165_v1 = vand.u32 4294901760, %v730_v4  ;;  %v789_v62 = vand.u32 4294901760, %v723_v25  ;;  %v793_v20 = vand.u32 4294901760, %v727_v37  ;;  %v725_v33 = vld [vmem:[#allocation2 + $0x1d0] sm:$0xff]  ;;  %v7693_v14 = vpack.c.bf16 %v3159_v23, %v3155_v39 }
  0xaa   : > { %10701 = vst [vmem:[#allocation67_spill] sm:$0xff] %v7687_v8  ;;  %v7695_v50 = vsub.f32 %v721_v24, %v3159_v23  ;;  %v7697_v61 = vpack.c.bf16 %v791_v36, %v787_v2  ;;  %v7699_v52 = vsub.f32 %v724_v53, %v787_v2  ;;  %v7701_v55 = vsub.f32 %v728_v5, %v791_v36 }
  0xab   : > { %10702 = vst [vmem:[#allocation68_spill] sm:$0xff] %v7693_v14  ;;  %v7703_v8 = vpack.c.bf16 %v3165_v1, %v3161_v42  ;;  %v7705_v49 = vsub.f32 %v726_v38, %v3161_v42  ;;  %v7707_v10 = vsub.f32 %v730_v4, %v3165_v1  ;;  %6169 = vmatpush1.bf16.msra.mxu1 %v7693_v14  ;;  %v3163_v53 = vand.u32 4294901760, %v725_v33 }
  0xac   : > { %10703 = vst [vmem:[#allocation69_spill] sm:$0xff] %v7697_v61  ;;  %5979 = vmatprep.subr.bf16.mxu0 %v7697_v61  ;;  %v7711_v39 = vpack.c.bf16 %v793_v20, %v789_v62  ;;  %v7713_v24 = vsub.f32 %v723_v25, %v789_v62  ;;  %v7715_v23 = vsub.f32 %v727_v37, %v793_v20  ;;  %v3167_v5 = vand.u32 4294901760, %v729_v30 }
  0xad   : > { %10704 = vst [vmem:[#allocation70_spill] sm:$0xff] %v7703_v8  ;;  %6171 = vmatprep.subr.bf16.mxu1 %v7703_v8  ;;  %v10246_v2 = vand.u32 4294901760, %v7590_v32  ;;  %v10249_v38 = vand.u32 4294901760, %v7607_v13  ;;  %v7721_v4 = vsub.f32 %v725_v33, %v3163_v53  ;;  %v10250_v36 = vmov 0.0  }
  0xae   : > { %10705 = vst [vmem:[#allocation71_spill] sm:$0xff] %v7711_v39  ;;  %5981 = vmatpush1.bf16.msra.mxu0 %v7711_v39  ;;  %827 = vmatprep.mubr.f32.mxu0 %v10250_v36  ;;  %v10258_v62 = vand.u32 4294901760, %v7612_v48  ;;  %v7727_v25 = vpack.c.bf16 %v3167_v5, %v3163_v53  ;;  %v7729_v42 = vsub.f32 %v729_v30, %v3167_v5  ;;  %v473_v39 = vlaneseq }
  0xaf   : > { %v1183_v1 = vsub.f32 %v7590_v32, %v10246_v2  ;;  %v1195_v33 = vsub.f32 %v7607_v13, %v10249_v38  ;;  %3201 = vmatprep.mubr.f32.mxu1 %v10250_v36  ;;  %v10707_v53 = vand.u32 4294901760, %v7617_v3  ;;  %v10261_v5 = vand.u32 4294901760, %v7448_v57 }
  0xb0   : > { %10706 = vst [vmem:[#allocation72_spill] sm:$0xff] %v7727_v25  ;;  %v3557_v37 = vsub.f32 %v7612_v48, %v10258_v62  ;;  %6173 = vmatpush1.bf16.msra.mxu1 %v7727_v25  ;;  %v10262_v8 = vand.u32 4294901760, %v7456_v63  ;;  %v10708_v13 = vand.u32 4294901760, %v7446_v56 }
  0xb1   : > { %v3569_v30 = vsub.f32 %v7617_v3, %v10707_v53  ;;  %v1184_v2 = vand.u32 4294901760, %v1183_v1  ;;  %v1196_v20 = vand.u32 4294901760, %v1195_v33  ;;  %v1201_v53 = vsub.f32 %v7448_v57, %v10261_v5 }
  0xb2   : > { %v3558_v36 = vand.u32 4294901760, %v3557_v37  ;;  %v1189_v62 = vsub.f32 %v7446_v56, %v10708_v13  ;;  %v10709_v3 = vand.u32 4294901760, %v7462_v9  ;;  %v10711_v33 = vand.u32 4294901760, %v7472_v15 }
  0xb3   : > { %v3570_v61 = vand.u32 4294901760, %v3569_v30  ;;  %v5982_v14 = vpack.c.bf16 %v1196_v20, %v1184_v2  ;;  %v7764_v37 = vand.u32 127, %v473_v39  ;;  %v10713_v20 = vand.u32 4294901760, %v7474_v16 }
  0xb4   : > { %v7757_v1 = vsub.f32 %v7462_v9, %v10709_v3  ;;  %v7762_v38 = vsub.f32 %v7472_v15, %v10711_v33  ;;  %v10715_v30 = vand.u32 4294901760, %v7476_v17  ;;  %v3563_v9 = vsub.f32 %v7456_v63, %v10262_v8 }
  0xb5   : > { %v6174_v2 = vpack.c.bf16 %v3570_v61, %v3558_v36  ;;  %v7769_v13 = vsub.f32 %v7474_v16, %v10713_v20  ;;  %5983 = vmatprep.subr.bf16.mxu0 %v5982_v14  ;;  %v10717_v15 = vand.u32 4294901760, %v7458_v0  ;;  %v10718_v61 = vand.u32 4294901760, %v7495_v34 }
  0xb6   : > { %10710 = vst [vmem:[#allocation73_spill] sm:$0xff] %v7757_v1  ;;  %10712 = vst [vmem:[#allocation74_spill] sm:$0xff] %v7762_v38  ;;  %v7774_v5 = vsub.f32 %v7476_v17, %v10715_v30  ;;  %v10720_v16 = vand.u32 4294901760, %v7503_v40  ;;  %v10722_v17 = vand.u32 4294901760, %v7506_v44  ;;  %v10724_v33 = vand.u32 4294901760, %v7508_v45 }
  0xb7   : > { %10714 = vst [vmem:[#allocation75_spill] sm:$0xff] %v7769_v13  ;;  %v3575_v3 = vsub.f32 %v7458_v0, %v10717_v15  ;;  %v7785_v39 = vsub.f32 %v7495_v34, %v10718_v61  ;;  %6175 = vmatprep.subr.bf16.mxu1 %v6174_v2  ;;  %v10726_v30 = vand.u32 4294901760, %v7510_v46  ;;  %v1190_v15 = vand.u32 4294901760, %v1189_v62 }
  0xb8   : > { %10716 = vst [vmem:[#allocation76_spill] sm:$0xff] %v7774_v5  ;;  %v7790_v36 = vsub.f32 %v7503_v40, %v10720_v16  ;;  %v7795_v14 = vsub.f32 %v7506_v44, %v10722_v17  ;;  %v7800_v20 = vsub.f32 %v7508_v45, %v10724_v33  ;;  %v1202_v61 = vand.u32 4294901760, %v1201_v53 }
  0xb9   : > { %10719 = vst [vmem:[#allocation77_spill] sm:$0xff] %v7785_v39  ;;  %v7805_v34 = vsub.f32 %v7510_v46, %v10726_v30  ;;  %v10263_v40 = vand.u32 4294901760, %v7466_v11  ;;  %v10728_v16 = vand.u32 4294901760, %v7525_v51  ;;  %v10730_v17 = vand.u32 4294901760, %v7541_v6 }
  0xba   : > { %10721 = vst [vmem:[#allocation78_spill] sm:$0xff] %v7790_v36  ;;  %10723 = vst [vmem:[#allocation79_spill] sm:$0xff] %v7795_v14  ;;  %v10732_v46 = vand.u32 4294901760, %v7543_v7  ;;  %v3564_v53 = vand.u32 4294901760, %v3563_v9  ;;  %v3576_v30 = vand.u32 4294901760, %v3575_v3  ;;  %v10264_v8 = vand.u32 4294901760, %v7480_v19 }
  0xbb   : > { %10725 = vst [vmem:[#allocation80_spill] sm:$0xff] %v7800_v20  ;;  %10727 = vst [vmem:[#allocation81_spill] sm:$0xff] %v7805_v34  ;;  %v7811_v44 = vsub.f32 %v7525_v51, %v10728_v16  ;;  %v7816_v45 = vsub.f32 %v7541_v6, %v10730_v17  ;;  %v10733_v51 = vand.u32 4294901760, %v7557_v26  ;;  %v10734_v6 = vand.u32 4294901760, %v7559_v41 }
  0xbc   : > { %v7823_v62 = vsub.f32 %v7543_v7, %v10732_v46  ;;  %v10735_v33 = vand.u32 4294901760, %v7561_v43  ;;  %v10737_v9 = vand.u32 4294901760, %v7569_v60  ;;  %v7847_v46 = vpack.c.bf16 %v1202_v61, %v1190_v15 }
  0xbd   : > { %10729 = vst [vmem:[#allocation82_spill] sm:$0xff] %v7811_v44  ;;  %10731 = vst [vmem:[#allocation83_spill] sm:$0xff] %v7816_v45  ;;  %v7829_v16 = vsub.f32 %v7557_v26, %v10733_v51  ;;  %v7834_v17 = vsub.f32 %v7559_v41, %v10734_v6  ;;  %v1207_v26 = vsub.f32 %v7466_v11, %v10263_v40  ;;  %v10739_v51 = vand.u32 4294901760, %v7468_v12 }
  0xbe   : > { %v7839_v2 = vsub.f32 %v7561_v43, %v10735_v33  ;;  %v7845_v3 = vsub.f32 %v7569_v60, %v10737_v9  ;;  %v10740_v33 = vand.u32 4294901760, %v7478_v18  ;;  %v7861_v15 = vpack.c.bf16 %v3576_v30, %v3564_v53 }
  0xbf   : > { %v1219_v43 = vsub.f32 %v7468_v12, %v10739_v51  ;;  %v3593_v61 = vsub.f32 %v7480_v19, %v10264_v8  ;;  %v10741_v51 = vand.u32 4294901760, %v7484_v22  ;;  %v10742_v53 = vand.u32 4294901760, %v7488_v27 }
  0xc0   : > { %10736 = vst [vmem:[#allocation84_spill] sm:$0xff] %v7839_v2  ;;  %10738 = vst [vmem:[#allocation85_spill] sm:$0xff] %v7845_v3  ;;  %v3581_v6 = vsub.f32 %v7478_v18, %v10740_v33  ;;  %v1208_v25 = vand.u32 4294901760, %v1207_v26  ;;  %v10744_v7 = vand.u32 4294901760, %v7498_v35  ;;  %v10746_v9 = vand.u32 4294901760, %v7762_v38 }
  0xc1   : > { %v1213_v41 = vsub.f32 %v7484_v22, %v10741_v51  ;;  %v1225_v30 = vsub.f32 %v7488_v27, %v10742_v53  ;;  %v1220_v19 = vand.u32 4294901760, %v1219_v43  ;;  %v10743_v51 = vand.u32 4294901760, %v7492_v31 }
  0xc2   : > { %v3599_v60 = vsub.f32 %v7498_v35, %v10744_v7  ;;  %v3582_v22 = vand.u32 4294901760, %v3581_v6  ;;  %v3594_v18 = vand.u32 4294901760, %v3593_v61  ;;  %v10745_v53 = vand.u32 4294901760, %v7757_v1 }
  0xc3   : > { %v3587_v33 = vsub.f32 %v7492_v31, %v10743_v51  ;;  %v1243_v40 = vsub.f32 %v7762_v38, %v10746_v9  ;;  %v1214_v26 = vand.u32 4294901760, %v1213_v41  ;;  %v10747_v43 = vand.u32 4294901760, %v7769_v13 }
  0xc4   : > { %v1231_v8 = vsub.f32 %v7757_v1, %v10745_v53  ;;  %v10748_v51 = vand.u32 4294901760, %v7774_v5  ;;  %v10749_v7 = vand.u32 4294901760, %v7529_v58  ;;  %v1226_v61 = vand.u32 4294901760, %v1225_v30 }
  0xc5   : > { %v3605_v27 = vsub.f32 %v7769_v13, %v10747_v43  ;;  %v10750_v53 = vand.u32 4294901760, %v7531_v59  ;;  %v10751_v9 = vand.u32 4294901760, %v7785_v39  ;;  %v10752_v38 = vand.u32 4294901760, %v7790_v36 }
  0xc6   : > { %v3617_v31 = vsub.f32 %v7774_v5, %v10748_v51  ;;  %v1237_v6 = vsub.f32 %v7529_v58, %v10749_v7  ;;  %v3588_v13 = vand.u32 4294901760, %v3587_v33  ;;  %v3600_v35 = vand.u32 4294901760, %v3599_v60 }
  0xc7   : > { %v1249_v1 = vsub.f32 %v7531_v59, %v10750_v53  ;;  %v3611_v41 = vsub.f32 %v7785_v39, %v10751_v9  ;;  %v3623_v43 = vsub.f32 %v7790_v36, %v10752_v38  ;;  %v10302_v5 = vand.u32 4294901760, %v7800_v20 }
  0xc8   : > { %v7912_v7 = vpack.c.bf16 %v1220_v19, %v1208_v25  ;;  %v1232_v30 = vand.u32 4294901760, %v1231_v8  ;;  %v1244_v58 = vand.u32 4294901760, %v1243_v40  ;;  %v10301_v53 = vand.u32 4294901760, %v7805_v34  ;;  %v483_v33 = vpop.permute.xlu1 %482  ;;  %v477_v51 = vpop.permute.xlu0 %476 }
  0xc9   : > { %v7915_v59 = vpack.c.bf16 %v3594_v18, %v3582_v22  ;;  %v3606_v12 = vand.u32 4294901760, %v3605_v27  ;;  %v3618_v9 = vand.u32 4294901760, %v3617_v31  ;;  %v1238_v39 = vand.u32 4294901760, %v1237_v6  ;;  %v10761_v6 = vld [vmem:[#allocation37_spill] sm:$0xff] }
  0xca   : > { %v1250_v11 = vand.u32 4294901760, %v1249_v1  ;;  %v3612_v0 = vand.u32 4294901760, %v3611_v41  ;;  %v3624_v38 = vand.u32 4294901760, %v3623_v43  ;;  %v10303_v60 = vand.u32 4294901760, %v7811_v44 }
  0xcb   : > { %v7918_v36 = vpack.c.bf16 %v1226_v61, %v1214_v26  ;;  %v7920_v19 = vpack.c.bf16 %v3600_v35, %v3588_v13  ;;  %v10753_v8 = vand.u32 4294901760, %v7795_v14  ;;  %v1267_v18 = vsub.f32 %v7800_v20, %v10302_v5 }
  0xcc   : > { %vm7929_vm0 = vcmp.eq.s32.totalorder %v7764_v37, %v483_v33  ;;  %v10754_v22 = vmov 0  ;;  %vm7934_vm1 = vcmp.eq.s32.totalorder %v7764_v37, %v477_v51  ;;  %v10757_v27 = vmov 0  ;;  %v480_v33 = vpop.permute.xlu0 %479 }
  0xcd   : > { %v1255_v25 = vsub.f32 %v7795_v14, %v10753_v8  ;;  %v10755_v22 = vsel %vm7929_vm0, 4294967295, %v10754_v22  ;;  %v10758_v27 = vsel %vm7934_vm1, 4294967295, %v10757_v27  ;;  %v7938_v31 = vpack.c.bf16 %v1244_v58, %v1232_v30  ;;  %v486_v30 = vpop.permute.xlu1 %485 }
  0xce   : > { %10756 = vst [vmem:[#allocation86_spill] sm:$0xff] %v10755_v22  ;;  %10759 = vst [vmem:[#allocation87_spill] sm:$0xff] %v10758_v27  ;;  %v7943_v35 = vsub.f32 %v7805_v34, %v10301_v53  ;;  %v10760_v1 = vmov 0.0   ;;  %v7951_v26 = vpack.c.bf16 %v3618_v9, %v3606_v12  ;;  %v10310_v61 = vand.u32 4294901760, %v10761_v6  ;;  %v10764_v12 = vld [vmem:[#allocation38_spill] sm:$0xff]  ;;  %v10959_v27 = vld [vmem:[#allocation76_spill] sm:$0xff] }
  0xcf   : > { %v5712_v13 = vsel %vm7934_vm1, 1.0, %v10760_v1  ;;  %v5714_v40 = vsel %vm7929_vm0, 1.0, %v10760_v1  ;;  %v7956_v58 = vpack.c.bf16 %v1250_v11, %v1238_v39  ;;  %v7958_v43 = vpack.c.bf16 %v3624_v38, %v3612_v0 }
  0xd0   : > { %v7954_v41 = vsub.f32 %v5712_v13, %v5712_v13  ;;  %v3641_v51 = vsub.f32 %v7811_v44, %v10303_v60  ;;  %v7963_v8 = vsub.f32 %v5714_v40, %v5714_v40  ;;  %v1256_v53 = vand.u32 4294901760, %v1255_v25  ;;  %v489_v22 = vpop.permute.xlu0 %488 }
  0xd1   : > { %v1268_v5 = vand.u32 4294901760, %v1267_v18  ;;  %vm7967_vm5 = vcmp.eq.s32.totalorder %v7764_v37, %v486_v30  ;;  %v10765_v13 = vmov 0  ;;  %vm7972_vm2 = vcmp.eq.s32.totalorder %v7764_v37, %v480_v33  ;;  %v492_v9 = vpop.permute.xlu1 %491 }
  0xd2   : > { %10762 = vst [vmem:[#allocation88_spill] sm:$0xff] %v7954_v41  ;;  %10763 = vst [vmem:[#allocation89_spill] sm:$0xff] %v7963_v8  ;;  %v10766_v13 = vsel %vm7967_vm5, 4294967295, %v10765_v13  ;;  %v10768_v0 = vmov 0  ;;  %v7977_v11 = vand.u32 4294901760, %v7954_v41  ;;  %v3630_v39 = vand.u32 4294901760, %v7943_v35 }
  0xd3   : > { %10767 = vst [vmem:[#allocation90_spill] sm:$0xff] %v10766_v13  ;;  %v10769_v0 = vsel %vm7972_vm2, 4294967295, %v10768_v0  ;;  %v5713_v38 = vsel %vm7972_vm2, 1.0, %v10760_v1  ;;  %v5715_v25 = vsel %vm7967_vm5, 1.0, %v10760_v1  ;;  %v7989_v18 = vsub.f32 %v10761_v6, %v10310_v61 }
  0xd4   : > { %10770 = vst [vmem:[#allocation91_spill] sm:$0xff] %v10769_v0  ;;  %10771 = vst [vmem:[#allocation92_spill] sm:$0xff] %v7977_v11  ;;  %v831_v30 = vsub.f32 %v7954_v41, %v7977_v11  ;;  %v7994_v33 = vsub.f32 %v5713_v38, %v5713_v38  ;;  %v3642_v35 = vand.u32 4294901760, %v3641_v51  ;;  %v7998_v13 = vand.u32 4294901760, %v7963_v8  ;;  %v10965_v0 = vld [vmem:[#allocation82_spill] sm:$0xff] }
  0xd5   : > { %v10774_v44 = vand.u32 4294901760, %v10764_v12  ;;  %vm8008_vm3 = vcmp.eq.s32.totalorder %v7764_v37, %v489_v22  ;;  %v10775_v38 = vmov 0  ;;  %v8015_v11 = vsub.f32 %v5715_v25, %v5715_v25 }
  0xd6   : > { %10772 = vst [vmem:[#allocation93_spill] sm:$0xff] %v7994_v33  ;;  %10773 = vst [vmem:[#allocation94_spill] sm:$0xff] %v7998_v13  ;;  %v10776_v38 = vsel %vm8008_vm3, 4294967295, %v10775_v38  ;;  %v832_v51 = vand.u32 4294901760, %v831_v30  ;;  %v8013_v60 = vand.u32 4294901760, %v7994_v33  ;;  %v10780_v41 = vand.u32 4294901760, %v7816_v45 }
  0xd7   : > { %v8003_v61 = vsub.f32 %v10764_v12, %v10774_v44  ;;  %10777 = vst [vmem:[#allocation95_spill] sm:$0xff] %v10776_v38  ;;  %10779 = vst [vmem:[#allocation97_spill] sm:$0xff] %v8015_v11  ;;  %v5716_v44 = vsel %vm8008_vm3, 1.0, %v10760_v1  ;;  %vm8026_vm6 = vcmp.eq.s32.totalorder %v7764_v37, %v492_v9  ;;  %v10781_v30 = vmov 0 }
  0xd8   : > { %10778 = vst [vmem:[#allocation96_spill] sm:$0xff] %v8013_v60  ;;  %v3635_v40 = vsub.f32 %v7816_v45, %v10780_v41  ;;  %v10782_v30 = vsel %vm8026_vm6, 4294967295, %v10781_v30  ;;  %833 = vmatmul.mubr.f32.vlgmr.msra.gmra.mrb[0].mxu0 %v832_v51  ;;  %3207 = vmatmul.mubr.f32.vlgmr.msra.gmra.mrb[0].mxu1 %v832_v51  ;;  %v842_v25 = vsub.f32 %v7994_v33, %v8013_v60  ;;  %v10784_v38 = vand.u32 4294901760, %v7823_v62  ;;  %v495_v41 = vpop.permute.xlu0 %494  ;;  %v10794_v33 = vld [vmem:[#allocation46_spill] sm:$0xff] }
  0xd9   : > { %10783 = vst [vmem:[#allocation98_spill] sm:$0xff] %v10782_v30  ;;  %5985 = vmatpush1.bf16.msra.mxu0 %v7847_v46  ;;  %6177 = vmatpush1.bf16.msra.mxu1 %v7861_v15  ;;  %v5994_v22 = vpack.c.bf16 %v1268_v5, %v1256_v53  ;;  %v1262_v9 = vand.u32 4294901760, %v7989_v18  ;;  %v10785_v6 = vand.u32 4294901760, %v7829_v16  ;;  %v10786_v51 = vand.u32 4294901760, %v7834_v17  ;;  %v10795_v30 = vld [vmem:[#allocation47_spill] sm:$0xff] }
  0xda   : > { %v3647_v12 = vsub.f32 %v7823_v62, %v10784_v38  ;;  %838 = vmatprep.mubr.f32.mxu0 %v10760_v1  ;;  %3212 = vmatprep.mubr.f32.mxu1 %v10760_v1  ;;  %v843_v38 = vand.u32 4294901760, %v842_v25  ;;  %v853_v46 = vsub.f32 %v7963_v8, %v7998_v13  ;;  %v8049_v5 = vand.u32 4294901760, %v8015_v11 }
  0xdb   : > { %v1279_v45 = vsub.f32 %v7829_v16, %v10785_v6  ;;  %v1291_v60 = vsub.f32 %v7834_v17, %v10786_v51  ;;  %v8051_v15 = vsub.f32 %v5716_v44, %v5716_v44  ;;  %5987 = vmatprep.subr.bf16.mxu0 %v7912_v7  ;;  %6179 = vmatprep.subr.bf16.mxu1 %v7915_v59  ;;  %v5717_v53 = vsel %vm8026_vm6, 1.0, %v10760_v1 }
  0xdc   : > { %10787 = vst [vmem:[#allocation99_spill] sm:$0xff] %v8049_v5  ;;  %v6186_v6 = vpack.c.bf16 %v3642_v35, %v3630_v39  ;;  %v10789_v18 = vand.u32 4294901760, %v7839_v2  ;;  %v10790_v51 = vand.u32 4294901760, %v7845_v3  ;;  %vm8065_vm8 = vcmp.eq.s32.totalorder %v7764_v37, %v495_v41  ;;  %844 = vmatmul.mubr.f32.gmra.mrb[2].mxu0 %v843_v38  ;;  %3218 = vmatmul.mubr.f32.gmra.mrb[2].mxu1 %v843_v38  ;;  %v498_v39 = vpop.permute.xlu1 %497 }
  0xdd   : > { %10788 = vst [vmem:[#allocation100_spill] sm:$0xff] %v8051_v15  ;;  %v10791_v44 = vmov 0  ;;  %v1274_v59 = vand.u32 4294901760, %v8003_v61  ;;  %v3636_v7 = vand.u32 4294901760, %v3635_v40  ;;  %v3648_v8 = vand.u32 4294901760, %v3647_v12  ;;  %849 = vmatprep.mubr.f32.mxu0 %v10760_v1  ;;  %3223 = vmatprep.mubr.f32.mxu1 %v10760_v1  ;;  %v10798_v40 = vld [vmem:[#allocation48_spill] sm:$0xff] }
  0xde   : > { %v3653_v25 = vsub.f32 %v7839_v2, %v10789_v18  ;;  %v3665_v13 = vsub.f32 %v7845_v3, %v10790_v51  ;;  %v10792_v44 = vsel %vm8065_vm8, 4294967295, %v10791_v44  ;;  %v1280_v35 = vand.u32 4294901760, %v1279_v45  ;;  %5989 = vmatpush1.bf16.msra.mxu0 %v7918_v36  ;;  %6181 = vmatpush1.bf16.msra.mxu1 %v7920_v19  ;;  %v501_v19 = vpop.permute.xlu0 %500 }
  0xdf   : > { %10793 = vst [vmem:[#allocation101_spill] sm:$0xff] %v10792_v44  ;;  %v1292_v18 = vand.u32 4294901760, %v1291_v60  ;;  %v10335_v51 = vand.u32 4294901760, %v10794_v33  ;;  %v854_v3 = vand.u32 4294901760, %v853_v46  ;;  %v864_v2 = vsub.f32 %v8015_v11, %v8049_v5  ;;  %5991 = vmatprep.subr.bf16.mxu0 %v7938_v31  ;;  %6183 = vmatprep.subr.bf16.mxu1 %v7951_v26 }
  0xe0   : > { %v8077_v38 = vand.u32 4294901760, %v8051_v15  ;;  %v8081_v61 = vsub.f32 %v5717_v53, %v5717_v53  ;;  %v5718_v45 = vsel %vm8065_vm8, 1.0, %v10760_v1  ;;  %v3654_v60 = vand.u32 4294901760, %v3653_v25  ;;  %v10803_v25 = vld [vmem:[#allocation50_spill] sm:$0xff] }
  0xe1   : > { %v3666_v12 = vand.u32 4294901760, %v3665_v13  ;;  %vm8090_vm4 = vcmp.eq.s32.totalorder %v7764_v37, %v498_v39  ;;  %v10799_v41 = vmov 0  ;;  %855 = vmatmul.mubr.f32.gmra.mrb[4].mxu0 %v854_v3  ;;  %3229 = vmatmul.mubr.f32.gmra.mrb[4].mxu1 %v854_v3  ;;  %v5996_v36 = vpack.c.bf16 %v1274_v59, %v1262_v9  ;;  %v504_v39 = vpop.permute.xlu1 %503 }
  0xe2   : > { %10796 = vst [vmem:[#allocation46_spill] sm:$0xff] %v8077_v38  ;;  %10797 = vst [vmem:[#allocation47_spill] sm:$0xff] %v8081_v61  ;;  %v10800_v41 = vsel %vm8090_vm4, 4294967295, %v10799_v41  ;;  %860 = vmatprep.mubr.f32.mxu0 %v10760_v1  ;;  %3234 = vmatprep.mubr.f32.mxu1 %v10760_v1  ;;  %v6188_v31 = vpack.c.bf16 %v3648_v8, %v3636_v7  ;;  %v1285_v26 = vsub.f32 %v10794_v33, %v10335_v51 }
  0xe3   : > { %10801 = vst [vmem:[#allocation48_spill] sm:$0xff] %v10800_v41  ;;  %v10802_v13 = vand.u32 4294901760, %v10795_v30  ;;  %v865_v46 = vand.u32 4294901760, %v864_v2  ;;  %v875_v3 = vsub.f32 %v8051_v15, %v8077_v38  ;;  %v8106_v9 = vand.u32 4294901760, %v8081_v61  ;;  %5993 = vmatpush1.bf16.msra.mxu0 %v7956_v58  ;;  %6185 = vmatpush1.bf16.msra.mxu1 %v7958_v43  ;;  %v10829_v38 = vld [vmem:[#allocation56_spill] sm:$0xff] }
  0xe4   : > { %v8108_v59 = vsub.f32 %v5718_v45, %v5718_v45  ;;  %v5719_v8 = vsel %vm8090_vm4, 1.0, %v10760_v1  ;;  %5995 = vmatprep.subr.bf16.mxu0 %v5994_v22  ;;  %6187 = vmatprep.subr.bf16.mxu1 %v6186_v6  ;;  %v5998_v7 = vpack.c.bf16 %v1292_v18, %v1280_v35  ;;  %v6190_v2 = vpack.c.bf16 %v3666_v12, %v3654_v60  ;;  %v10811_v35 = vld [vmem:[#allocation52_spill] sm:$0xff] }
  0xe5   : > { %v1297_v53 = vsub.f32 %v10795_v30, %v10802_v13  ;;  %10804 = vst [vmem:[#allocation102_spill] sm:$0xff] %v8106_v9  ;;  %v10806_v13 = vand.u32 4294901760, %v10798_v40  ;;  %vm8119_vm9 = vcmp.eq.s32.totalorder %v7764_v37, %v501_v19  ;;  %v10807_v45 = vmov 0  ;;  %866 = vmatmul.mubr.f32.gmra.mrb[6].mxu0 %v865_v46  ;;  %3240 = vmatmul.mubr.f32.gmra.mrb[6].mxu1 %v865_v46 }
  0xe6   : > { %10805 = vst [vmem:[#allocation103_spill] sm:$0xff] %v8108_v59  ;;  %v10808_v45 = vsel %vm8119_vm9, 4294967295, %v10807_v45  ;;  %871 = vmatprep.mubr.f32.mxu0 %v10760_v1  ;;  %3245 = vmatprep.mubr.f32.mxu1 %v10760_v1  ;;  %v1286_v58 = vand.u32 4294901760, %v1285_v26  ;;  %v10810_v22 = vand.u32 4294901760, %v10803_v25  ;;  %v10336_v18 = vand.u32 4294901760, %v10811_v35 }
  0xe7   : > { %v3659_v51 = vsub.f32 %v10798_v40, %v10806_v13  ;;  %10809 = vst [vmem:[#allocation104_spill] sm:$0xff] %v10808_v45  ;;  %v1298_v43 = vand.u32 4294901760, %v1297_v53  ;;  %v876_v60 = vand.u32 4294901760, %v875_v3  ;;  %v886_v12 = vsub.f32 %v8081_v61, %v8106_v9  ;;  %5997 = vmatpush1.bf16.msra.mxu0 %v5996_v36  ;;  %6189 = vmatpush1.bf16.msra.mxu1 %v6188_v31 }
  0xe8   : > { %v3671_v6 = vsub.f32 %v10803_v25, %v10810_v22  ;;  %v8132_v19 = vand.u32 4294901760, %v8108_v59  ;;  %v8134_v46 = vsub.f32 %v5719_v8, %v5719_v8  ;;  %v5720_v26 = vsel %vm8119_vm9, 1.0, %v10760_v1  ;;  %5999 = vmatprep.subr.bf16.mxu0 %v5998_v7  ;;  %6191 = vmatprep.subr.bf16.mxu1 %v6190_v2  ;;  %v507_v22 = vpop.permute.xlu0 %506  ;;  %v10817_v8 = vld [vmem:[#allocation53_spill] sm:$0xff]  ;;  %v510_v7 = vpop.permute.xlu1 %509 }
  0xe9   : > { %v3660_v53 = vand.u32 4294901760, %v3659_v51  ;;  %vm8140_vm10 = vcmp.eq.s32.totalorder %v7764_v37, %v504_v39  ;;  %v10814_v3 = vmov 0  ;;  %877 = vmatmul.mubr.f32.gmra.mrb[8].mxu0 %v876_v60  ;;  %3251 = vmatmul.mubr.f32.gmra.mrb[8].mxu1 %v876_v60  ;;  %v6000_v36 = vpack.c.bf16 %v1298_v43, %v1286_v58 }
  0xea   : > { %10812 = vst [vmem:[#allocation105_spill] sm:$0xff] %v8132_v19  ;;  %10813 = vst [vmem:[#allocation106_spill] sm:$0xff] %v8134_v46  ;;  %v10815_v3 = vsel %vm8140_vm10, 4294967295, %v10814_v3  ;;  %v3672_v13 = vand.u32 4294901760, %v3671_v6  ;;  %882 = vmatprep.mubr.f32.mxu0 %v10760_v1  ;;  %3256 = vmatprep.mubr.f32.mxu1 %v10760_v1  ;;  %v1303_v31 = vsub.f32 %v10811_v35, %v10336_v18  ;;  %v10341_v51 = vand.u32 4294901760, %v10817_v8 }
  0xeb   : > { %10816 = vst [vmem:[#allocation107_spill] sm:$0xff] %v10815_v3  ;;  %v887_v39 = vand.u32 4294901760, %v886_v12  ;;  %v897_v2 = vsub.f32 %v8108_v59, %v8132_v19  ;;  %v8153_v60 = vand.u32 4294901760, %v8134_v46  ;;  %v8155_v6 = vsub.f32 %v5720_v26, %v5720_v26  ;;  %6001 = vmatpush1.bf16.msra.mxu0 %v6000_v36 }
  0xec   : > { %v5721_v58 = vsel %vm8140_vm10, 1.0, %v10760_v1  ;;  %v6192_v43 = vpack.c.bf16 %v3672_v13, %v3660_v53  ;;  %vm8161_vm7 = vcmp.eq.s32.totalorder %v7764_v37, %v507_v22  ;;  %v10820_v18 = vmov 0  ;;  %v10826_v13 = vld [vmem:[#allocation55_spill] sm:$0xff]  ;;  %v513_v5 = vpop.permute.xlu0 %512 }
  0xed   : > { %10818 = vst [vmem:[#allocation108_spill] sm:$0xff] %v8153_v60  ;;  %10819 = vst [vmem:[#allocation109_spill] sm:$0xff] %v8155_v6  ;;  %v10821_v18 = vsel %vm8161_vm7, 4294967295, %v10820_v18  ;;  %888 = vmatmul.mubr.f32.gmra.mrb[10].mxu0 %v887_v39  ;;  %3262 = vmatmul.mubr.f32.gmra.mrb[10].mxu1 %v887_v39  ;;  %vm8166_vm11 = vcmp.eq.s32.totalorder %v7764_v37, %v510_v7  ;;  %v10823_v12 = vmov 0  ;;  %v1304_v26 = vand.u32 4294901760, %v1303_v31 }
  0xee   : > { %10822 = vst [vmem:[#allocation110_spill] sm:$0xff] %v10821_v18  ;;  %v10824_v12 = vsel %vm8166_vm11, 4294967295, %v10823_v12  ;;  %893 = vmatprep.mubr.f32.mxu0 %v10760_v1  ;;  %3267 = vmatprep.mubr.f32.mxu1 %v10760_v1  ;;  %v1315_v53 = vsub.f32 %v10817_v8, %v10341_v51  ;;  %v10352_v22 = vand.u32 4294901760, %v10826_v13  ;;  %v898_v36 = vand.u32 4294901760, %v897_v2 }
  0xef   : > { %10825 = vst [vmem:[#allocation111_spill] sm:$0xff] %v10824_v12  ;;  %v908_v39 = vsub.f32 %v8134_v46, %v8153_v60  ;;  %v8179_v7 = vand.u32 4294901760, %v8155_v6  ;;  %v8181_v19 = vsub.f32 %v5721_v58, %v5721_v58  ;;  %6193 = vmatpush1.bf16.msra.mxu1 %v6192_v43  ;;  %v5722_v31 = vsel %vm8161_vm7, 1.0, %v10760_v1  ;;  %v10830_v60 = vld [vmem:[#allocation58_spill] sm:$0xff]  ;;  %v516_v46 = vpop.permute.xlu1 %515 }
  0xf0   : > { %v1316_v9 = vand.u32 4294901760, %v1315_v53  ;;  %v3677_v51 = vsub.f32 %v10826_v13, %v10352_v22  ;;  %v5723_v58 = vsel %vm8166_vm11, 1.0, %v10760_v1  ;;  %vm8204_vm12 = vcmp.eq.s32.totalorder %v7764_v37, %v513_v5 }
  0xf1   : > { %10827 = vst [vmem:[#allocation55_spill] sm:$0xff] %v8179_v7  ;;  %10828 = vst [vmem:[#allocation112_spill] sm:$0xff] %v8181_v19  ;;  %899 = vmatmul.mubr.f32.gmra.mrb[12].mxu0 %v898_v36  ;;  %3273 = vmatmul.mubr.f32.gmra.mrb[12].mxu1 %v898_v36  ;;  %v909_v59 = vand.u32 4294901760, %v908_v39  ;;  %v919_v22 = vsub.f32 %v8155_v6, %v8179_v7  ;;  %v8199_v2 = vand.u32 4294901760, %v8181_v19  ;;  %v10833_v61 = vmov 0  ;;  %v10839_v7 = vld [vmem:[#allocation59_spill] sm:$0xff] }
  0xf2   : > { %904 = vmatprep.mubr.f32.mxu0 %v10760_v1  ;;  %3278 = vmatprep.mubr.f32.mxu1 %v10760_v1  ;;  %v6002_v53 = vpack.c.bf16 %v1316_v9, %v1304_v26  ;;  %v8201_v36 = vsub.f32 %v5722_v31, %v5722_v31  ;;  %v10834_v61 = vsel %vm8204_vm12, 4294967295, %v10833_v61  ;;  %v8208_v43 = vsub.f32 %v5723_v58, %v5723_v58  ;;  %v10843_v58 = vld [vmem:[#allocation60_spill] sm:$0xff] }
  0xf3   : > { %10831 = vst [vmem:[#allocation56_spill] sm:$0xff] %v8199_v2  ;;  %10835 = vst [vmem:[#allocation113_spill] sm:$0xff] %v10834_v61  ;;  %v3678_v15 = vand.u32 4294901760, %v3677_v51  ;;  %v10837_v9 = vand.u32 4294901760, %v10829_v38  ;;  %v10838_v39 = vand.u32 4294901760, %v10830_v60  ;;  %vm8218_vm13 = vcmp.eq.s32.totalorder %v7764_v37, %v516_v46 }
  0xf4   : > { %10832 = vst [vmem:[#allocation58_spill] sm:$0xff] %v8201_v36  ;;  %10836 = vst [vmem:[#allocation114_spill] sm:$0xff] %v8208_v43  ;;  %6003 = vmatprep.subr.bf16.mxu0 %v6002_v53  ;;  %v10840_v5 = vmov 0  ;;  %v5724_v46 = vsel %vm8204_vm12, 1.0, %v10760_v1  ;;  %v8234_v6 = vand.u32 4294901760, %v8208_v43  ;;  %v10846_v12 = vand.u32 4294901760, %v10839_v7  ;;  %v522_v53 = vpop.permute.xlu1 %521 }
  0xf5   : > { %v3689_v26 = vsub.f32 %v10829_v38, %v10837_v9  ;;  %910 = vmatmul.mubr.f32.gmra.mrb[14].mxu0 %v909_v59  ;;  %3284 = vmatmul.mubr.f32.gmra.mrb[14].mxu1 %v909_v59  ;;  %v1309_v31 = vsub.f32 %v10830_v60, %v10838_v39  ;;  %v10841_v5 = vsel %vm8218_vm13, 4294967295, %v10840_v5  ;;  %v920_v9 = vand.u32 4294901760, %v919_v22  ;;  %v519_v22 = vpop.permute.xlu0 %518 }
  0xf6   : > { %10842 = vst [vmem:[#allocation59_spill] sm:$0xff] %v10841_v5  ;;  %915 = vmatprep.mubr.f32.mxu0 %v10760_v1  ;;  %3289 = vmatprep.mubr.f32.mxu1 %v10760_v1  ;;  %v930_v59 = vsub.f32 %v8181_v19, %v8199_v2  ;;  %v8228_v39 = vand.u32 4294901760, %v8201_v36  ;;  %10845 = vst [vmem:[#allocation115_spill] sm:$0xff] %v8234_v6  ;;  %v5725_v2 = vsel %vm8218_vm13, 1.0, %v10760_v1  ;;  %v10847_v61 = vand.u32 4294901760, %v10843_v58 }
  0xf7   : > { %v3690_v51 = vand.u32 4294901760, %v3689_v26  ;;  %v1321_v26 = vsub.f32 %v10839_v7, %v10846_v12  ;;  %v1310_v19 = vand.u32 4294901760, %v1309_v31  ;;  %v10379_v3 = vand.u32 4294901760, %v7667_v29 }
  0xf8   : > { %10844 = vst [vmem:[#allocation60_spill] sm:$0xff] %v8228_v39  ;;  %v3683_v18 = vsub.f32 %v10843_v58, %v10847_v61  ;;  %vm8256_vm14 = vcmp.eq.s32.totalorder %v7764_v37, %v519_v22  ;;  %v10849_v61 = vmov 0  ;;  %v8260_v45 = vsub.f32 %v5725_v2, %v5725_v2  ;;  %v528_v2 = vpop.permute.xlu1 %527 }
  0xf9   : > { %v6194_v11 = vpack.c.bf16 %v3690_v51, %v3678_v15  ;;  %921 = vmatmul.mubr.f32.gmra.mrb[16].mxu0 %v920_v9  ;;  %3295 = vmatmul.mubr.f32.gmra.mrb[16].mxu1 %v920_v9  ;;  %v8248_v15 = vsub.f32 %v5724_v46, %v5724_v46  ;;  %v1322_v12 = vand.u32 4294901760, %v1321_v26  ;;  %v931_v51 = vand.u32 4294901760, %v930_v59 }
  0xfa   : > { %926 = vmatprep.mubr.f32.mxu0 %v10760_v1  ;;  %3300 = vmatprep.mubr.f32.mxu1 %v10760_v1  ;;  %v941_v9 = vsub.f32 %v8201_v36, %v8228_v39  ;;  %v3684_v5 = vand.u32 4294901760, %v3683_v18  ;;  %v3695_v31 = vsub.f32 %v7667_v29, %v10379_v3  ;;  %v10850_v61 = vsel %vm8256_vm14, 4294967295, %v10849_v61  ;;  %10852 = vst [vmem:[#allocation118_spill] sm:$0xff] %v8260_v45  ;;  %v525_v3 = vpop.permute.xlu0 %524  ;;  %v10858_v39 = vld [vmem:[#allocation64_spill] sm:$0xff]  ;;  %v10863_v36 = vld [vmem:[#allocation65_spill] sm:$0xff] }
  0xfb   : > { %10848 = vst [vmem:[#allocation116_spill] sm:$0xff] %v8248_v15  ;;  %6195 = vmatprep.subr.bf16.mxu1 %v6194_v11  ;;  %10851 = vst [vmem:[#allocation117_spill] sm:$0xff] %v10850_v61  ;;  %v952_v59 = vsub.f32 %v8208_v43, %v8234_v6  ;;  %v6004_v46 = vpack.c.bf16 %v1322_v12, %v1310_v19  ;;  %vm8265_vm15 = vcmp.eq.s32.totalorder %v7764_v37, %v522_v53  ;;  %v10853_v11 = vmov 0 }
  0xfc   : > { %v3696_v26 = vand.u32 4294901760, %v3695_v31  ;;  %v10854_v11 = vsel %vm8265_vm15, 4294967295, %v10853_v11  ;;  %v8272_v18 = vand.u32 4294901760, %v8248_v15  ;;  %v942_v22 = vand.u32 4294901760, %v941_v9 }
  0xfd   : > { %932 = vmatmul.mubr.f32.gmra.mrb[18].mxu0 %v931_v51  ;;  %3306 = vmatmul.mubr.f32.gmra.mrb[18].mxu1 %v931_v51  ;;  %10855 = vst [vmem:[#allocation119_spill] sm:$0xff] %v10854_v11  ;;  %v5726_v51 = vsel %vm8256_vm14, 1.0, %v10760_v1  ;;  %v10388_v53 = vand.u32 4294901760, %v7671_v21  ;;  %v8279_v12 = vand.u32 4294901760, %v8260_v45  ;;  %v10397_v31 = vand.u32 4294901760, %v7673_v54 }
  0xfe   : > { %937 = vmatprep.mubr.f32.mxu0 %v10760_v1  ;;  %3311 = vmatprep.mubr.f32.mxu1 %v10760_v1  ;;  %10856 = vst [vmem:[#allocation120_spill] sm:$0xff] %v8272_v18  ;;  %v6196_v19 = vpack.c.bf16 %v3696_v26, %v3684_v5  ;;  %v953_v6 = vand.u32 4294901760, %v952_v59  ;;  %v10400_v43 = vand.u32 4294901760, %v10858_v39  ;;  %vm8287_vm14 = vcmp.eq.s32.totalorder %v7764_v37, %v528_v2 }
  0xff   : > { %6005 = vmatpush1.bf16.msra.mxu0 %v6004_v46  ;;  %10857 = vst [vmem:[#allocation121_spill] sm:$0xff] %v8279_v12  ;;  %v1327_v9 = vsub.f32 %v7671_v21, %v10388_v53  ;;  %v10859_v5 = vmov 0  ;;  %v963_v46 = vsub.f32 %v8248_v15, %v8272_v18  ;;  %v8295_v26 = vsub.f32 %v5726_v51, %v5726_v51 }
 0x100   : > { %v10860_v5 = vsel %vm8287_vm14, 4294967295, %v10859_v5  ;;  %v5727_v59 = vsel %vm8265_vm15, 1.0, %v10760_v1  ;;  %6197 = vmatpush1.bf16.msra.mxu1 %v6196_v19  ;;  %v1339_v2 = vsub.f32 %v7673_v54, %v10397_v31  ;;  %v3701_v53 = vsub.f32 %v10858_v39, %v10400_v43 }
 0x101   : > { %943 = vmatmul.mubr.f32.gmra.mrb[20].mxu0 %v942_v22  ;;  %3317 = vmatmul.mubr.f32.gmra.mrb[20].mxu1 %v942_v22  ;;  %10861 = vst [vmem:[#allocation64_spill] sm:$0xff] %v10860_v5  ;;  %10862 = vst [vmem:[#allocation122_spill] sm:$0xff] %v8295_v26  ;;  %v1328_v22 = vand.u32 4294901760, %v1327_v9  ;;  %v10403_v61 = vand.u32 4294901760, %v10863_v36  ;;  %vm8308_vm13 = vcmp.eq.s32.totalorder %v7764_v37, %v525_v3  ;;  %v10864_v51 = vmov 0 }
 0x102   : > { %948 = vmatprep.mubr.f32.mxu0 %v10760_v1  ;;  %3322 = vmatprep.mubr.f32.mxu1 %v10760_v1  ;;  %v10865_v51 = vsel %vm8308_vm13, 4294967295, %v10864_v51  ;;  %v974_v18 = vsub.f32 %v8260_v45, %v8279_v12  ;;  %v10414_v19 = vand.u32 4294901760, %v7685_v47  ;;  %v8315_v9 = vsub.f32 %v5727_v59, %v5727_v59  ;;  %v10868_v59 = vld [vmem:[#allocation67_spill] sm:$0xff] }
 0x103   : > { %10866 = vst [vmem:[#allocation65_spill] sm:$0xff] %v10865_v51  ;;  %v1340_v31 = vand.u32 4294901760, %v1339_v2  ;;  %v3702_v15 = vand.u32 4294901760, %v3701_v53  ;;  %v3713_v43 = vsub.f32 %v10863_v36, %v10403_v61  ;;  %v964_v3 = vand.u32 4294901760, %v963_v46  ;;  %v534_v46 = vpop.permute.xlu1 %533 }
 0x104   : > { %10867 = vst [vmem:[#allocation123_spill] sm:$0xff] %v8315_v9  ;;  %v5729_v12 = vsel %vm8287_vm14, 1.0, %v10760_v1  ;;  %v10421_v2 = vand.u32 4294901760, %v10868_v59  ;;  %v8330_v53 = vand.u32 4294901760, %v8295_v26  ;;  %v5728_v61 = vsel %vm8308_vm13, 1.0, %v10760_v1 }
 0x105   : > { %954 = vmatmul.mubr.f32.gmra.mrb[22].mxu0 %v953_v6  ;;  %3328 = vmatmul.mubr.f32.gmra.mrb[22].mxu1 %v953_v6  ;;  %v1333_v6 = vsub.f32 %v7685_v47, %v10414_v19  ;;  %v6006_v45 = vpack.c.bf16 %v1340_v31, %v1328_v22  ;;  %v3714_v11 = vand.u32 4294901760, %v3713_v43  ;;  %v10422_v44 = vand.u32 4294901760, %v7691_v28  ;;  %v531_v31 = vpop.permute.xlu0 %530 }
 0x106   : > { %959 = vmatprep.mubr.f32.mxu0 %v10760_v1  ;;  %3333 = vmatprep.mubr.f32.mxu1 %v10760_v1  ;;  %10869 = vst [vmem:[#allocation67_spill] sm:$0xff] %v8330_v53  ;;  %v1345_v5 = vsub.f32 %v10868_v59, %v10421_v2  ;;  %v10427_v19 = vand.u32 4294901760, %v7695_v50  ;;  %v8341_v8 = vand.u32 4294901760, %v8315_v9  ;;  %v8343_v35 = vsub.f32 %v5729_v12, %v5729_v12 }
 0x107   : > { %v1334_v41 = vand.u32 4294901760, %v1333_v6  ;;  %v6198_v51 = vpack.c.bf16 %v3714_v11, %v3702_v15  ;;  %v3707_v22 = vsub.f32 %v7691_v28, %v10422_v44  ;;  %vm8354_vm14 = vcmp.eq.s32.totalorder %v7764_v37, %v534_v46  ;;  %6007 = vmatprep.subr.bf16.mxu0 %v6006_v45 }
 0x108   : > { %10870 = vst [vmem:[#allocation124_spill] sm:$0xff] %v8341_v8  ;;  %10871 = vst [vmem:[#allocation125_spill] sm:$0xff] %v8343_v35  ;;  %v1346_v43 = vand.u32 4294901760, %v1345_v5  ;;  %v10872_v6 = vmov 0  ;;  %v975_v15 = vand.u32 4294901760, %v974_v18  ;;  %v985_v11 = vsub.f32 %v8295_v26, %v8330_v53 }
 0x109   : > { %965 = vmatmul.mubr.f32.gmra.mrb[24].mxu0 %v964_v3  ;;  %3339 = vmatmul.mubr.f32.gmra.mrb[24].mxu1 %v964_v3  ;;  %v3719_v3 = vsub.f32 %v7695_v50, %v10427_v19  ;;  %v10873_v6 = vsel %vm8354_vm14, 4294967295, %v10872_v6  ;;  %v8360_v12 = vsub.f32 %v5728_v61, %v5728_v61  ;;  %v3708_v2 = vand.u32 4294901760, %v3707_v22 }
 0x10a   : > { %970 = vmatprep.mubr.f32.mxu0 %v10760_v1  ;;  %3344 = vmatprep.mubr.f32.mxu1 %v10760_v1  ;;  %10874 = vst [vmem:[#allocation126_spill] sm:$0xff] %v10873_v6  ;;  %v6008_v5 = vpack.c.bf16 %v1346_v43, %v1334_v41  ;;  %vm8363_vm13 = vcmp.eq.s32.totalorder %v7764_v37, %v531_v31  ;;  %v10876_v25 = vmov 0  ;;  %v8370_v46 = vand.u32 4294901760, %v8343_v35 }
 0x10b   : > { %10875 = vst [vmem:[#allocation127_spill] sm:$0xff] %v8360_v12  ;;  %6199 = vmatprep.subr.bf16.mxu1 %v6198_v51  ;;  %v3720_v44 = vand.u32 4294901760, %v3719_v3  ;;  %v10877_v25 = vsel %vm8363_vm13, 4294967295, %v10876_v25  ;;  %v996_v18 = vsub.f32 %v8315_v9, %v8341_v8  ;;  %v10426_v61 = vand.u32 4294901760, %v7699_v52  ;;  %v537_v8 = vpop.permute.xlu0 %536 }
 0x10c   : > { %10878 = vst [vmem:[#allocation128_spill] sm:$0xff] %v10877_v25  ;;  %10879 = vst [vmem:[#allocation129_spill] sm:$0xff] %v8370_v46  ;;  %v5731_v41 = vsel %vm8354_vm14, 1.0, %v10760_v1  ;;  %v10430_v51 = vand.u32 4294901760, %v7701_v55  ;;  %v10433_v31 = vand.u32 4294901760, %v7705_v49  ;;  %v986_v43 = vand.u32 4294901760, %v985_v11  ;;  %6009 = vmatpush1.bf16.msra.mxu0 %v6008_v5 }
 0x10d   : > { %976 = vmatmul.mubr.f32.gmra.mrb[26].mxu0 %v975_v15  ;;  %3350 = vmatmul.mubr.f32.gmra.mrb[26].mxu1 %v975_v15  ;;  %v6200_v45 = vpack.c.bf16 %v3720_v44, %v3708_v2  ;;  %v8381_v22 = vand.u32 4294901760, %v8360_v12  ;;  %v1351_v3 = vsub.f32 %v7699_v52, %v10426_v61  ;;  %v5730_v15 = vsel %vm8363_vm13, 1.0, %v10760_v1 }
 0x10e   : > { %981 = vmatprep.mubr.f32.mxu0 %v10760_v1  ;;  %3355 = vmatprep.mubr.f32.mxu1 %v10760_v1  ;;  %v1363_v44 = vsub.f32 %v7701_v55, %v10430_v51  ;;  %v3725_v2 = vsub.f32 %v7705_v49, %v10433_v31  ;;  %v10446_v11 = vand.u32 4294901760, %v7707_v10  ;;  %v997_v5 = vand.u32 4294901760, %v996_v18 }
 0x10f   : > { %10880 = vst [vmem:[#allocation130_spill] sm:$0xff] %v8381_v22  ;;  %6201 = vmatpush1.bf16.msra.mxu1 %v6200_v45  ;;  %v1018_v61 = vsub.f32 %v8343_v35, %v8370_v46  ;;  %v8398_v19 = vsub.f32 %v5731_v41, %v5731_v41  ;;  %v1352_v45 = vand.u32 4294901760, %v1351_v3  ;;  %v1007_v18 = vsub.f32 %v8360_v12, %v8381_v22 }
 0x110   : > { %v1364_v51 = vand.u32 4294901760, %v1363_v44  ;;  %v3726_v53 = vand.u32 4294901760, %v3725_v2  ;;  %v3737_v31 = vsub.f32 %v7707_v10, %v10446_v11  ;;  %v10444_v41 = vand.u32 4294901760, %v7713_v24 }
 0x111   : > { %987 = vmatmul.mubr.f32.gmra.mrb[28].mxu0 %v986_v43  ;;  %3361 = vmatmul.mubr.f32.gmra.mrb[28].mxu1 %v986_v43  ;;  %10881 = vst [vmem:[#allocation131_spill] sm:$0xff] %v8398_v19  ;;  %v8407_v43 = vsub.f32 %v5730_v15, %v5730_v15  ;;  %v10445_v46 = vand.u32 4294901760, %v7715_v23  ;;  %v10451_v26 = vand.u32 4294901760, %v7721_v4  ;;  %v10452_v3 = vand.u32 4294901760, %v7729_v42 }
 0x112   : > { %992 = vmatprep.mubr.f32.mxu0 %v10760_v1  ;;  %3366 = vmatprep.mubr.f32.mxu1 %v10760_v1  ;;  %v6010_v35 = vpack.c.bf16 %v1364_v51, %v1352_v45  ;;  %v3738_v9 = vand.u32 4294901760, %v3737_v31  ;;  %vm8414_vm14 = vcmp.eq.s32.totalorder %v7764_v37, %v537_v8  ;;  %v10883_v44 = vmov 0  ;;  %v540_v31 = vpop.permute.xlu1 %539 }
 0x113   : > { %10882 = vst [vmem:[#allocation132_spill] sm:$0xff] %v8407_v43  ;;  %v10884_v44 = vsel %vm8414_vm14, 4294967295, %v10883_v44  ;;  %v1357_v15 = vsub.f32 %v7713_v24, %v10444_v41  ;;  %v1369_v51 = vsub.f32 %v7715_v23, %v10445_v46  ;;  %v3731_v8 = vsub.f32 %v7721_v4, %v10451_v26 }
 0x114   : > { %10885 = vst [vmem:[#allocation133_spill] sm:$0xff] %v10884_v44  ;;  %v6202_v2 = vpack.c.bf16 %v3738_v9, %v3726_v53  ;;  %v1008_v45 = vand.u32 4294901760, %v1007_v18  ;;  %v8433_v41 = vand.u32 4294901760, %v8407_v43  ;;  %6011 = vmatprep.subr.bf16.mxu0 %v6010_v35  ;;  %v5732_v22 = vsel %vm8414_vm14, 1.0, %v10760_v1 }
 0x115   : > { %998 = vmatmul.mubr.f32.gmra.mrb[30].mxu0 %v997_v5  ;;  %3372 = vmatmul.mubr.f32.gmra.mrb[30].mxu1 %v997_v5  ;;  %v3743_v5 = vsub.f32 %v7729_v42, %v10452_v3  ;;  %v1358_v46 = vand.u32 4294901760, %v1357_v15  ;;  %v1370_v11 = vand.u32 4294901760, %v1369_v51  ;;  %v3732_v9 = vand.u32 4294901760, %v3731_v8  ;;  %v543_v3 = vpop.permute.xlu0 %542  ;;  %v10890_v51 = vld [vmem:[#allocation41_spill] sm:$0xff] }
 0x116   : > { %1003 = vmatprep.mubr.f32.mxu0 %v10760_v1  ;;  %3377 = vmatprep.mubr.f32.mxu1 %v10760_v1  ;;  %10886 = vst [vmem:[#allocation134_spill] sm:$0xff] %v8433_v41  ;;  %vm8439_vm13 = vcmp.eq.s32.totalorder %v7764_v37, %v540_v31  ;;  %v10887_v26 = vmov 0  ;;  %v1019_v35 = vand.u32 4294901760, %v1018_v61  ;;  %v1029_v8 = vsub.f32 %v8407_v43, %v8433_v41 }
 0x117   : > { %6203 = vmatprep.subr.bf16.mxu1 %v6202_v2  ;;  %v3744_v53 = vand.u32 4294901760, %v3743_v5  ;;  %v10888_v26 = vsel %vm8439_vm13, 4294967295, %v10887_v26  ;;  %v6012_v18 = vpack.c.bf16 %v1370_v11, %v1358_v46  ;;  %v6014_v2 = vpack.c.bf16 %v10890_v51, %v7590_v32  ;;  %v10893_v46 = vld [vmem:[#allocation43_spill] sm:$0xff] }
 0x118   : > { %10889 = vst [vmem:[#allocation135_spill] sm:$0xff] %v10888_v26  ;;  %v8450_v31 = vand.u32 4294901760, %v8398_v19  ;;  %v8452_v5 = vsub.f32 %v5732_v22, %v5732_v22  ;;  %v6206_v11 = vpack.c.bf16 %v10893_v46, %v7612_v48  ;;  %v5733_v61 = vsel %vm8439_vm13, 1.0, %v10760_v1 }
 0x119   : > { %1009 = vmatmul.mubr.f32.gmra.mrb[32].mxu0 %v1008_v45  ;;  %3383 = vmatmul.mubr.f32.gmra.mrb[32].mxu1 %v1008_v45  ;;  %v6204_v15 = vpack.c.bf16 %v3744_v53, %v3732_v9  ;;  %vm8460_vm14 = vcmp.eq.s32.totalorder %v7764_v37, %v543_v3  ;;  %v10894_v45 = vmov 0  ;;  %v546_v9 = vpop.permute.xlu1 %545  ;;  %v1030_v22 = vand.u32 4294901760, %v1029_v8 }
 0x11a   : > { %1014 = vmatprep.mubr.f32.mxu0 %v10760_v1  ;;  %3388 = vmatprep.mubr.f32.mxu1 %v10760_v1  ;;  %10891 = vst [vmem:[#allocation136_spill] sm:$0xff] %v8450_v31  ;;  %10892 = vst [vmem:[#allocation137_spill] sm:$0xff] %v8452_v5  ;;  %v10895_v45 = vsel %vm8460_vm14, 4294967295, %v10894_v45  ;;  %v1040_v53 = vsub.f32 %v8398_v19, %v8450_v31  ;;  %v5734_v3 = vsel %vm8460_vm14, 1.0, %v10760_v1  ;;  %v10909_v19 = vmov 0 }
 0x11b   : > { %6013 = vmatpush1.bf16.msra.mxu0 %v6012_v18  ;;  %6205 = vmatpush1.bf16.msra.mxu1 %v6204_v15  ;;  %10896 = vst [vmem:[#allocation138_spill] sm:$0xff] %v10895_v45  ;;  %v8469_v18 = vand.u32 4294901760, %v8452_v5  ;;  %v8471_v15 = vsub.f32 %v5733_v61, %v5733_v61  ;;  %vm8477_vm13 = vcmp.eq.s32.totalorder %v7764_v37, %v546_v9  ;;  %v10929_v51 = vmov 0 }
 0x11c   : > { %6015 = vmatprep.subr.bf16.mxu0 %v6014_v2  ;;  %6207 = vmatprep.subr.bf16.mxu1 %v6206_v11  ;;  %v549_v2 = vpop.permute.xlu0 %548  ;;  %v1041_v8 = vand.u32 4294901760, %v1040_v53  ;;  %v8488_v31 = vsub.f32 %v5734_v3, %v5734_v3  ;;  %v5735_v9 = vsel %vm8477_vm13, 1.0, %v10760_v1  ;;  %v10914_v3 = vmov 0 }
 0x11d   : > { %1020 = vmatmul.mubr.f32.gmra.mrb[34].mxu0 %v1019_v35  ;;  %3394 = vmatmul.mubr.f32.gmra.mrb[34].mxu1 %v1019_v35  ;;  %10897 = vst [vmem:[#allocation139_spill] sm:$0xff] %v8469_v18  ;;  %10898 = vst [vmem:[#allocation140_spill] sm:$0xff] %v8471_v15  ;;  %v10899_v35 = vmov 0  ;;  %v1051_v11 = vsub.f32 %v8452_v5, %v8469_v18  ;;  %v8486_v61 = vand.u32 4294901760, %v8471_v15  ;;  %vm8494_vm14 = vcmp.eq.s32.totalorder %v7764_v37, %v549_v2  ;;  %v552_v53 = vpop.permute.xlu1 %551 }
 0x11e   : > { %1025 = vmatprep.mubr.f32.mxu0 %v10760_v1  ;;  %3399 = vmatprep.mubr.f32.mxu1 %v10760_v1  ;;  %v10900_v35 = vsel %vm8477_vm13, 4294967295, %v10899_v35  ;;  %10903 = vst [vmem:[#allocation143_spill] sm:$0xff] %v8488_v31  ;;  %v8505_v5 = vand.u32 4294901760, %v8488_v31  ;;  %v8507_v2 = vsub.f32 %v5735_v9, %v5735_v9  ;;  %vm8513_vm13 = vcmp.eq.s32.totalorder %v7764_v37, %v552_v53 }
 0x11f   : > { %10901 = vst [vmem:[#allocation141_spill] sm:$0xff] %v10900_v35  ;;  %10902 = vst [vmem:[#allocation142_spill] sm:$0xff] %v8486_v61  ;;  %v1052_v18 = vand.u32 4294901760, %v1051_v11  ;;  %v1062_v41 = vsub.f32 %v8471_v15, %v8486_v61  ;;  %v10910_v19 = vsel %vm8513_vm13, 4294967295, %v10909_v19 }
 0x120   : > { %10907 = vst [vmem:[#allocation145_spill] sm:$0xff] %v8505_v5  ;;  %10908 = vst [vmem:[#allocation146_spill] sm:$0xff] %v8507_v2  ;;  %v555_v61 = vpop.permute.xlu0 %554  ;;  %v1073_v53 = vsub.f32 %v8488_v31, %v8505_v5  ;;  %v8526_v15 = vand.u32 4294901760, %v8507_v2 }
 0x121   : > { %1031 = vmatmul.mubr.f32.gmra.mrb[36].mxu0 %v1030_v22  ;;  %3405 = vmatmul.mubr.f32.gmra.mrb[36].mxu1 %v1030_v22  ;;  %v10904_v22 = vmov 0  ;;  %10911 = vst [vmem:[#allocation147_spill] sm:$0xff] %v10910_v19  ;;  %v1063_v9 = vand.u32 4294901760, %v1062_v41  ;;  %v558_v41 = vpop.permute.xlu1 %557 }
 0x122   : > { %1036 = vmatprep.mubr.f32.mxu0 %v10760_v1  ;;  %3410 = vmatprep.mubr.f32.mxu1 %v10760_v1  ;;  %v10905_v22 = vsel %vm8494_vm14, 4294967295, %v10904_v22  ;;  %10912 = vst [vmem:[#allocation148_spill] sm:$0xff] %v8526_v15  ;;  %v1074_v11 = vand.u32 4294901760, %v1073_v53 }
 0x123   : > { %10906 = vst [vmem:[#allocation144_spill] sm:$0xff] %v10905_v22 }
 0x124   : > { %v561_v53 = vpop.permute.xlu0 %560 }
 0x125   : > { %1042 = vmatmul.mubr.f32.gmra.mrb[38].mxu0 %v1041_v8  ;;  %3416 = vmatmul.mubr.f32.gmra.mrb[38].mxu1 %v1041_v8  ;;  %v5736_v8 = vsel %vm8494_vm14, 1.0, %v10760_v1  ;;  %vm8534_vm14 = vcmp.eq.s32.totalorder %v7764_v37, %v555_v61 }
 0x126   : > { %1047 = vmatprep.mubr.f32.mxu0 %v10760_v1  ;;  %3421 = vmatprep.mubr.f32.mxu1 %v10760_v1  ;;  %v8528_v43 = vsub.f32 %v5736_v8, %v5736_v8  ;;  %v10915_v3 = vsel %vm8534_vm14, 4294967295, %v10914_v3  ;;  %v1084_v8 = vsub.f32 %v8507_v2, %v8526_v15  ;;  %v5738_v61 = vsel %vm8534_vm14, 1.0, %v10760_v1 }
 0x127   : > { %10916 = vst [vmem:[#allocation150_spill] sm:$0xff] %v10915_v3  ;;  %v8562_v12 = vsub.f32 %v5738_v61, %v5738_v61  ;;  %vm8568_vm14 = vcmp.eq.s32.totalorder %v7764_v37, %v561_v53 }
 0x128   : > { %10913 = vst [vmem:[#allocation149_spill] sm:$0xff] %v8528_v43  ;;  %v8543_v5 = vand.u32 4294901760, %v8528_v43  ;;  %v1085_v15 = vand.u32 4294901760, %v1084_v8  ;;  %v564_v8 = vpop.permute.xlu1 %563  ;;  %v567_v61 = vpop.permute.xlu0 %566 }
 0x129   : > { %1053 = vmatmul.mubr.f32.gmra.mrb[40].mxu0 %v1052_v18  ;;  %3427 = vmatmul.mubr.f32.gmra.mrb[40].mxu1 %v1052_v18  ;;  %v5737_v18 = vsel %vm8513_vm13, 1.0, %v10760_v1  ;;  %vm8551_vm13 = vcmp.eq.s32.totalorder %v7764_v37, %v558_v41  ;;  %10923 = vst [vmem:[#allocation155_spill] sm:$0xff] %v8562_v12  ;;  %v8581_v46 = vand.u32 4294901760, %v8562_v12 }
 0x12a   : > { %1058 = vmatprep.mubr.f32.mxu0 %v10760_v1  ;;  %3432 = vmatprep.mubr.f32.mxu1 %v10760_v1  ;;  %10917 = vst [vmem:[#allocation151_spill] sm:$0xff] %v8543_v5  ;;  %v8545_v31 = vsub.f32 %v5737_v18, %v5737_v18  ;;  %v1095_v18 = vsub.f32 %v8528_v43, %v8543_v5  ;;  %v5739_v41 = vsel %vm8551_vm13, 1.0, %v10760_v1  ;;  %v10934_v5 = vmov 0 }
 0x12b   : > { %10927 = vst [vmem:[#allocation157_spill] sm:$0xff] %v8581_v46  ;;  %v8583_v48 = vsub.f32 %v5739_v41, %v5739_v41 }
 0x12c   : > { %10918 = vst [vmem:[#allocation152_spill] sm:$0xff] %v8545_v31  ;;  %v8560_v2 = vand.u32 4294901760, %v8545_v31  ;;  %v1096_v43 = vand.u32 4294901760, %v1095_v18 }
 0x12d   : > { %1064 = vmatmul.mubr.f32.gmra.mrb[42].mxu0 %v1063_v9  ;;  %3438 = vmatmul.mubr.f32.gmra.mrb[42].mxu1 %v1063_v9  ;;  %v10919_v9 = vmov 0  ;;  %10928 = vst [vmem:[#allocation158_spill] sm:$0xff] %v8583_v48 }
 0x12e   : > { %1069 = vmatprep.mubr.f32.mxu0 %v10760_v1  ;;  %3443 = vmatprep.mubr.f32.mxu1 %v10760_v1  ;;  %v10920_v9 = vsel %vm8551_vm13, 4294967295, %v10919_v9  ;;  %10922 = vst [vmem:[#allocation154_spill] sm:$0xff] %v8560_v2  ;;  %v1106_v53 = vsub.f32 %v8545_v31, %v8560_v2  ;;  %vm8589_vm13 = vcmp.eq.s32.totalorder %v7764_v37, %v564_v8  ;;  %v8602_v2 = vand.u32 4294901760, %v8583_v48 }
 0x12f   : > { %10921 = vst [vmem:[#allocation153_spill] sm:$0xff] %v10920_v9  ;;  %v10930_v51 = vsel %vm8589_vm13, 4294967295, %v10929_v51  ;;  %v1117_v8 = vsub.f32 %v8562_v12, %v8581_v46 }
 0x130   : > { %10931 = vst [vmem:[#allocation159_spill] sm:$0xff] %v10930_v51  ;;  %v1107_v41 = vand.u32 4294901760, %v1106_v53  ;;  %10932 = vst [vmem:[#allocation160_spill] sm:$0xff] %v8602_v2  ;;  %v570_v53 = vpop.permute.xlu1 %569 }
 0x131   : > { %1075 = vmatmul.mubr.f32.gmra.mrb[44].mxu0 %v1074_v11  ;;  %3449 = vmatmul.mubr.f32.gmra.mrb[44].mxu1 %v1074_v11  ;;  %v10924_v11 = vmov 0  ;;  %v1118_v18 = vand.u32 4294901760, %v1117_v8 }
 0x132   : > { %1080 = vmatprep.mubr.f32.mxu0 %v10760_v1  ;;  %3454 = vmatprep.mubr.f32.mxu1 %v10760_v1  ;;  %v10925_v11 = vsel %vm8568_vm14, 4294967295, %v10924_v11 }
 0x133   : > { %10926 = vst [vmem:[#allocation156_spill] sm:$0xff] %v10925_v11 }
 0x135   : > { %1086 = vmatmul.mubr.f32.gmra.mrb[46].mxu0 %v1085_v15  ;;  %3460 = vmatmul.mubr.f32.gmra.mrb[46].mxu1 %v1085_v15  ;;  %v5740_v15 = vsel %vm8568_vm14, 1.0, %v10760_v1  ;;  %vm8610_vm14 = vcmp.eq.s32.totalorder %v7764_v37, %v567_v61 }
 0x136   : > { %1091 = vmatprep.mubr.f32.mxu0 %v10760_v1  ;;  %3465 = vmatprep.mubr.f32.mxu1 %v10760_v1  ;;  %v8604_v31 = vsub.f32 %v5740_v15, %v5740_v15  ;;  %v10935_v5 = vsel %vm8610_vm14, 4294967295, %v10934_v5  ;;  %v1128_v15 = vsub.f32 %v8583_v48, %v8602_v2  ;;  %v5742_v61 = vsel %vm8610_vm14, 1.0, %v10760_v1 }
 0x137   : > { %10936 = vst [vmem:[#allocation162_spill] sm:$0xff] %v10935_v5  ;;  %v8638_v48 = vsub.f32 %v5742_v61, %v5742_v61  ;;  %v11020_v5 = vld [vmem:[#allocation10_spill] sm:$0xff] }
 0x138   : > { %10933 = vst [vmem:[#allocation161_spill] sm:$0xff] %v8604_v31  ;;  %v8619_v46 = vand.u32 4294901760, %v8604_v31  ;;  %v1129_v8 = vand.u32 4294901760, %v1128_v15 }
 0x139   : > { %1097 = vmatmul.mubr.f32.gmra.mrb[48].mxu0 %v1096_v43  ;;  %3471 = vmatmul.mubr.f32.gmra.mrb[48].mxu1 %v1096_v43  ;;  %v5741_v43 = vsel %vm8589_vm13, 1.0, %v10760_v1  ;;  %vm8627_vm13 = vcmp.eq.s32.totalorder %v7764_v37, %v570_v53  ;;  %10943 = vst [vmem:[#allocation167_spill] sm:$0xff] %v8638_v48 }
 0x13a   : > { %1102 = vmatprep.mubr.f32.mxu0 %v10760_v1  ;;  %3476 = vmatprep.mubr.f32.mxu1 %v10760_v1  ;;  %10937 = vst [vmem:[#allocation163_spill] sm:$0xff] %v8619_v46  ;;  %v8621_v12 = vsub.f32 %v5741_v43, %v5741_v43  ;;  %v1139_v43 = vsub.f32 %v8604_v31, %v8619_v46  ;;  %v5743_v37 = vsel %vm8627_vm13, 1.0, %v10760_v1  ;;  %v8652_v46 = vand.u32 4294901760, %v8638_v48 }
 0x13b   : > { %v8654_v31 = vsub.f32 %v5743_v37, %v5743_v37 }
 0x13c   : > { %10938 = vst [vmem:[#allocation164_spill] sm:$0xff] %v8621_v12  ;;  %v8636_v2 = vand.u32 4294901760, %v8621_v12  ;;  %v1140_v15 = vand.u32 4294901760, %v1139_v43  ;;  %10944 = vst [vmem:[#allocation168_spill] sm:$0xff] %v8652_v46  ;;  %v1161_v53 = vsub.f32 %v8638_v48, %v8652_v46  ;;  %v10950_v46 = vld [vmem:[#allocation20_spill] sm:$0xff] }
 0x13d   : > { %1108 = vmatmul.mubr.f32.gmra.mrb[50].mxu0 %v1107_v41  ;;  %3482 = vmatmul.mubr.f32.gmra.mrb[50].mxu1 %v1107_v41  ;;  %v10939_v41 = vmov 0  ;;  %10945 = vst [vmem:[#allocation169_spill] sm:$0xff] %v8654_v31 }
 0x13e   : > { %1113 = vmatprep.mubr.f32.mxu0 %v10760_v1  ;;  %3487 = vmatprep.mubr.f32.mxu1 %v10760_v1  ;;  %v10940_v41 = vsel %vm8627_vm13, 4294967295, %v10939_v41  ;;  %10942 = vst [vmem:[#allocation166_spill] sm:$0xff] %v8636_v2  ;;  %v1150_v61 = vsub.f32 %v8621_v12, %v8636_v2  ;;  %v8665_v2 = vand.u32 4294901760, %v8654_v31  ;;  %v1162_v37 = vand.u32 4294901760, %v1161_v53  ;;  %v10947_v53 = vld [vmem:[#allocation15_spill] sm:$0xff] }
 0x13f   : > { %10941 = vst [vmem:[#allocation165_spill] sm:$0xff] %v10940_v41  ;;  %v10537_v12 = vmov 1.0   ;;  %v11023_v41 = vld [vmem:[#allocation19_spill] sm:$0xff] }
 0x140   : > { %v1151_v43 = vand.u32 4294901760, %v1150_v61  ;;  %10946 = vst [vmem:[#allocation170_spill] sm:$0xff] %v8665_v2 }
 0x141   : > { %1119 = vmatmul.mubr.f32.gmra.mrb[52].mxu0 %v1118_v18  ;;  %3493 = vmatmul.mubr.f32.gmra.mrb[52].mxu1 %v1118_v18  ;;  %v6208_v18 = vpack.c.bf16 %v10947_v53, %v7456_v63  ;;  %v10956_v53 = vld [vmem:[#allocation73_spill] sm:$0xff]  ;;  %v10957_v63 = vld [vmem:[#allocation74_spill] sm:$0xff] }
 0x142   : > { %1124 = vmatprep.mubr.f32.mxu0 %v10760_v1  ;;  %3498 = vmatprep.mubr.f32.mxu1 %v10760_v1 }
 0x145   : > { %1130 = vmatmul.mubr.f32.gmra.mrb[54].mxu0 %v1129_v8  ;;  %3504 = vmatmul.mubr.f32.gmra.mrb[54].mxu1 %v1129_v8  ;;  %v10948_v8 = vld [vmem:[#allocation17_spill] sm:$0xff] }
 0x146   : > { %1135 = vmatprep.mubr.f32.mxu0 %v10760_v1  ;;  %3509 = vmatprep.mubr.f32.mxu1 %v10760_v1 }
 0x149   : > { %1141 = vmatmul.mubr.f32.gmra.mrb[56].mxu0 %v1140_v15  ;;  %3515 = vmatmul.mubr.f32.gmra.mrb[56].mxu1 %v1140_v15  ;;  %v1172_v15 = vsub.f32 %v8654_v31, %v8665_v2  ;;  %v10949_v2 = vld [vmem:[#allocation18_spill] sm:$0xff]  ;;  %v10951_v31 = vld [vmem:[#allocation21_spill] sm:$0xff] }
 0x14a   : > { %1146 = vmatprep.mubr.f32.mxu0 %v10760_v1  ;;  %3520 = vmatprep.mubr.f32.mxu1 %v10760_v1  ;;  %v6210_v48 = vpack.c.bf16 %v10951_v31, %v10950_v46  ;;  %v10955_v31 = vld [vmem:[#allocation27_spill] sm:$0xff] }
 0x14b   : > { %v1173_v61 = vand.u32 4294901760, %v1172_v15  ;;  %v10952_v15 = vld [vmem:[#allocation23_spill] sm:$0xff] }
 0x14d   : > { %1152 = vmatmul.mubr.f32.gmra.mrb[58].mxu0 %v1151_v43  ;;  %3526 = vmatmul.mubr.f32.gmra.mrb[58].mxu1 %v1151_v43  ;;  %v6016_v43 = vpack.c.bf16 %v7448_v57, %v7446_v56  ;;  %v6022_v57 = vpack.c.bf16 %v10957_v63, %v10956_v53  ;;  %v10958_v56 = vld [vmem:[#allocation75_spill] sm:$0xff]  ;;  %v10963_v63 = vld [vmem:[#allocation77_spill] sm:$0xff]  ;;  %v10964_v53 = vld [vmem:[#allocation78_spill] sm:$0xff] }
 0x14e   : > { %1157 = vmatprep.mubr.f32.mxu0 %v10760_v1  ;;  %3531 = vmatprep.mubr.f32.mxu1 %v10760_v1 }
 0x151   : > { %1163 = vmatmul.mubr.f32.gmra.mrb[60].mxu0 %v1162_v37  ;;  %3537 = vmatmul.mubr.f32.gmra.mrb[60].mxu1 %v1162_v37  ;;  %v6018_v37 = vpack.c.bf16 %v10949_v2, %v10948_v8  ;;  %v10954_v8 = vld [vmem:[#allocation26_spill] sm:$0xff] }
 0x152   : > { %1168 = vmatprep.mubr.f32.mxu0 %v10760_v1  ;;  %3542 = vmatprep.mubr.f32.mxu1 %v10760_v1  ;;  %v6212_v46 = vpack.c.bf16 %v10955_v31, %v10954_v8  ;;  %v6218_v31 = vpack.c.bf16 %v10965_v0, %v7805_v34  ;;  %v6030_v34 = vpack.c.bf16 %v7834_v17, %v7829_v16  ;;  %v10971_v8 = vld [vmem:[#allocation85_spill] sm:$0xff] }
 0x155   : > { %1174 = vmatmul.mubr.f32.gmra.mrb[62].mxu0 %v1173_v61  ;;  %3548 = vmatmul.mubr.f32.gmra.mrb[62].mxu1 %v1173_v61  ;;  %v10953_v61 = vld [vmem:[#allocation24_spill] sm:$0xff] }
 0x156   : > { %1404 = vmatprep.mubr.f32.mxu0 %v10760_v1  ;;  %3778 = vmatprep.mubr.f32.mxu1 %v10760_v1  ;;  %v6020_v2 = vpack.c.bf16 %v10953_v61, %v10952_v15 }
 0x159   : > { %5744 = vmatmul.mubr.msk.f32.vlgmr.msra.gmra.mrb[0].mxu0 %vm7934_vm1, %v10537_v12  ;;  %5840 = vmatmul.mubr.msk.f32.vlgmr.msra.gmra.mrb[0].mxu1 %vm7934_vm1, %v10537_v12  ;;  %v6214_v12 = vpack.c.bf16 %v10959_v27, %v10958_v56  ;;  %v6216_v27 = vpack.c.bf16 %v10964_v53, %v10963_v63  ;;  %v6026_v56 = vpack.c.bf16 %v7800_v20, %v7795_v14  ;;  %v10970_v20 = vld [vmem:[#allocation84_spill] sm:$0xff]  ;;  %v11042_v53 = vld [vmem:[#allocation51_spill] sm:$0xff] }
 0x15a   : > { %6017 = vmatpush1.bf16.msra.mxu0 %v6016_v43  ;;  %6209 = vmatpush1.bf16.msra.mxu1 %v6208_v18  ;;  %v10960_v43 = vmov 1.0   ;;  %v10962_v18 = vld [vmem:[#allocation32_spill] sm:$0xff]  ;;  %v6222_v14 = vpack.c.bf16 %v10971_v8, %v10970_v20  ;;  %v10975_v8 = vld [vmem:[#allocation53_spill] sm:$0xff] }
 0x15b   : > { %1411 = vmatprep.mubr.f32.mxu0 %v10760_v1  ;;  %3785 = vmatprep.mubr.f32.mxu1 %v10760_v1 }
 0x15c   : > { %6019 = vmatprep.subr.bf16.mxu0 %v6018_v37  ;;  %6211 = vmatprep.subr.bf16.mxu1 %v6210_v48  ;;  %v10961_v48 = vld [vmem:[#allocation31_spill] sm:$0xff] }
 0x15d   : > { %5745 = vmatmul.mubr.msk.f32.gmra.mrb[2].mxu0 %vm7972_vm2, %v10960_v43  ;;  %5841 = vmatmul.mubr.msk.f32.gmra.mrb[2].mxu1 %vm7972_vm2, %v10960_v43  ;;  %v6024_v37 = vpack.c.bf16 %v10962_v18, %v10961_v48 }
 0x15e   : > { %1418 = vmatprep.mubr.f32.mxu0 %v10760_v1  ;;  %3792 = vmatprep.mubr.f32.mxu1 %v10760_v1 }
 0x15f   : > { %6021 = vmatpush1.bf16.msra.mxu0 %v6020_v2  ;;  %6213 = vmatpush1.bf16.msra.mxu1 %v6212_v46  ;;  %v10969_v2 = vld [vmem:[#allocation83_spill] sm:$0xff] }
 0x160   : > { %6023 = vmatprep.subr.bf16.mxu0 %v6022_v57  ;;  %6215 = vmatprep.subr.bf16.mxu1 %v6214_v12  ;;  %v10967_v57 = vld [vmem:[#allocation37_spill] sm:$0xff]  ;;  %v10968_v12 = vld [vmem:[#allocation38_spill] sm:$0xff]  ;;  %v6220_v0 = vpack.c.bf16 %v7823_v62, %v10969_v2 }
 0x161   : > { %5746 = vmatmul.mubr.msk.f32.gmra.mrb[4].mxu0 %vm7929_vm0, %v10960_v43  ;;  %5842 = vmatmul.mubr.msk.f32.gmra.mrb[4].mxu1 %vm7929_vm0, %v10960_v43  ;;  %v6028_v46 = vpack.c.bf16 %v10968_v12, %v10967_v57 }
 0x162   : > { %1425 = vmatprep.mubr.f32.mxu0 %v10760_v1  ;;  %3799 = vmatprep.mubr.f32.mxu1 %v10760_v1 }
 0x163   : > { %6025 = vmatpush1.bf16.msra.mxu0 %v6024_v37  ;;  %6217 = vmatpush1.bf16.msra.mxu1 %v6216_v27  ;;  %v10973_v27 = vld [vmem:[#allocation50_spill] sm:$0xff]  ;;  %v10974_v37 = vld [vmem:[#allocation52_spill] sm:$0xff] }
 0x164   : > { %6027 = vmatprep.subr.bf16.mxu0 %v6026_v56  ;;  %6219 = vmatprep.subr.bf16.mxu1 %v6218_v31  ;;  %v6032_v56 = vpack.c.bf16 %v10795_v30, %v10794_v33  ;;  %v6224_v31 = vpack.c.bf16 %v10973_v27, %v10798_v40  ;;  %v6034_v20 = vpack.c.bf16 %v10975_v8, %v10974_v37 }
 0x165   : > { %5747 = vmatmul.mubr.msk.f32.gmra.mrb[6].mxu0 %vm7967_vm5, %v10960_v43  ;;  %5843 = vmatmul.mubr.msk.f32.gmra.mrb[6].mxu1 %vm7967_vm5, %v10960_v43 }
 0x166   : > { %1432 = vmatprep.mubr.f32.mxu0 %v10760_v1  ;;  %3806 = vmatprep.mubr.f32.mxu1 %v10760_v1 }
 0x167   : > { %6029 = vmatpush1.bf16.msra.mxu0 %v6028_v46  ;;  %6221 = vmatpush1.bf16.msra.mxu1 %v6220_v0  ;;  %v10979_v0 = vpack.c.bf16 %v10839_v7, %v10830_v60  ;;  %v10981_v46 = vpack.c.bf16 %v7673_v54, %v7671_v21 }
 0x168   : > { %6031 = vmatprep.subr.bf16.mxu0 %v6030_v34  ;;  %6223 = vmatprep.subr.bf16.mxu1 %v6222_v14  ;;  %v10977_v14 = vpack.c.bf16 %v10829_v38, %v10826_v13  ;;  %v11041_v34 = vld [vmem:[#allocation49_spill] sm:$0xff] }
 0x169   : > { %5748 = vmatmul.mubr.msk.f32.gmra.mrb[8].mxu0 %vm8008_vm3, %v10960_v43  ;;  %5844 = vmatmul.mubr.msk.f32.gmra.mrb[8].mxu1 %vm8008_vm3, %v10960_v43 }
 0x16a   : > { %1439 = vmatprep.mubr.f32.mxu0 %v10760_v1  ;;  %3813 = vmatprep.mubr.f32.mxu1 %v10760_v1 }
 0x16b   : > { %6033 = vmatpush1.bf16.msra.mxu0 %v6032_v56  ;;  %6225 = vmatpush1.bf16.msra.mxu1 %v6224_v31  ;;  %v10982_v56 = vpack.c.bf16 %v10863_v36, %v10858_v39  ;;  %v11000_v31 = vld [vmem:[#allocation117_spill] sm:$0xff] }
 0x16c   : > { %6035 = vmatprep.subr.bf16.mxu0 %v6034_v20  ;;  %6227 = vmatprep.subr.bf16.mxu1 %v10977_v14  ;;  %v10980_v20 = vpack.c.bf16 %v7667_v29, %v10843_v58  ;;  %v10984_v14 = vpack.c.bf16 %v10868_v59, %v7685_v47 }
 0x16d   : > { %5749 = vmatmul.mubr.msk.f32.gmra.mrb[10].mxu0 %vm8026_vm6, %v10960_v43  ;;  %5845 = vmatmul.mubr.msk.f32.gmra.mrb[10].mxu1 %vm8026_vm6, %v10960_v43 }
 0x16e   : > { %1446 = vmatprep.mubr.f32.mxu0 %v10760_v1  ;;  %3820 = vmatprep.mubr.f32.mxu1 %v10760_v1 }
 0x16f   : > { %6037 = vmatpush1.bf16.msra.mxu0 %v10979_v0  ;;  %6229 = vmatpush1.bf16.msra.mxu1 %v10980_v20  ;;  %v10985_v0 = vpack.c.bf16 %v7695_v50, %v7691_v28  ;;  %v10986_v20 = vpack.c.bf16 %v7701_v55, %v7699_v52 }
 0x170   : > { %6039 = vmatprep.subr.bf16.mxu0 %v10981_v46  ;;  %6231 = vmatprep.subr.bf16.mxu1 %v10982_v56  ;;  %v10987_v46 = vpack.c.bf16 %v7707_v10, %v7705_v49  ;;  %v11039_v56 = vld [vmem:[#allocation100_spill] sm:$0xff] }
 0x171   : > { %5750 = vmatmul.mubr.msk.f32.gmra.mrb[12].mxu0 %vm8065_vm8, %v10960_v43  ;;  %5846 = vmatmul.mubr.msk.f32.gmra.mrb[12].mxu1 %vm8065_vm8, %v10960_v43 }
 0x172   : > { %1453 = vmatprep.mubr.f32.mxu0 %v10760_v1  ;;  %3827 = vmatprep.mubr.f32.mxu1 %v10760_v1 }
 0x173   : > { %6041 = vmatpush1.bf16.msra.mxu0 %v10984_v14  ;;  %6233 = vmatpush1.bf16.msra.mxu1 %v10985_v0  ;;  %v10989_v14 = vpack.c.bf16 %v7715_v23, %v7713_v24  ;;  %v10990_v0 = vpack.c.bf16 %v7729_v42, %v7721_v4 }
 0x174   : > { %6043 = vmatprep.subr.bf16.mxu0 %v10986_v20  ;;  %6235 = vmatprep.subr.bf16.mxu1 %v10987_v46  ;;  %v10991_v20 = vld [vmem:[#allocation8_spill] sm:$0xff]  ;;  %v10992_v46 = vld [vmem:[#allocation9_spill] sm:$0xff] }
 0x175   : > { %5751 = vmatmul.mubr.msk.f32.gmra.mrb[14].mxu0 %vm8090_vm4, %v10960_v43  ;;  %5847 = vmatmul.mubr.msk.f32.gmra.mrb[14].mxu1 %vm8090_vm4, %v10960_v43 }
 0x176   : > { %1460 = vmatprep.mubr.f32.mxu0 %v10760_v1  ;;  %3834 = vmatprep.mubr.f32.mxu1 %v10760_v1 }
 0x177   : > { %6045 = vmatpush1.bf16.msra.mxu0 %v10989_v14  ;;  %6237 = vmatpush1.bf16.msra.mxu1 %v10990_v0  ;;  %v10998_v0 = vld [vmem:[#allocation59_spill] sm:$0xff]  ;;  %v11038_v14 = vld [vmem:[#allocation44_spill] sm:$0xff] }
 0x178   : > { %6047 = vmatprep.subr.bf16.mxu0 %v10991_v20  ;;  %6239 = vmatprep.subr.bf16.mxu1 %v10992_v46 }
 0x179   : > { %5752 = vmatmul.mubr.msk.f32.gmra.mrb[16].mxu0 %vm8119_vm9, %v10960_v43  ;;  %5848 = vmatmul.mubr.msk.f32.gmra.mrb[16].mxu1 %vm8119_vm9, %v10960_v43 }
 0x17a   : > { %1467 = vmatprep.mubr.f32.mxu0 %v10760_v1  ;;  %3841 = vmatprep.mubr.f32.mxu1 %v10760_v1 }
 0x17d   : > { %5753 = vmatmul.mubr.msk.f32.gmra.mrb[18].mxu0 %vm8140_vm10, %v10960_v43  ;;  %5849 = vmatmul.mubr.msk.f32.gmra.mrb[18].mxu1 %vm8140_vm10, %v10960_v43 }
 0x17e   : > { %1474 = vmatprep.mubr.f32.mxu0 %v10760_v1  ;;  %3848 = vmatprep.mubr.f32.mxu1 %v10760_v1 }
 0x181   : > { %5754 = vmatmul.mubr.msk.f32.gmra.mrb[20].mxu0 %vm8161_vm7, %v10960_v43  ;;  %5850 = vmatmul.mubr.msk.f32.gmra.mrb[20].mxu1 %vm8161_vm7, %v10960_v43  ;;  %vm10999_vm7 = vnez %v10998_v0  ;;  %v11003_v0 = vld [vmem:[#allocation65_spill] sm:$0xff] }
 0x182   : > { %1481 = vmatprep.mubr.f32.mxu0 %v10760_v1  ;;  %3855 = vmatprep.mubr.f32.mxu1 %v10760_v1 }
 0x185   : > { %5755 = vmatmul.mubr.msk.f32.gmra.mrb[22].mxu0 %vm8166_vm11, %v10960_v43  ;;  %5851 = vmatmul.mubr.msk.f32.gmra.mrb[22].mxu1 %vm8166_vm11, %v10960_v43  ;;  %vm11001_vm11 = vnez %v11000_v31  ;;  %v11005_v31 = vld [vmem:[#allocation64_spill] sm:$0xff] }
 0x186   : > { %1488 = vmatprep.mubr.f32.mxu0 %v10760_v1  ;;  %3862 = vmatprep.mubr.f32.mxu1 %v10760_v1 }
 0x189   : > { %5756 = vmatmul.mubr.msk.f32.gmra.mrb[24].mxu0 %vm8204_vm12, %v10960_v43  ;;  %5852 = vmatmul.mubr.msk.f32.gmra.mrb[24].mxu1 %vm8204_vm12, %v10960_v43 }
 0x18a   : > { %1495 = vmatprep.mubr.f32.mxu0 %v10760_v1  ;;  %3869 = vmatprep.mubr.f32.mxu1 %v10760_v1 }
 0x18d   : > { %5757 = vmatmul.mubr.msk.f32.gmra.mrb[26].mxu0 %vm10999_vm7, %v10960_v43  ;;  %5853 = vmatmul.mubr.msk.f32.gmra.mrb[26].mxu1 %vm10999_vm7, %v10960_v43  ;;  %vm11004_vm7 = vnez %v11003_v0  ;;  %v11037_v0 = vld [vmem:[#allocation40_spill] sm:$0xff] }
 0x18e   : > { %1502 = vmatprep.mubr.f32.mxu0 %v10760_v1  ;;  %3876 = vmatprep.mubr.f32.mxu1 %v10760_v1 }
 0x191   : > { %5758 = vmatmul.mubr.msk.f32.gmra.mrb[28].mxu0 %vm11001_vm11, %v10960_v43  ;;  %5854 = vmatmul.mubr.msk.f32.gmra.mrb[28].mxu1 %vm11001_vm11, %v10960_v43  ;;  %vm11006_vm11 = vnez %v11005_v31  ;;  %v11036_v31 = vld [vmem:[#allocation39_spill] sm:$0xff] }
 0x192   : > { %1509 = vmatprep.mubr.f32.mxu0 %v10760_v1  ;;  %3883 = vmatprep.mubr.f32.mxu1 %v10760_v1 }
 0x195   : > { %5759 = vmatmul.mubr.msk.f32.gmra.mrb[30].mxu0 %vm8265_vm15, %v10960_v43  ;;  %5855 = vmatmul.mubr.msk.f32.gmra.mrb[30].mxu1 %vm8265_vm15, %v10960_v43  ;;  %vm11007_vm15 = vnez %v10877_v25  ;;  %v11034_v25 = vld [vmem:[#allocation97_spill] sm:$0xff] }
 0x196   : > { %1516 = vmatprep.mubr.f32.mxu0 %v10760_v1  ;;  %3890 = vmatprep.mubr.f32.mxu1 %v10760_v1 }
 0x199   : > { %5760 = vmatmul.mubr.msk.f32.gmra.mrb[32].mxu0 %vm11004_vm7, %v10960_v43  ;;  %5856 = vmatmul.mubr.msk.f32.gmra.mrb[32].mxu1 %vm11004_vm7, %v10960_v43  ;;  %vm11008_vm7 = vnez %v10873_v6  ;;  %v11033_v6 = vld [vmem:[#allocation35_spill] sm:$0xff] }
 0x19a   : > { %1523 = vmatprep.mubr.f32.mxu0 %v10760_v1  ;;  %3897 = vmatprep.mubr.f32.mxu1 %v10760_v1 }
 0x19d   : > { %5761 = vmatmul.mubr.msk.f32.gmra.mrb[34].mxu0 %vm11006_vm11, %v10960_v43  ;;  %5857 = vmatmul.mubr.msk.f32.gmra.mrb[34].mxu1 %vm11006_vm11, %v10960_v43  ;;  %vm11009_vm11 = vnez %v10884_v44  ;;  %v11032_v44 = vld [vmem:[#allocation34_spill] sm:$0xff] }
 0x19e   : > { %1530 = vmatprep.mubr.f32.mxu0 %v10760_v1  ;;  %3904 = vmatprep.mubr.f32.mxu1 %v10760_v1 }
 0x1a1   : > { %5762 = vmatmul.mubr.msk.f32.gmra.mrb[36].mxu0 %vm11007_vm15, %v10960_v43  ;;  %5858 = vmatmul.mubr.msk.f32.gmra.mrb[36].mxu1 %vm11007_vm15, %v10960_v43  ;;  %vm11010_vm15 = vnez %v10888_v26  ;;  %v11031_v26 = vld [vmem:[#allocation33_spill] sm:$0xff] }
 0x1a2   : > { %1537 = vmatprep.mubr.f32.mxu0 %v10760_v1  ;;  %3911 = vmatprep.mubr.f32.mxu1 %v10760_v1 }
 0x1a5   : > { %5763 = vmatmul.mubr.msk.f32.gmra.mrb[38].mxu0 %vm11008_vm7, %v10960_v43  ;;  %5859 = vmatmul.mubr.msk.f32.gmra.mrb[38].mxu1 %vm11008_vm7, %v10960_v43  ;;  %vm11011_vm7 = vnez %v10895_v45  ;;  %v11029_v45 = vld [vmem:[#allocation89_spill] sm:$0xff] }
 0x1a6   : > { %1544 = vmatprep.mubr.f32.mxu0 %v10760_v1  ;;  %3918 = vmatprep.mubr.f32.mxu1 %v10760_v1 }
 0x1a9   : > { %5764 = vmatmul.mubr.msk.f32.gmra.mrb[40].mxu0 %vm11009_vm11, %v10960_v43  ;;  %5860 = vmatmul.mubr.msk.f32.gmra.mrb[40].mxu1 %vm11009_vm11, %v10960_v43  ;;  %vm11012_vm11 = vnez %v10900_v35  ;;  %v11028_v35 = vld [vmem:[#allocation29_spill] sm:$0xff] }
 0x1aa   : > { %1551 = vmatprep.mubr.f32.mxu0 %v10760_v1  ;;  %3925 = vmatprep.mubr.f32.mxu1 %v10760_v1 }
 0x1ad   : > { %5765 = vmatmul.mubr.msk.f32.gmra.mrb[42].mxu0 %vm11010_vm15, %v10960_v43  ;;  %5861 = vmatmul.mubr.msk.f32.gmra.mrb[42].mxu1 %vm11010_vm15, %v10960_v43  ;;  %vm11013_vm15 = vnez %v10905_v22  ;;  %v11027_v22 = vld [vmem:[#allocation28_spill] sm:$0xff] }
 0x1ae   : > { %1558 = vmatprep.mubr.f32.mxu0 %v10760_v1  ;;  %3932 = vmatprep.mubr.f32.mxu1 %v10760_v1 }
 0x1b1   : > { %5766 = vmatmul.mubr.msk.f32.gmra.mrb[44].mxu0 %vm11011_vm7, %v10960_v43  ;;  %5862 = vmatmul.mubr.msk.f32.gmra.mrb[44].mxu1 %vm11011_vm7, %v10960_v43  ;;  %vm11014_vm7 = vnez %v10910_v19  ;;  %v11026_v19 = vld [vmem:[#allocation25_spill] sm:$0xff] }
 0x1b2   : > { %1565 = vmatprep.mubr.f32.mxu0 %v10760_v1  ;;  %3939 = vmatprep.mubr.f32.mxu1 %v10760_v1 }
 0x1b5   : > { %5767 = vmatmul.mubr.msk.f32.gmra.mrb[46].mxu0 %vm11012_vm11, %v10960_v43  ;;  %5863 = vmatmul.mubr.msk.f32.gmra.mrb[46].mxu1 %vm11012_vm11, %v10960_v43  ;;  %vm11015_vm11 = vnez %v10915_v3  ;;  %v11024_v3 = vld [vmem:[#allocation93_spill] sm:$0xff] }
 0x1b6   : > { %1572 = vmatprep.mubr.f32.mxu0 %v10760_v1  ;;  %3946 = vmatprep.mubr.f32.mxu1 %v10760_v1 }
 0x1b9   : > { %5768 = vmatmul.mubr.msk.f32.gmra.mrb[48].mxu0 %vm11013_vm15, %v10960_v43  ;;  %5864 = vmatmul.mubr.msk.f32.gmra.mrb[48].mxu1 %vm11013_vm15, %v10960_v43  ;;  %vm11016_vm15 = vnez %v10920_v9  ;;  %v11022_v9 = vld [vmem:[#allocation16_spill] sm:$0xff] }
 0x1ba   : > { %1579 = vmatprep.mubr.f32.mxu0 %v10760_v1  ;;  %3953 = vmatprep.mubr.f32.mxu1 %v10760_v1 }
 0x1bd   : > { %5769 = vmatmul.mubr.msk.f32.gmra.mrb[50].mxu0 %vm11014_vm7, %v10960_v43  ;;  %5865 = vmatmul.mubr.msk.f32.gmra.mrb[50].mxu1 %vm11014_vm7, %v10960_v43  ;;  %vm11017_vm7 = vnez %v10925_v11  ;;  %v11021_v11 = vld [vmem:[#allocation13_spill] sm:$0xff] }
 0x1be   : > { %1586 = vmatprep.mubr.f32.mxu0 %v10760_v1  ;;  %3960 = vmatprep.mubr.f32.mxu1 %v10760_v1 }
 0x1c1   : > { %5770 = vmatmul.mubr.msk.f32.gmra.mrb[52].mxu0 %vm11015_vm11, %v10960_v43  ;;  %5866 = vmatmul.mubr.msk.f32.gmra.mrb[52].mxu1 %vm11015_vm11, %v10960_v43  ;;  %vm11018_vm11 = vnez %v10930_v51  ;;  %v11019_v51 = vld [vmem:[#allocation88_spill] sm:$0xff] }
 0x1c2   : > { %1593 = vmatprep.mubr.f32.mxu0 %v10760_v1  ;;  %3967 = vmatprep.mubr.f32.mxu1 %v10760_v1 }
 0x1c5   : > { %5771 = vmatmul.mubr.msk.f32.gmra.mrb[54].mxu0 %vm11016_vm15, %v10960_v43  ;;  %5867 = vmatmul.mubr.msk.f32.gmra.mrb[54].mxu1 %vm11016_vm15, %v10960_v43 }
 0x1c6   : > { %1600 = vmatprep.mubr.f32.mxu0 %v10760_v1  ;;  %3974 = vmatprep.mubr.f32.mxu1 %v10760_v1 }
 0x1c9   : > { %5772 = vmatmul.mubr.msk.f32.gmra.mrb[56].mxu0 %vm11017_vm7, %v10960_v43  ;;  %5868 = vmatmul.mubr.msk.f32.gmra.mrb[56].mxu1 %vm11017_vm7, %v10960_v43 }
 0x1ca   : > { %1607 = vmatprep.mubr.f32.mxu0 %v10760_v1  ;;  %3981 = vmatprep.mubr.f32.mxu1 %v10760_v1 }
 0x1cd   : > { %5773 = vmatmul.mubr.msk.f32.gmra.mrb[58].mxu0 %vm11018_vm11, %v10960_v43  ;;  %5869 = vmatmul.mubr.msk.f32.gmra.mrb[58].mxu1 %vm11018_vm11, %v10960_v43 }
 0x1ce   : > { %1614 = vmatprep.mubr.f32.mxu0 %v10760_v1  ;;  %3988 = vmatprep.mubr.f32.mxu1 %v10760_v1 }
 0x1d1   : > { %5774 = vmatmul.mubr.msk.f32.gmra.mrb[60].mxu0 %vm8610_vm14, %v10960_v43  ;;  %5870 = vmatmul.mubr.msk.f32.gmra.mrb[60].mxu1 %vm8610_vm14, %v10960_v43 }
 0x1d2   : > { %1621 = vmatprep.mubr.f32.mxu0 %v10760_v1  ;;  %3995 = vmatprep.mubr.f32.mxu1 %v10760_v1 }
 0x1d5   : > { %5775 = vmatmul.mubr.msk.f32.gmra.mrb[62].mxu0 %vm8627_vm13, %v10960_v43  ;;  %5871 = vmatmul.mubr.msk.f32.gmra.mrb[62].mxu1 %vm8627_vm13, %v10960_v43 }
 0x1d6   : > { %1757 = vmatprep.mubr.f32.mxu0 %v10760_v1  ;;  %4131 = vmatprep.mubr.f32.mxu1 %v10760_v1 }
 0x1d9   : > { %1760 = vmatmul.mubr.f32.vlgmr.msra.gmra.mrb[0].mxu0 %v11019_v51  ;;  %4134 = vmatmul.mubr.f32.vlgmr.msra.gmra.mrb[0].mxu1 %v11019_v51  ;;  %v11025_v51 = vld [vmem:[#allocation22_spill] sm:$0xff] }
 0x1da   : > { %6049 = vmatpush1.bf16.msra.mxu0 %v11020_v5  ;;  %6241 = vmatpush1.bf16.msra.mxu1 %v11021_v11  ;;  %v11104_v5 = vld [vmem:[#allocation92_spill] sm:$0xff] }
 0x1db   : > { %1765 = vmatprep.mubr.f32.mxu0 %v10760_v1  ;;  %4139 = vmatprep.mubr.f32.mxu1 %v10760_v1 }
 0x1dc   : > { %6051 = vmatprep.subr.bf16.mxu0 %v11022_v9  ;;  %6243 = vmatprep.subr.bf16.mxu1 %v11023_v41  ;;  %v11102_v41 = vld [vmem:[#allocation21_spill] sm:$0xff] }
 0x1dd   : > { %1768 = vmatmul.mubr.f32.gmra.mrb[2].mxu0 %v11024_v3  ;;  %4142 = vmatmul.mubr.f32.gmra.mrb[2].mxu1 %v11024_v3  ;;  %v11030_v3 = vld [vmem:[#allocation30_spill] sm:$0xff]  ;;  %v11103_v9 = vand.u32 4294901760, %v11102_v41 }
 0x1de   : > { %1773 = vmatprep.mubr.f32.mxu0 %v10760_v1  ;;  %4147 = vmatprep.mubr.f32.mxu1 %v10760_v1 }
 0x1df   : > { %6053 = vmatpush1.bf16.msra.mxu0 %v11025_v51  ;;  %6245 = vmatpush1.bf16.msra.mxu1 %v11026_v19 }
 0x1e0   : > { %6055 = vmatprep.subr.bf16.mxu0 %v11027_v22  ;;  %6247 = vmatprep.subr.bf16.mxu1 %v11028_v35  ;;  %v11061_v22 = vld [vmem:[#allocation106_spill] sm:$0xff] }
 0x1e1   : > { %1776 = vmatmul.mubr.f32.gmra.mrb[4].mxu0 %v11029_v45  ;;  %4150 = vmatmul.mubr.f32.gmra.mrb[4].mxu1 %v11029_v45  ;;  %v11035_v45 = vld [vmem:[#allocation36_spill] sm:$0xff] }
 0x1e2   : > { %1781 = vmatprep.mubr.f32.mxu0 %v10760_v1  ;;  %4155 = vmatprep.mubr.f32.mxu1 %v10760_v1 }
 0x1e3   : > { %6057 = vmatpush1.bf16.msra.mxu0 %v11030_v3  ;;  %6249 = vmatpush1.bf16.msra.mxu1 %v11031_v26 }
 0x1e4   : > { %6059 = vmatprep.subr.bf16.mxu0 %v11032_v44  ;;  %6251 = vmatprep.subr.bf16.mxu1 %v11033_v6  ;;  %v11057_v44 = vld [vmem:[#allocation42_spill] sm:$0xff] }
 0x1e5   : > { %1784 = vmatmul.mubr.f32.gmra.mrb[6].mxu0 %v11034_v25  ;;  %4158 = vmatmul.mubr.f32.gmra.mrb[6].mxu1 %v11034_v25  ;;  %v11040_v25 = vld [vmem:[#allocation45_spill] sm:$0xff]  ;;  %v11058_v26 = vand.u32 4294901760, %v11057_v44  ;;  %v11066_v44 = vld [vmem:[#allocation58_spill] sm:$0xff] }
 0x1e6   : > { %1789 = vmatprep.mubr.f32.mxu0 %v10760_v1  ;;  %4163 = vmatprep.mubr.f32.mxu1 %v10760_v1 }
 0x1e7   : > { %6061 = vmatpush1.bf16.msra.mxu0 %v11035_v45  ;;  %6253 = vmatpush1.bf16.msra.mxu1 %v11036_v31  ;;  %v11043_v45 = vld [vmem:[#allocation54_spill] sm:$0xff]  ;;  %v11044_v31 = vld [vmem:[#allocation47_spill] sm:$0xff] }
 0x1e8   : > { %6063 = vmatprep.subr.bf16.mxu0 %v11037_v0  ;;  %6255 = vmatprep.subr.bf16.mxu1 %v11038_v14  ;;  %v11046_v14 = vld [vmem:[#allocation61_spill] sm:$0xff]  ;;  %v11047_v0 = vld [vmem:[#allocation62_spill] sm:$0xff] }
 0x1e9   : > { %1792 = vmatmul.mubr.f32.gmra.mrb[8].mxu0 %v11039_v56  ;;  %4166 = vmatmul.mubr.f32.gmra.mrb[8].mxu1 %v11039_v56  ;;  %v11045_v56 = vld [vmem:[#allocation57_spill] sm:$0xff] }
 0x1ea   : > { %1797 = vmatprep.mubr.f32.mxu0 %v10760_v1  ;;  %4171 = vmatprep.mubr.f32.mxu1 %v10760_v1 }
 0x1eb   : > { %6065 = vmatpush1.bf16.msra.mxu0 %v11040_v25  ;;  %6257 = vmatpush1.bf16.msra.mxu1 %v11041_v34  ;;  %v11048_v25 = vld [vmem:[#allocation63_spill] sm:$0xff] }
 0x1ec   : > { %6067 = vmatprep.subr.bf16.mxu0 %v11042_v53  ;;  %6259 = vmatprep.subr.bf16.mxu1 %v11043_v45  ;;  %v11049_v34 = vld [vmem:[#allocation103_spill] sm:$0xff]  ;;  %v11051_v45 = vld [vmem:[#allocation68_spill] sm:$0xff]  ;;  %v11052_v53 = vld [vmem:[#allocation69_spill] sm:$0xff] }
 0x1ed   : > { %1800 = vmatmul.mubr.f32.gmra.mrb[10].mxu0 %v11044_v31  ;;  %4174 = vmatmul.mubr.f32.gmra.mrb[10].mxu1 %v11044_v31  ;;  %v11050_v31 = vld [vmem:[#allocation66_spill] sm:$0xff] }
 0x1ee   : > { %1805 = vmatprep.mubr.f32.mxu0 %v10760_v1  ;;  %4179 = vmatprep.mubr.f32.mxu1 %v10760_v1 }
 0x1ef   : > { %6069 = vmatpush1.bf16.msra.mxu0 %v11045_v56  ;;  %6261 = vmatpush1.bf16.msra.mxu1 %v11046_v14  ;;  %v11053_v56 = vld [vmem:[#allocation70_spill] sm:$0xff]  ;;  %v11055_v14 = vld [vmem:[#allocation41_spill] sm:$0xff] }
 0x1f0   : > { %6071 = vmatprep.subr.bf16.mxu0 %v11047_v0  ;;  %6263 = vmatprep.subr.bf16.mxu1 %v11048_v25  ;;  %v11054_v0 = vand.u32 4294901760, %v7590_v32  ;;  %v11056_v25 = vand.u32 4294901760, %v11055_v14  ;;  %v11064_v32 = vld [vmem:[#allocation109_spill] sm:$0xff]  ;;  %v11070_v14 = vld [vmem:[#allocation122_spill] sm:$0xff] }
 0x1f1   : > { %1808 = vmatmul.mubr.f32.gmra.mrb[12].mxu0 %v11049_v34  ;;  %4182 = vmatmul.mubr.f32.gmra.mrb[12].mxu1 %v11049_v34  ;;  %v11059_v34 = vld [vmem:[#allocation43_spill] sm:$0xff] }
 0x1f2   : > { %1813 = vmatprep.mubr.f32.mxu0 %v10760_v1  ;;  %4187 = vmatprep.mubr.f32.mxu1 %v10760_v1  ;;  %v6078_v6 = vpack.c.bf16 %v11056_v25, %v11054_v0  ;;  %v11060_v3 = vand.u32 4294901760, %v11059_v34  ;;  %v11071_v0 = vld [vmem:[#allocation123_spill] sm:$0xff]  ;;  %v11073_v25 = vld [vmem:[#allocation125_spill] sm:$0xff]  ;;  %v11074_v34 = vld [vmem:[#allocation132_spill] sm:$0xff] }
 0x1f3   : > { %6073 = vmatpush1.bf16.msra.mxu0 %v11050_v31  ;;  %6265 = vmatpush1.bf16.msra.mxu1 %v11051_v45  ;;  %v11098_v45 = vld [vmem:[#allocation18_spill] sm:$0xff] }
 0x1f4   : > { %6075 = vmatprep.subr.bf16.mxu0 %v11052_v53  ;;  %6267 = vmatprep.subr.bf16.mxu1 %v11053_v56  ;;  %v6270_v35 = vpack.c.bf16 %v11060_v3, %v11058_v26  ;;  %v11062_v53 = vld [vmem:[#allocation71_spill] sm:$0xff]  ;;  %v11063_v56 = vld [vmem:[#allocation72_spill] sm:$0xff]  ;;  %v11099_v31 = vand.u32 4294901760, %v11098_v45  ;;  %v11106_v45 = vand.u32 4294901760, %v10953_v61 }
 0x1f5   : > { %1816 = vmatmul.mubr.f32.gmra.mrb[14].mxu0 %v11061_v22  ;;  %4190 = vmatmul.mubr.f32.gmra.mrb[14].mxu1 %v11061_v22  ;;  %v11065_v26 = vld [vmem:[#allocation112_spill] sm:$0xff]  ;;  %v11069_v22 = vld [vmem:[#allocation118_spill] sm:$0xff]  ;;  %v11072_v3 = vld [vmem:[#allocation127_spill] sm:$0xff] }
 0x1f6   : > { %1821 = vmatprep.mubr.f32.mxu0 %v10760_v1  ;;  %4195 = vmatprep.mubr.f32.mxu1 %v10760_v1 }
 0x1f7   : > { %6077 = vmatpush1.bf16.msra.mxu0 %v11062_v53  ;;  %6269 = vmatpush1.bf16.msra.mxu1 %v11063_v56  ;;  %v11096_v56 = vld [vmem:[#allocation17_spill] sm:$0xff] }
 0x1f8   : > { %6079 = vmatprep.subr.bf16.mxu0 %v6078_v6  ;;  %6271 = vmatprep.subr.bf16.mxu1 %v6270_v35  ;;  %v11067_v6 = vld [vmem:[#allocation114_spill] sm:$0xff]  ;;  %v11068_v35 = vld [vmem:[#allocation116_spill] sm:$0xff]  ;;  %v11097_v53 = vand.u32 4294901760, %v11096_v56  ;;  %v11105_v56 = vand.u32 4294901760, %v10952_v15 }
 0x1f9   : > { %1824 = vmatmul.mubr.f32.gmra.mrb[16].mxu0 %v11064_v32  ;;  %4198 = vmatmul.mubr.f32.gmra.mrb[16].mxu1 %v11064_v32  ;;  %v11075_v32 = vld [vmem:[#allocation131_spill] sm:$0xff] }
 0x1fa   : > { %1829 = vmatprep.mubr.f32.mxu0 %v10760_v1  ;;  %4203 = vmatprep.mubr.f32.mxu1 %v10760_v1  ;;  %v6082_v19 = vpack.c.bf16 %v11099_v31, %v11097_v53  ;;  %v6084_v53 = vpack.c.bf16 %v11106_v45, %v11105_v56  ;;  %v11107_v31 = vld [vmem:[#allocation26_spill] sm:$0xff] }
 0x1fb   : > { %v11123_v56 = vld [vmem:[#allocation78_spill] sm:$0xff] }
 0x1fc   : > { %v11124_v45 = vand.u32 4294901760, %v11123_v56 }
 0x1fd   : > { %1832 = vmatmul.mubr.f32.gmra.mrb[18].mxu0 %v11065_v26  ;;  %4206 = vmatmul.mubr.f32.gmra.mrb[18].mxu1 %v11065_v26  ;;  %v11076_v26 = vld [vmem:[#allocation137_spill] sm:$0xff] }
 0x1fe   : > { %1837 = vmatprep.mubr.f32.mxu0 %v10760_v1  ;;  %4211 = vmatprep.mubr.f32.mxu1 %v10760_v1 }
 0x201   : > { %1840 = vmatmul.mubr.f32.gmra.mrb[20].mxu0 %v11066_v44  ;;  %4214 = vmatmul.mubr.f32.gmra.mrb[20].mxu1 %v11066_v44  ;;  %v11077_v44 = vld [vmem:[#allocation140_spill] sm:$0xff] }
 0x202   : > { %1845 = vmatprep.mubr.f32.mxu0 %v10760_v1  ;;  %4219 = vmatprep.mubr.f32.mxu1 %v10760_v1 }
 0x205   : > { %1848 = vmatmul.mubr.f32.gmra.mrb[22].mxu0 %v11067_v6  ;;  %4222 = vmatmul.mubr.f32.gmra.mrb[22].mxu1 %v11067_v6  ;;  %v11078_v6 = vld [vmem:[#allocation143_spill] sm:$0xff] }
 0x206   : > { %1853 = vmatprep.mubr.f32.mxu0 %v10760_v1  ;;  %4227 = vmatprep.mubr.f32.mxu1 %v10760_v1 }
 0x209   : > { %1856 = vmatmul.mubr.f32.gmra.mrb[24].mxu0 %v11068_v35  ;;  %4230 = vmatmul.mubr.f32.gmra.mrb[24].mxu1 %v11068_v35  ;;  %v11079_v35 = vld [vmem:[#allocation146_spill] sm:$0xff] }
 0x20a   : > { %1861 = vmatprep.mubr.f32.mxu0 %v10760_v1  ;;  %4235 = vmatprep.mubr.f32.mxu1 %v10760_v1 }
 0x20d   : > { %1864 = vmatmul.mubr.f32.gmra.mrb[26].mxu0 %v11069_v22  ;;  %4238 = vmatmul.mubr.f32.gmra.mrb[26].mxu1 %v11069_v22  ;;  %v11080_v22 = vld [vmem:[#allocation149_spill] sm:$0xff] }
 0x20e   : > { %1869 = vmatprep.mubr.f32.mxu0 %v10760_v1  ;;  %4243 = vmatprep.mubr.f32.mxu1 %v10760_v1 }
 0x211   : > { %1872 = vmatmul.mubr.f32.gmra.mrb[28].mxu0 %v11070_v14  ;;  %4246 = vmatmul.mubr.f32.gmra.mrb[28].mxu1 %v11070_v14  ;;  %v11081_v14 = vld [vmem:[#allocation152_spill] sm:$0xff] }
 0x212   : > { %1877 = vmatprep.mubr.f32.mxu0 %v10760_v1  ;;  %4251 = vmatprep.mubr.f32.mxu1 %v10760_v1 }
 0x215   : > { %1880 = vmatmul.mubr.f32.gmra.mrb[30].mxu0 %v11071_v0  ;;  %4254 = vmatmul.mubr.f32.gmra.mrb[30].mxu1 %v11071_v0  ;;  %v11082_v0 = vld [vmem:[#allocation155_spill] sm:$0xff] }
 0x216   : > { %1885 = vmatprep.mubr.f32.mxu0 %v10760_v1  ;;  %4259 = vmatprep.mubr.f32.mxu1 %v10760_v1 }
 0x219   : > { %1888 = vmatmul.mubr.f32.gmra.mrb[32].mxu0 %v11072_v3  ;;  %4262 = vmatmul.mubr.f32.gmra.mrb[32].mxu1 %v11072_v3  ;;  %v11083_v3 = vld [vmem:[#allocation158_spill] sm:$0xff] }
 0x21a   : > { %1893 = vmatprep.mubr.f32.mxu0 %v10760_v1  ;;  %4267 = vmatprep.mubr.f32.mxu1 %v10760_v1 }
 0x21d   : > { %1896 = vmatmul.mubr.f32.gmra.mrb[34].mxu0 %v11073_v25  ;;  %4270 = vmatmul.mubr.f32.gmra.mrb[34].mxu1 %v11073_v25  ;;  %v11084_v25 = vld [vmem:[#allocation161_spill] sm:$0xff] }
 0x21e   : > { %1901 = vmatprep.mubr.f32.mxu0 %v10760_v1  ;;  %4275 = vmatprep.mubr.f32.mxu1 %v10760_v1 }
 0x221   : > { %1904 = vmatmul.mubr.f32.gmra.mrb[36].mxu0 %v11074_v34  ;;  %4278 = vmatmul.mubr.f32.gmra.mrb[36].mxu1 %v11074_v34  ;;  %v11085_v34 = vld [vmem:[#allocation164_spill] sm:$0xff] }
 0x222   : > { %1909 = vmatprep.mubr.f32.mxu0 %v10760_v1  ;;  %4283 = vmatprep.mubr.f32.mxu1 %v10760_v1 }
 0x225   : > { %1912 = vmatmul.mubr.f32.gmra.mrb[38].mxu0 %v11075_v32  ;;  %4286 = vmatmul.mubr.f32.gmra.mrb[38].mxu1 %v11075_v32  ;;  %v11086_v32 = vld [vmem:[#allocation167_spill] sm:$0xff] }
 0x226   : > { %1917 = vmatprep.mubr.f32.mxu0 %v10760_v1  ;;  %4291 = vmatprep.mubr.f32.mxu1 %v10760_v1 }
 0x229   : > { %1920 = vmatmul.mubr.f32.gmra.mrb[40].mxu0 %v11076_v26  ;;  %4294 = vmatmul.mubr.f32.gmra.mrb[40].mxu1 %v11076_v26  ;;  %v11087_v26 = vld [vmem:[#allocation169_spill] sm:$0xff] }
 0x22a   : > { %1925 = vmatprep.mubr.f32.mxu0 %v10760_v1  ;;  %4299 = vmatprep.mubr.f32.mxu1 %v10760_v1 }
 0x22d   : > { %1928 = vmatmul.mubr.f32.gmra.mrb[42].mxu0 %v11077_v44  ;;  %4302 = vmatmul.mubr.f32.gmra.mrb[42].mxu1 %v11077_v44  ;;  %v11088_v44 = vld [vmem:[#allocation11_spill] sm:$0xff] }
 0x22e   : > { %1933 = vmatprep.mubr.f32.mxu0 %v10760_v1  ;;  %4307 = vmatprep.mubr.f32.mxu1 %v10760_v1 }
 0x231   : > { %1936 = vmatmul.mubr.f32.gmra.mrb[44].mxu0 %v11078_v6  ;;  %4310 = vmatmul.mubr.f32.gmra.mrb[44].mxu1 %v11078_v6  ;;  %v11089_v6 = vand.u32 4294901760, %v11088_v44  ;;  %v11108_v44 = vand.u32 4294901760, %v11107_v31 }
 0x232   : > { %1941 = vmatprep.mubr.f32.mxu0 %v10760_v1  ;;  %4315 = vmatprep.mubr.f32.mxu1 %v10760_v1 }
 0x235   : > { %1944 = vmatmul.mubr.f32.gmra.mrb[46].mxu0 %v11079_v35  ;;  %4318 = vmatmul.mubr.f32.gmra.mrb[46].mxu1 %v11079_v35  ;;  %v11090_v35 = vld [vmem:[#allocation12_spill] sm:$0xff] }
 0x236   : > { %1949 = vmatprep.mubr.f32.mxu0 %v10760_v1  ;;  %4323 = vmatprep.mubr.f32.mxu1 %v10760_v1 }
 0x239   : > { %1952 = vmatmul.mubr.f32.gmra.mrb[48].mxu0 %v11080_v22  ;;  %4326 = vmatmul.mubr.f32.gmra.mrb[48].mxu1 %v11080_v22  ;;  %v11091_v22 = vand.u32 4294901760, %v11090_v35  ;;  %v11113_v35 = vld [vmem:[#allocation74_spill] sm:$0xff] }
 0x23a   : > { %1957 = vmatprep.mubr.f32.mxu0 %v10760_v1  ;;  %4331 = vmatprep.mubr.f32.mxu1 %v10760_v1 }
 0x23d   : > { %1960 = vmatmul.mubr.f32.gmra.mrb[50].mxu0 %v11081_v14  ;;  %4334 = vmatmul.mubr.f32.gmra.mrb[50].mxu1 %v11081_v14  ;;  %v6080_v14 = vpack.c.bf16 %v11091_v22, %v11089_v6  ;;  %v11109_v6 = vld [vmem:[#allocation27_spill] sm:$0xff]  ;;  %v11114_v22 = vand.u32 4294901760, %v11113_v35  ;;  %v11129_v35 = vld [vmem:[#allocation81_spill] sm:$0xff] }
 0x23e   : > { %1965 = vmatprep.mubr.f32.mxu0 %v10760_v1  ;;  %4339 = vmatprep.mubr.f32.mxu1 %v10760_v1  ;;  %v11110_v41 = vand.u32 4294901760, %v11109_v6 }
 0x241   : > { %1968 = vmatmul.mubr.f32.gmra.mrb[52].mxu0 %v11082_v0  ;;  %4342 = vmatmul.mubr.f32.gmra.mrb[52].mxu1 %v11082_v0  ;;  %v11092_v0 = vld [vmem:[#allocation14_spill] sm:$0xff] }
 0x242   : > { %1973 = vmatprep.mubr.f32.mxu0 %v10760_v1  ;;  %4347 = vmatprep.mubr.f32.mxu1 %v10760_v1 }
 0x245   : > { %1976 = vmatmul.mubr.f32.gmra.mrb[54].mxu0 %v11083_v3  ;;  %4350 = vmatmul.mubr.f32.gmra.mrb[54].mxu1 %v11083_v3  ;;  %v11093_v3 = vand.u32 4294901760, %v11092_v0  ;;  %v11115_v0 = vld [vmem:[#allocation75_spill] sm:$0xff] }
 0x246   : > { %1981 = vmatprep.mubr.f32.mxu0 %v10760_v1  ;;  %4355 = vmatprep.mubr.f32.mxu1 %v10760_v1 }
 0x249   : > { %1984 = vmatmul.mubr.f32.gmra.mrb[56].mxu0 %v11084_v25  ;;  %4358 = vmatmul.mubr.f32.gmra.mrb[56].mxu1 %v11084_v25  ;;  %v11094_v25 = vld [vmem:[#allocation15_spill] sm:$0xff] }
 0x24a   : > { %1989 = vmatprep.mubr.f32.mxu0 %v10760_v1  ;;  %4363 = vmatprep.mubr.f32.mxu1 %v10760_v1 }
 0x24d   : > { %1992 = vmatmul.mubr.f32.gmra.mrb[58].mxu0 %v11085_v34  ;;  %4366 = vmatmul.mubr.f32.gmra.mrb[58].mxu1 %v11085_v34  ;;  %v11095_v34 = vand.u32 4294901760, %v11094_v25  ;;  %v11117_v25 = vld [vmem:[#allocation76_spill] sm:$0xff] }
 0x24e   : > { %1997 = vmatprep.mubr.f32.mxu0 %v10760_v1  ;;  %4371 = vmatprep.mubr.f32.mxu1 %v10760_v1 }
 0x251   : > { %2000 = vmatmul.mubr.f32.gmra.mrb[60].mxu0 %v11086_v32  ;;  %4374 = vmatmul.mubr.f32.gmra.mrb[60].mxu1 %v11086_v32  ;;  %v6272_v32 = vpack.c.bf16 %v11095_v34, %v11093_v3  ;;  %v11116_v3 = vand.u32 4294901760, %v11115_v0  ;;  %v11118_v34 = vand.u32 4294901760, %v11117_v25  ;;  %v11133_v0 = vld [vmem:[#allocation94_spill] sm:$0xff]  ;;  %v11137_v25 = vand.u32 4294901760, %v7823_v62 }
 0x252   : > { %2005 = vmatprep.mubr.f32.mxu0 %v10760_v1  ;;  %4379 = vmatprep.mubr.f32.mxu1 %v10760_v1  ;;  %v11145_v62 = vand.u32 4294901760, %v10794_v33 }
 0x253   : > { %v6278_v15 = vpack.c.bf16 %v11118_v34, %v11116_v3  ;;  %v11136_v3 = vand.u32 4294901760, %v10969_v2  ;;  %v11148_v2 = vand.u32 4294901760, %v10973_v27 }
 0x255   : > { %2008 = vmatmul.mubr.f32.gmra.mrb[62].mxu0 %v11087_v26  ;;  %4382 = vmatmul.mubr.f32.gmra.mrb[62].mxu1 %v11087_v26  ;;  %v11100_v26 = vld [vmem:[#allocation20_spill] sm:$0xff]  ;;  %v6284_v34 = vpack.c.bf16 %v11137_v25, %v11136_v3  ;;  %v11170_v3 = vand.u32 4294901760, %v7707_v10  ;;  %v11171_v25 = vld [vmem:[#allocation105_spill] sm:$0xff] }
 0x256   : > { %2110 = vmatprep.mubr.f32.mxu0 %v10760_v1  ;;  %4484 = vmatprep.mubr.f32.mxu1 %v10760_v1  ;;  %v11101_v51 = vand.u32 4294901760, %v11100_v26  ;;  %v11122_v26 = vand.u32 4294901760, %v10963_v63  ;;  %v11134_v63 = vand.u32 4294901760, %v10967_v57 }
 0x258   : > { %v6274_v11 = vpack.c.bf16 %v11103_v9, %v11101_v51  ;;  %v6276_v9 = vpack.c.bf16 %v11110_v41, %v11108_v44  ;;  %v11111_v51 = vld [vmem:[#allocation73_spill] sm:$0xff]  ;;  %v6280_v31 = vpack.c.bf16 %v11124_v45, %v11122_v26  ;;  %v11125_v44 = vld [vmem:[#allocation79_spill] sm:$0xff]  ;;  %v11127_v41 = vld [vmem:[#allocation80_spill] sm:$0xff] }
 0x259   : > { %2114 = vmatmul.mubr.f32.vlgmr.msra.gmra.mrb[0].mxu0 %v11104_v5  ;;  %4488 = vmatmul.mubr.f32.vlgmr.msra.gmra.mrb[0].mxu1 %v11104_v5  ;;  %v11112_v5 = vand.u32 4294901760, %v11111_v51  ;;  %v11126_v6 = vand.u32 4294901760, %v11125_v44  ;;  %v11128_v51 = vand.u32 4294901760, %v11127_v41  ;;  %v11142_v26 = vld [vmem:[#allocation85_spill] sm:$0xff]  ;;  %v11144_v45 = vld [vmem:[#allocation99_spill] sm:$0xff]  ;;  %v11149_v44 = vand.u32 4294901760, %v10974_v37 }
 0x25a   : > { %6081 = vmatpush1.bf16.msra.mxu0 %v6080_v14  ;;  %6273 = vmatpush1.bf16.msra.mxu1 %v6272_v32  ;;  %v11119_v32 = vld [vmem:[#allocation96_spill] sm:$0xff]  ;;  %v11143_v56 = vand.u32 4294901760, %v11142_v26  ;;  %v11158_v37 = vand.u32 4294901760, %v7671_v21  ;;  %v11189_v26 = vld [vmem:[#allocation139_spill] sm:$0xff] }
 0x25b   : > { %2119 = vmatprep.mubr.f32.mxu0 %v10760_v1  ;;  %4493 = vmatprep.mubr.f32.mxu1 %v10760_v1  ;;  %v6086_v14 = vpack.c.bf16 %v11114_v22, %v11112_v5  ;;  %v6090_v5 = vpack.c.bf16 %v11128_v51, %v11126_v6  ;;  %v11150_v6 = vand.u32 4294901760, %v10975_v8  ;;  %v11151_v51 = vand.u32 4294901760, %v10826_v13 }
 0x25c   : > { %6083 = vmatprep.subr.bf16.mxu0 %v6082_v19  ;;  %6275 = vmatprep.subr.bf16.mxu1 %v6274_v11  ;;  %v11120_v19 = vand.u32 4294901760, %v10961_v48  ;;  %v11121_v11 = vand.u32 4294901760, %v10962_v18  ;;  %v11135_v18 = vand.u32 4294901760, %v10968_v12  ;;  %v11147_v12 = vand.u32 4294901760, %v10798_v40 }
 0x25d   : > { %2123 = vmatmul.mubr.f32.gmra.mrb[2].mxu0 %v11119_v32  ;;  %4497 = vmatmul.mubr.f32.gmra.mrb[2].mxu1 %v11119_v32  ;;  %v11139_v32 = vand.u32 4294901760, %v7834_v17  ;;  %v6098_v41 = vpack.c.bf16 %v11150_v6, %v11149_v44  ;;  %v11155_v40 = vand.u32 4294901760, %v10839_v7  ;;  %v11156_v13 = vand.u32 4294901760, %v10843_v58  ;;  %v11199_v44 = vld [vmem:[#allocation168_spill] sm:$0xff]  ;;  %v11200_v6 = vld [vmem:[#allocation170_spill] sm:$0xff] }
 0x25e   : > { %2128 = vmatprep.mubr.f32.mxu0 %v10760_v1  ;;  %4502 = vmatprep.mubr.f32.mxu1 %v10760_v1  ;;  %v6088_v61 = vpack.c.bf16 %v11121_v11, %v11120_v19  ;;  %v11140_v11 = vld [vmem:[#allocation84_spill] sm:$0xff]  ;;  %v11165_v7 = vand.u32 4294901760, %v7691_v28  ;;  %v11172_v28 = vand.u32 4294901760, %v7713_v24  ;;  %v11177_v24 = vld [vmem:[#allocation55_spill] sm:$0xff] }
 0x25f   : > { %6085 = vmatpush1.bf16.msra.mxu0 %v6084_v53  ;;  %6277 = vmatpush1.bf16.msra.mxu1 %v6276_v9  ;;  %v11130_v53 = vand.u32 4294901760, %v11129_v35  ;;  %v11131_v9 = vld [vmem:[#allocation82_spill] sm:$0xff] }
 0x260   : > { %6087 = vmatprep.subr.bf16.mxu0 %v6086_v14  ;;  %6279 = vmatprep.subr.bf16.mxu1 %v6278_v15  ;;  %v11132_v22 = vand.u32 4294901760, %v11131_v9  ;;  %v6092_v14 = vpack.c.bf16 %v11135_v18, %v11134_v63  ;;  %v11138_v15 = vand.u32 4294901760, %v7829_v16  ;;  %v11146_v16 = vand.u32 4294901760, %v10795_v30  ;;  %v11153_v35 = vld [vmem:[#allocation46_spill] sm:$0xff] }
 0x261   : > { %2132 = vmatmul.mubr.f32.gmra.mrb[4].mxu0 %v11133_v0  ;;  %4506 = vmatmul.mubr.f32.gmra.mrb[4].mxu1 %v11133_v0  ;;  %v11154_v30 = vand.u32 4294901760, %v10830_v60  ;;  %v11162_v0 = vld [vmem:[#allocation102_spill] sm:$0xff]  ;;  %v11168_v63 = vand.u32 4294901760, %v7701_v55  ;;  %v11173_v55 = vand.u32 4294901760, %v7715_v23  ;;  %v11178_v23 = vld [vmem:[#allocation56_spill] sm:$0xff] }
 0x262   : > { %v6282_v48 = vpack.c.bf16 %v11132_v22, %v11130_v53  ;;  %2137 = vmatprep.mubr.f32.mxu0 %v10760_v1  ;;  %4511 = vmatprep.mubr.f32.mxu1 %v10760_v1  ;;  %v6094_v19 = vpack.c.bf16 %v11139_v32, %v11138_v15  ;;  %v6096_v17 = vpack.c.bf16 %v11146_v16, %v11145_v62  ;;  %v11159_v53 = vand.u32 4294901760, %v7673_v54  ;;  %v11184_v15 = vld [vmem:[#allocation124_spill] sm:$0xff]  ;;  %v11185_v32 = vld [vmem:[#allocation130_spill] sm:$0xff]  ;;  %v11193_v62 = vld [vmem:[#allocation151_spill] sm:$0xff] }
 0x263   : > { %6089 = vmatpush1.bf16.msra.mxu0 %v6088_v61  ;;  %6281 = vmatpush1.bf16.msra.mxu1 %v6280_v31  ;;  %v11141_v61 = vand.u32 4294901760, %v11140_v11  ;;  %v6288_v31 = vpack.c.bf16 %v11148_v2, %v11147_v12  ;;  %v6100_v8 = vpack.c.bf16 %v11155_v40, %v11154_v30  ;;  %v11160_v22 = vand.u32 4294901760, %v10858_v39  ;;  %v11187_v11 = vld [vmem:[#allocation134_spill] sm:$0xff]  ;;  %v11196_v12 = vld [vmem:[#allocation160_spill] sm:$0xff]  ;;  %v11197_v2 = vld [vmem:[#allocation163_spill] sm:$0xff] }
 0x264   : > { %6091 = vmatprep.subr.bf16.mxu0 %v6090_v5  ;;  %6283 = vmatprep.subr.bf16.mxu1 %v6282_v48  ;;  %v11152_v5 = vand.u32 4294901760, %v10829_v38  ;;  %v11157_v38 = vand.u32 4294901760, %v7667_v29  ;;  %v6102_v9 = vpack.c.bf16 %v11159_v53, %v11158_v37  ;;  %v11161_v48 = vand.u32 4294901760, %v10863_v36  ;;  %v11194_v16 = vld [vmem:[#allocation154_spill] sm:$0xff]  ;;  %v11213_v53 = vld [vmem:[#allocation33_spill] sm:$0xff] }
 0x265   : > { %v6286_v57 = vpack.c.bf16 %v11143_v56, %v11141_v61  ;;  %2141 = vmatmul.mubr.f32.gmra.mrb[6].mxu0 %v11144_v45  ;;  %4515 = vmatmul.mubr.f32.gmra.mrb[6].mxu1 %v11144_v45  ;;  %v11163_v29 = vand.u32 4294901760, %v7685_v47  ;;  %v11164_v54 = vand.u32 4294901760, %v10868_v59  ;;  %v11166_v36 = vand.u32 4294901760, %v7695_v50  ;;  %v11176_v59 = vld [vmem:[#allocation108_spill] sm:$0xff]  ;;  %v11190_v56 = vld [vmem:[#allocation142_spill] sm:$0xff] }
 0x266   : > { %2146 = vmatprep.mubr.f32.mxu0 %v10760_v1  ;;  %4520 = vmatprep.mubr.f32.mxu1 %v10760_v1  ;;  %v6290_v33 = vpack.c.bf16 %v11152_v5, %v11151_v51  ;;  %v6292_v27 = vpack.c.bf16 %v11157_v38, %v11156_v13  ;;  %v6294_v60 = vpack.c.bf16 %v11161_v48, %v11160_v22  ;;  %v11167_v39 = vand.u32 4294901760, %v7699_v52  ;;  %v11188_v61 = vld [vmem:[#allocation136_spill] sm:$0xff]  ;;  %v11202_v51 = vld [vmem:[#allocation10_spill] sm:$0xff]  ;;  %v11203_v5 = vld [vmem:[#allocation13_spill] sm:$0xff] }
 0x267   : > { %6093 = vmatpush1.bf16.msra.mxu0 %v6092_v14  ;;  %6285 = vmatpush1.bf16.msra.mxu1 %v6284_v34  ;;  %v6104_v21 = vpack.c.bf16 %v11164_v54, %v11163_v29  ;;  %v6296_v58 = vpack.c.bf16 %v11166_v36, %v11165_v7  ;;  %v11169_v14 = vand.u32 4294901760, %v7705_v49  ;;  %v6108_v50 = vpack.c.bf16 %v11173_v55, %v11172_v28  ;;  %v11183_v34 = vld [vmem:[#allocation67_spill] sm:$0xff]  ;;  %v11192_v45 = vld [vmem:[#allocation148_spill] sm:$0xff]  ;;  %v11207_v40 = vld [vmem:[#allocation22_spill] sm:$0xff] }
 0x268   : > { %6095 = vmatprep.subr.bf16.mxu0 %v6094_v19  ;;  %6287 = vmatprep.subr.bf16.mxu1 %v6286_v57  ;;  %v6106_v18 = vpack.c.bf16 %v11168_v63, %v11167_v39  ;;  %v11174_v49 = vand.u32 4294901760, %v7721_v4  ;;  %v11175_v52 = vand.u32 4294901760, %v7729_v42  ;;  %v11179_v4 = vld [vmem:[#allocation60_spill] sm:$0xff]  ;;  %v11180_v42 = vld [vmem:[#allocation115_spill] sm:$0xff]  ;;  %v11186_v19 = vld [vmem:[#allocation129_spill] sm:$0xff] }
 0x269   : > { %2150 = vmatmul.mubr.f32.gmra.mrb[8].mxu0 %v11153_v35  ;;  %4524 = vmatmul.mubr.f32.gmra.mrb[8].mxu1 %v11153_v35  ;;  %v6298_v47 = vpack.c.bf16 %v11170_v3, %v11169_v14  ;;  %v11191_v57 = vld [vmem:[#allocation145_spill] sm:$0xff]  ;;  %v11205_v35 = vld [vmem:[#allocation19_spill] sm:$0xff]  ;;  %v11209_v13 = vld [vmem:[#allocation28_spill] sm:$0xff] }
 0x26a   : > { %2155 = vmatprep.mubr.f32.mxu0 %v10760_v1  ;;  %4529 = vmatprep.mubr.f32.mxu1 %v10760_v1  ;;  %v6300_v10 = vpack.c.bf16 %v11175_v52, %v11174_v49  ;;  %v11210_v38 = vld [vmem:[#allocation29_spill] sm:$0xff]  ;;  %v11212_v37 = vld [vmem:[#allocation30_spill] sm:$0xff]  ;;  %v11215_v22 = vld [vmem:[#allocation35_spill] sm:$0xff] }
 0x26b   : > { %6097 = vmatpush1.bf16.msra.mxu0 %v6096_v17  ;;  %6289 = vmatpush1.bf16.msra.mxu1 %v6288_v31  ;;  %v11195_v17 = vld [vmem:[#allocation157_spill] sm:$0xff]  ;;  %v11198_v31 = vld [vmem:[#allocation166_spill] sm:$0xff]  ;;  %v11219_v29 = vld [vmem:[#allocation40_spill] sm:$0xff] }
 0x26c   : > { %6099 = vmatprep.subr.bf16.mxu0 %v6098_v41  ;;  %6291 = vmatprep.subr.bf16.mxu1 %v6290_v33  ;;  %v11204_v33 = vld [vmem:[#allocation16_spill] sm:$0xff]  ;;  %v11222_v7 = vld [vmem:[#allocation45_spill] sm:$0xff]  ;;  %v11225_v39 = vld [vmem:[#allocation54_spill] sm:$0xff] }
 0x26d   : > { %2159 = vmatmul.mubr.f32.gmra.mrb[10].mxu0 %v11162_v0  ;;  %4533 = vmatmul.mubr.f32.gmra.mrb[10].mxu1 %v11162_v0  ;;  %v11218_v0 = vld [vmem:[#allocation39_spill] sm:$0xff]  ;;  %v11220_v54 = vld [vmem:[#allocation44_spill] sm:$0xff]  ;;  %v11223_v36 = vld [vmem:[#allocation49_spill] sm:$0xff] }
 0x26e   : > { %2164 = vmatprep.mubr.f32.mxu0 %v10760_v1  ;;  %4538 = vmatprep.mubr.f32.mxu1 %v10760_v1  ;;  %v11228_v14 = vld [vmem:[#allocation61_spill] sm:$0xff]  ;;  %v11229_v3 = vld [vmem:[#allocation62_spill] sm:$0xff]  ;;  %v11233_v55 = vld [vmem:[#allocation68_spill] sm:$0xff] }
 0x26f   : > { %6101 = vmatpush1.bf16.msra.mxu0 %v6100_v8  ;;  %6293 = vmatpush1.bf16.msra.mxu1 %v6292_v27  ;;  %v11208_v8 = vld [vmem:[#allocation25_spill] sm:$0xff]  ;;  %v11232_v28 = vld [vmem:[#allocation66_spill] sm:$0xff]  ;;  %v11236_v52 = vld [vmem:[#allocation48_spill] sm:$0xff] }
 0x270   : > { %6103 = vmatprep.subr.bf16.mxu0 %v6102_v9  ;;  %6295 = vmatprep.subr.bf16.mxu1 %v6294_v60  ;;  %v11214_v9 = vld [vmem:[#allocation34_spill] sm:$0xff]  ;;  %v11217_v60 = vld [vmem:[#allocation36_spill] sm:$0xff] }
 0x271   : > { %2168 = vmatmul.mubr.f32.gmra.mrb[12].mxu0 %v11171_v25  ;;  %4542 = vmatmul.mubr.f32.gmra.mrb[12].mxu1 %v11171_v25  ;;  %v11235_v49 = vld [vmem:[#allocation70_spill] sm:$0xff] }
 0x272   : > { %2173 = vmatprep.mubr.f32.mxu0 %v10760_v1  ;;  %4547 = vmatprep.mubr.f32.mxu1 %v10760_v1 }
 0x273   : > { %6105 = vmatpush1.bf16.msra.mxu0 %v6104_v21  ;;  %6297 = vmatpush1.bf16.msra.mxu1 %v6296_v58  ;;  %v11224_v58 = vld [vmem:[#allocation51_spill] sm:$0xff] }
 0x274   : > { %6107 = vmatprep.subr.bf16.mxu0 %v6106_v18  ;;  %6299 = vmatprep.subr.bf16.mxu1 %v6298_v47  ;;  %v11227_v18 = vld [vmem:[#allocation57_spill] sm:$0xff]  ;;  %v11230_v47 = vld [vmem:[#allocation63_spill] sm:$0xff] }
 0x275   : > { %2177 = vmatmul.mubr.f32.gmra.mrb[14].mxu0 %v11176_v59  ;;  %4551 = vmatmul.mubr.f32.gmra.mrb[14].mxu1 %v11176_v59  ;;  %v11238_v59 = vld [vmem:[#allocation72_spill] sm:$0xff] }
 0x276   : > { %2182 = vmatprep.mubr.f32.mxu0 %v10760_v1  ;;  %4556 = vmatprep.mubr.f32.mxu1 %v10760_v1 }
 0x277   : > { %6109 = vmatpush1.bf16.msra.mxu0 %v6108_v50  ;;  %6301 = vmatpush1.bf16.msra.mxu1 %v6300_v10  ;;  %v11234_v50 = vld [vmem:[#allocation69_spill] sm:$0xff]  ;;  %v11237_v10 = vld [vmem:[#allocation71_spill] sm:$0xff] }
 0x278   : > { %6111 = vmatprep.subr.bf16.mxu0 %v10991_v20  ;;  %6303 = vmatprep.subr.bf16.mxu1 %v10992_v46  ;;  %v11181_v20 = vld [vmem:[#allocation120_spill] sm:$0xff]  ;;  %v11182_v46 = vld [vmem:[#allocation121_spill] sm:$0xff] }
 0x279   : > { %2186 = vmatmul.mubr.f32.gmra.mrb[16].mxu0 %v11177_v24  ;;  %4560 = vmatmul.mubr.f32.gmra.mrb[16].mxu1 %v11177_v24  ;;  %v11239_v24 = vld [vmem:[#allocation104_spill] sm:$0xff] }
 0x27a   : > { %2191 = vmatprep.mubr.f32.mxu0 %v10760_v1  ;;  %4565 = vmatprep.mubr.f32.mxu1 %v10760_v1 }
 0x27d   : > { %2195 = vmatmul.mubr.f32.gmra.mrb[18].mxu0 %v11178_v23  ;;  %4569 = vmatmul.mubr.f32.gmra.mrb[18].mxu1 %v11178_v23 }
 0x27e   : > { %2200 = vmatprep.mubr.f32.mxu0 %v10760_v1  ;;  %4574 = vmatprep.mubr.f32.mxu1 %v10760_v1 }
 0x281   : > { %2204 = vmatmul.mubr.f32.gmra.mrb[20].mxu0 %v11179_v4  ;;  %4578 = vmatmul.mubr.f32.gmra.mrb[20].mxu1 %v11179_v4  ;;  %v11241_v4 = vld [vmem:[#allocation110_spill] sm:$0xff] }
 0x282   : > { %2209 = vmatprep.mubr.f32.mxu0 %v10760_v1  ;;  %4583 = vmatprep.mubr.f32.mxu1 %v10760_v1 }
 0x285   : > { %2213 = vmatmul.mubr.f32.gmra.mrb[22].mxu0 %v11180_v42  ;;  %4587 = vmatmul.mubr.f32.gmra.mrb[22].mxu1 %v11180_v42  ;;  %v11243_v42 = vld [vmem:[#allocation111_spill] sm:$0xff] }
 0x286   : > { %2218 = vmatprep.mubr.f32.mxu0 %v10760_v1  ;;  %4592 = vmatprep.mubr.f32.mxu1 %v10760_v1 }
 0x289   : > { %2222 = vmatmul.mubr.f32.gmra.mrb[24].mxu0 %v11181_v20  ;;  %4596 = vmatmul.mubr.f32.gmra.mrb[24].mxu1 %v11181_v20  ;;  %v11245_v20 = vld [vmem:[#allocation113_spill] sm:$0xff] }
 0x28a   : > { %2227 = vmatprep.mubr.f32.mxu0 %v10760_v1  ;;  %4601 = vmatprep.mubr.f32.mxu1 %v10760_v1 }
 0x28d   : > { %2231 = vmatmul.mubr.f32.gmra.mrb[26].mxu0 %v11182_v46  ;;  %4605 = vmatmul.mubr.f32.gmra.mrb[26].mxu1 %v11182_v46  ;;  %v11246_v46 = vld [vmem:[#allocation59_spill] sm:$0xff] }
 0x28e   : > { %2236 = vmatprep.mubr.f32.mxu0 %v10760_v1  ;;  %4610 = vmatprep.mubr.f32.mxu1 %v10760_v1 }
 0x291   : > { %2240 = vmatmul.mubr.f32.gmra.mrb[28].mxu0 %v11183_v34  ;;  %4614 = vmatmul.mubr.f32.gmra.mrb[28].mxu1 %v11183_v34  ;;  %v11248_v34 = vld [vmem:[#allocation117_spill] sm:$0xff] }
 0x292   : > { %2245 = vmatprep.mubr.f32.mxu0 %v10760_v1  ;;  %4619 = vmatprep.mubr.f32.mxu1 %v10760_v1 }
 0x295   : > { %2249 = vmatmul.mubr.f32.gmra.mrb[30].mxu0 %v11184_v15  ;;  %4623 = vmatmul.mubr.f32.gmra.mrb[30].mxu1 %v11184_v15  ;;  %v11250_v15 = vld [vmem:[#allocation119_spill] sm:$0xff] }
 0x296   : > { %2254 = vmatprep.mubr.f32.mxu0 %v10760_v1  ;;  %4628 = vmatprep.mubr.f32.mxu1 %v10760_v1 }
 0x299   : > { %2258 = vmatmul.mubr.f32.gmra.mrb[32].mxu0 %v11185_v32  ;;  %4632 = vmatmul.mubr.f32.gmra.mrb[32].mxu1 %v11185_v32  ;;  %v11252_v32 = vld [vmem:[#allocation65_spill] sm:$0xff] }
 0x29a   : > { %2263 = vmatprep.mubr.f32.mxu0 %v10760_v1  ;;  %4637 = vmatprep.mubr.f32.mxu1 %v10760_v1 }
 0x29d   : > { %2267 = vmatmul.mubr.f32.gmra.mrb[34].mxu0 %v11186_v19  ;;  %4641 = vmatmul.mubr.f32.gmra.mrb[34].mxu1 %v11186_v19  ;;  %v11254_v19 = vld [vmem:[#allocation64_spill] sm:$0xff] }
 0x29e   : > { %2272 = vmatprep.mubr.f32.mxu0 %v10760_v1  ;;  %4646 = vmatprep.mubr.f32.mxu1 %v10760_v1 }
 0x2a1   : > { %2276 = vmatmul.mubr.f32.gmra.mrb[36].mxu0 %v11187_v11  ;;  %4650 = vmatmul.mubr.f32.gmra.mrb[36].mxu1 %v11187_v11  ;;  %v11256_v11 = vld [vmem:[#allocation128_spill] sm:$0xff] }
 0x2a2   : > { %2281 = vmatprep.mubr.f32.mxu0 %v10760_v1  ;;  %4655 = vmatprep.mubr.f32.mxu1 %v10760_v1 }
 0x2a5   : > { %2285 = vmatmul.mubr.f32.gmra.mrb[38].mxu0 %v11188_v61  ;;  %4659 = vmatmul.mubr.f32.gmra.mrb[38].mxu1 %v11188_v61  ;;  %v11258_v61 = vld [vmem:[#allocation126_spill] sm:$0xff] }
 0x2a6   : > { %2290 = vmatprep.mubr.f32.mxu0 %v10760_v1  ;;  %4664 = vmatprep.mubr.f32.mxu1 %v10760_v1 }
 0x2a9   : > { %2294 = vmatmul.mubr.f32.gmra.mrb[40].mxu0 %v11189_v26  ;;  %4668 = vmatmul.mubr.f32.gmra.mrb[40].mxu1 %v11189_v26  ;;  %v11260_v26 = vld [vmem:[#allocation133_spill] sm:$0xff] }
 0x2aa   : > { %2299 = vmatprep.mubr.f32.mxu0 %v10760_v1  ;;  %4673 = vmatprep.mubr.f32.mxu1 %v10760_v1 }
 0x2ad   : > { %2303 = vmatmul.mubr.f32.gmra.mrb[42].mxu0 %v11190_v56  ;;  %4677 = vmatmul.mubr.f32.gmra.mrb[42].mxu1 %v11190_v56  ;;  %v11262_v56 = vld [vmem:[#allocation135_spill] sm:$0xff] }
 0x2ae   : > { %2308 = vmatprep.mubr.f32.mxu0 %v10760_v1  ;;  %4682 = vmatprep.mubr.f32.mxu1 %v10760_v1 }
 0x2b1   : > { %2312 = vmatmul.mubr.f32.gmra.mrb[44].mxu0 %v11191_v57  ;;  %4686 = vmatmul.mubr.f32.gmra.mrb[44].mxu1 %v11191_v57  ;;  %v11264_v57 = vld [vmem:[#allocation138_spill] sm:$0xff] }
 0x2b2   : > { %2317 = vmatprep.mubr.f32.mxu0 %v10760_v1  ;;  %4691 = vmatprep.mubr.f32.mxu1 %v10760_v1 }
 0x2b5   : > { %2321 = vmatmul.mubr.f32.gmra.mrb[46].mxu0 %v11192_v45  ;;  %4695 = vmatmul.mubr.f32.gmra.mrb[46].mxu1 %v11192_v45  ;;  %v11266_v45 = vld [vmem:[#allocation141_spill] sm:$0xff] }
 0x2b6   : > { %2326 = vmatprep.mubr.f32.mxu0 %v10760_v1  ;;  %4700 = vmatprep.mubr.f32.mxu1 %v10760_v1 }
 0x2b9   : > { %2330 = vmatmul.mubr.f32.gmra.mrb[48].mxu0 %v11193_v62  ;;  %4704 = vmatmul.mubr.f32.gmra.mrb[48].mxu1 %v11193_v62  ;;  %v11268_v62 = vld [vmem:[#allocation144_spill] sm:$0xff] }
 0x2ba   : > { %2335 = vmatprep.mubr.f32.mxu0 %v10760_v1  ;;  %4709 = vmatprep.mubr.f32.mxu1 %v10760_v1 }
 0x2bd   : > { %2339 = vmatmul.mubr.f32.gmra.mrb[50].mxu0 %v11194_v16  ;;  %4713 = vmatmul.mubr.f32.gmra.mrb[50].mxu1 %v11194_v16  ;;  %v11270_v16 = vld [vmem:[#allocation147_spill] sm:$0xff] }
 0x2be   : > { %2344 = vmatprep.mubr.f32.mxu0 %v10760_v1  ;;  %4718 = vmatprep.mubr.f32.mxu1 %v10760_v1 }
 0x2c1   : > { %2348 = vmatmul.mubr.f32.gmra.mrb[52].mxu0 %v11195_v17  ;;  %4722 = vmatmul.mubr.f32.gmra.mrb[52].mxu1 %v11195_v17  ;;  %v11272_v17 = vld [vmem:[#allocation150_spill] sm:$0xff] }
 0x2c2   : > { %2353 = vmatprep.mubr.f32.mxu0 %v10760_v1  ;;  %4727 = vmatprep.mubr.f32.mxu1 %v10760_v1 }
 0x2c5   : > { %2357 = vmatmul.mubr.f32.gmra.mrb[54].mxu0 %v11196_v12  ;;  %4731 = vmatmul.mubr.f32.gmra.mrb[54].mxu1 %v11196_v12 }
 0x2c6   : > { %2362 = vmatprep.mubr.f32.mxu0 %v10760_v1  ;;  %4736 = vmatprep.mubr.f32.mxu1 %v10760_v1 }
 0x2c9   : > { %2366 = vmatmul.mubr.f32.gmra.mrb[56].mxu0 %v11197_v2  ;;  %4740 = vmatmul.mubr.f32.gmra.mrb[56].mxu1 %v11197_v2 }
 0x2ca   : > { %2371 = vmatprep.mubr.f32.mxu0 %v10760_v1  ;;  %4745 = vmatprep.mubr.f32.mxu1 %v10760_v1 }
 0x2cd   : > { %2375 = vmatmul.mubr.f32.gmra.mrb[58].mxu0 %v11198_v31  ;;  %4749 = vmatmul.mubr.f32.gmra.mrb[58].mxu1 %v11198_v31 }
 0x2ce   : > { %2380 = vmatprep.mubr.f32.mxu0 %v10760_v1  ;;  %4754 = vmatprep.mubr.f32.mxu1 %v10760_v1 }
 0x2d1   : > { %2384 = vmatmul.mubr.f32.gmra.mrb[60].mxu0 %v11199_v44  ;;  %4758 = vmatmul.mubr.f32.gmra.mrb[60].mxu1 %v11199_v44 }
 0x2d2   : > { %2389 = vmatprep.mubr.f32.mxu0 %v10760_v1  ;;  %4763 = vmatprep.mubr.f32.mxu1 %v10760_v1 }
 0x2d5   : > { %2393 = vmatmul.mubr.f32.gmra.mrb[62].mxu0 %v11200_v6  ;;  %4767 = vmatmul.mubr.f32.gmra.mrb[62].mxu1 %v11200_v6 }
 0x2d6   : > { %2559 = vmatprep.mubr.f32.mxu0 %v10760_v1  ;;  %4933 = vmatprep.mubr.f32.mxu1 %v10760_v1 }
 0x2d9   : > { %5776 = vmatmul.mubr.msk.f32.vlgmr.msra.gmra.mrb[0].mxu0 %vm7934_vm1, %v10960_v43  ;;  %5872 = vmatmul.mubr.msk.f32.vlgmr.msra.gmra.mrb[0].mxu1 %vm7934_vm1, %v10960_v43 }
 0x2da   : > { %6113 = vmatpush1.bf16.msra.mxu0 %v11202_v51  ;;  %6305 = vmatpush1.bf16.msra.mxu1 %v11203_v5 }
 0x2db   : > { %2566 = vmatprep.mubr.f32.mxu0 %v10760_v1  ;;  %4940 = vmatprep.mubr.f32.mxu1 %v10760_v1 }
 0x2dc   : > { %6115 = vmatprep.subr.bf16.mxu0 %v11204_v33  ;;  %6307 = vmatprep.subr.bf16.mxu1 %v11205_v35 }
 0x2dd   : > { %5777 = vmatmul.mubr.msk.f32.gmra.mrb[2].mxu0 %vm7972_vm2, %v10960_v43  ;;  %5873 = vmatmul.mubr.msk.f32.gmra.mrb[2].mxu1 %vm7972_vm2, %v10960_v43 }
 0x2de   : > { %2573 = vmatprep.mubr.f32.mxu0 %v10760_v1  ;;  %4947 = vmatprep.mubr.f32.mxu1 %v10760_v1 }
 0x2df   : > { %6117 = vmatpush1.bf16.msra.mxu0 %v11207_v40  ;;  %6309 = vmatpush1.bf16.msra.mxu1 %v11208_v8 }
 0x2e0   : > { %6119 = vmatprep.subr.bf16.mxu0 %v11209_v13  ;;  %6311 = vmatprep.subr.bf16.mxu1 %v11210_v38 }
 0x2e1   : > { %5778 = vmatmul.mubr.msk.f32.gmra.mrb[4].mxu0 %vm7929_vm0, %v10960_v43  ;;  %5874 = vmatmul.mubr.msk.f32.gmra.mrb[4].mxu1 %vm7929_vm0, %v10960_v43 }
 0x2e2   : > { %2580 = vmatprep.mubr.f32.mxu0 %v10760_v1  ;;  %4954 = vmatprep.mubr.f32.mxu1 %v10760_v1 }
 0x2e3   : > { %6121 = vmatpush1.bf16.msra.mxu0 %v11212_v37  ;;  %6313 = vmatpush1.bf16.msra.mxu1 %v11213_v53 }
 0x2e4   : > { %6123 = vmatprep.subr.bf16.mxu0 %v11214_v9  ;;  %6315 = vmatprep.subr.bf16.mxu1 %v11215_v22 }
 0x2e5   : > { %5779 = vmatmul.mubr.msk.f32.gmra.mrb[6].mxu0 %vm7967_vm5, %v10960_v43  ;;  %5875 = vmatmul.mubr.msk.f32.gmra.mrb[6].mxu1 %vm7967_vm5, %v10960_v43 }
 0x2e6   : > { %2587 = vmatprep.mubr.f32.mxu0 %v10760_v1  ;;  %4961 = vmatprep.mubr.f32.mxu1 %v10760_v1 }
 0x2e7   : > { %6125 = vmatpush1.bf16.msra.mxu0 %v11217_v60  ;;  %6317 = vmatpush1.bf16.msra.mxu1 %v11218_v0 }
 0x2e8   : > { %6127 = vmatprep.subr.bf16.mxu0 %v11219_v29  ;;  %6319 = vmatprep.subr.bf16.mxu1 %v11220_v54 }
 0x2e9   : > { %5780 = vmatmul.mubr.msk.f32.gmra.mrb[8].mxu0 %vm8008_vm3, %v10960_v43  ;;  %5876 = vmatmul.mubr.msk.f32.gmra.mrb[8].mxu1 %vm8008_vm3, %v10960_v43 }
 0x2ea   : > { %2594 = vmatprep.mubr.f32.mxu0 %v10760_v1  ;;  %4968 = vmatprep.mubr.f32.mxu1 %v10760_v1 }
 0x2eb   : > { %6129 = vmatpush1.bf16.msra.mxu0 %v11222_v7  ;;  %6321 = vmatpush1.bf16.msra.mxu1 %v11223_v36 }
 0x2ec   : > { %6131 = vmatprep.subr.bf16.mxu0 %v11224_v58  ;;  %6323 = vmatprep.subr.bf16.mxu1 %v11225_v39 }
 0x2ed   : > { %5781 = vmatmul.mubr.msk.f32.gmra.mrb[10].mxu0 %vm8026_vm6, %v10960_v43  ;;  %5877 = vmatmul.mubr.msk.f32.gmra.mrb[10].mxu1 %vm8026_vm6, %v10960_v43 }
 0x2ee   : > { %2601 = vmatprep.mubr.f32.mxu0 %v10760_v1  ;;  %4975 = vmatprep.mubr.f32.mxu1 %v10760_v1 }
 0x2ef   : > { %6133 = vmatpush1.bf16.msra.mxu0 %v11227_v18  ;;  %6325 = vmatpush1.bf16.msra.mxu1 %v11228_v14 }
 0x2f0   : > { %6135 = vmatprep.subr.bf16.mxu0 %v11229_v3  ;;  %6327 = vmatprep.subr.bf16.mxu1 %v11230_v47 }
 0x2f1   : > { %5782 = vmatmul.mubr.msk.f32.gmra.mrb[12].mxu0 %vm8065_vm8, %v10960_v43  ;;  %5878 = vmatmul.mubr.msk.f32.gmra.mrb[12].mxu1 %vm8065_vm8, %v10960_v43 }
 0x2f2   : > { %2608 = vmatprep.mubr.f32.mxu0 %v10760_v1  ;;  %4982 = vmatprep.mubr.f32.mxu1 %v10760_v1 }
 0x2f3   : > { %6137 = vmatpush1.bf16.msra.mxu0 %v11232_v28  ;;  %6329 = vmatpush1.bf16.msra.mxu1 %v11233_v55 }
 0x2f4   : > { %6139 = vmatprep.subr.bf16.mxu0 %v11234_v50  ;;  %6331 = vmatprep.subr.bf16.mxu1 %v11235_v49 }
 0x2f5   : > { %5783 = vmatmul.mubr.msk.f32.gmra.mrb[14].mxu0 %vm8090_vm4, %v10960_v43  ;;  %5879 = vmatmul.mubr.msk.f32.gmra.mrb[14].mxu1 %vm8090_vm4, %v10960_v43  ;;  %vm11242_vm4 = vnez %v11241_v4 }
 0x2f6   : > { %2615 = vmatprep.mubr.f32.mxu0 %v10760_v1  ;;  %4989 = vmatprep.mubr.f32.mxu1 %v10760_v1 }
 0x2f7   : > { %6141 = vmatpush1.bf16.msra.mxu0 %v11237_v10  ;;  %6333 = vmatpush1.bf16.msra.mxu1 %v11238_v59 }
 0x2f9   : > { %5784 = vmatmul.mubr.msk.f32.gmra.mrb[16].mxu0 %vm8119_vm9, %v10960_v43  ;;  %5880 = vmatmul.mubr.msk.f32.gmra.mrb[16].mxu1 %vm8119_vm9, %v10960_v43  ;;  %vm11244_vm9 = vnez %v11243_v42 }
 0x2fa   : > { %2622 = vmatprep.mubr.f32.mxu0 %v10760_v1  ;;  %4996 = vmatprep.mubr.f32.mxu1 %v10760_v1 }
 0x2fd   : > { %5785 = vmatmul.mubr.msk.f32.gmra.mrb[18].mxu0 %vm8140_vm10, %v10960_v43  ;;  %5881 = vmatmul.mubr.msk.f32.gmra.mrb[18].mxu1 %vm8140_vm10, %v10960_v43 }
 0x2fe   : > { %2629 = vmatprep.mubr.f32.mxu0 %v10760_v1  ;;  %5003 = vmatprep.mubr.f32.mxu1 %v10760_v1 }
 0x301   : > { %5786 = vmatmul.mubr.msk.f32.gmra.mrb[20].mxu0 %vm11242_vm4, %v10960_v43  ;;  %5882 = vmatmul.mubr.msk.f32.gmra.mrb[20].mxu1 %vm11242_vm4, %v10960_v43  ;;  %vm11247_vm4 = vnez %v11246_v46 }
 0x302   : > { %2636 = vmatprep.mubr.f32.mxu0 %v10760_v1  ;;  %5010 = vmatprep.mubr.f32.mxu1 %v10760_v1 }
 0x305   : > { %5787 = vmatmul.mubr.msk.f32.gmra.mrb[22].mxu0 %vm11244_vm9, %v10960_v43  ;;  %5883 = vmatmul.mubr.msk.f32.gmra.mrb[22].mxu1 %vm11244_vm9, %v10960_v43  ;;  %vm11249_vm9 = vnez %v11248_v34 }
 0x306   : > { %2643 = vmatprep.mubr.f32.mxu0 %v10760_v1  ;;  %5017 = vmatprep.mubr.f32.mxu1 %v10760_v1 }
 0x309   : > { %5788 = vmatmul.mubr.msk.f32.gmra.mrb[24].mxu0 %vm8204_vm12, %v10960_v43  ;;  %5884 = vmatmul.mubr.msk.f32.gmra.mrb[24].mxu1 %vm8204_vm12, %v10960_v43  ;;  %vm11251_vm12 = vnez %v11250_v15 }
 0x30a   : > { %2650 = vmatprep.mubr.f32.mxu0 %v10760_v1  ;;  %5024 = vmatprep.mubr.f32.mxu1 %v10760_v1 }
 0x30d   : > { %5789 = vmatmul.mubr.msk.f32.gmra.mrb[26].mxu0 %vm11247_vm4, %v10960_v43  ;;  %5885 = vmatmul.mubr.msk.f32.gmra.mrb[26].mxu1 %vm11247_vm4, %v10960_v43  ;;  %vm11253_vm4 = vnez %v11252_v32 }
 0x30e   : > { %2657 = vmatprep.mubr.f32.mxu0 %v10760_v1  ;;  %5031 = vmatprep.mubr.f32.mxu1 %v10760_v1 }
 0x311   : > { %5790 = vmatmul.mubr.msk.f32.gmra.mrb[28].mxu0 %vm11249_vm9, %v10960_v43  ;;  %5886 = vmatmul.mubr.msk.f32.gmra.mrb[28].mxu1 %vm11249_vm9, %v10960_v43  ;;  %vm11255_vm9 = vnez %v11254_v19 }
 0x312   : > { %2664 = vmatprep.mubr.f32.mxu0 %v10760_v1  ;;  %5038 = vmatprep.mubr.f32.mxu1 %v10760_v1 }
 0x315   : > { %5791 = vmatmul.mubr.msk.f32.gmra.mrb[30].mxu0 %vm11251_vm12, %v10960_v43  ;;  %5887 = vmatmul.mubr.msk.f32.gmra.mrb[30].mxu1 %vm11251_vm12, %v10960_v43  ;;  %vm11257_vm12 = vnez %v11256_v11 }
 0x316   : > { %2671 = vmatprep.mubr.f32.mxu0 %v10760_v1  ;;  %5045 = vmatprep.mubr.f32.mxu1 %v10760_v1 }
 0x319   : > { %5792 = vmatmul.mubr.msk.f32.gmra.mrb[32].mxu0 %vm11253_vm4, %v10960_v43  ;;  %5888 = vmatmul.mubr.msk.f32.gmra.mrb[32].mxu1 %vm11253_vm4, %v10960_v43  ;;  %vm11259_vm4 = vnez %v11258_v61 }
 0x31a   : > { %2678 = vmatprep.mubr.f32.mxu0 %v10760_v1  ;;  %5052 = vmatprep.mubr.f32.mxu1 %v10760_v1 }
 0x31d   : > { %5793 = vmatmul.mubr.msk.f32.gmra.mrb[34].mxu0 %vm11255_vm9, %v10960_v43  ;;  %5889 = vmatmul.mubr.msk.f32.gmra.mrb[34].mxu1 %vm11255_vm9, %v10960_v43  ;;  %vm11261_vm9 = vnez %v11260_v26 }
 0x31e   : > { %2685 = vmatprep.mubr.f32.mxu0 %v10760_v1  ;;  %5059 = vmatprep.mubr.f32.mxu1 %v10760_v1 }
 0x321   : > { %5794 = vmatmul.mubr.msk.f32.gmra.mrb[36].mxu0 %vm11257_vm12, %v10960_v43  ;;  %5890 = vmatmul.mubr.msk.f32.gmra.mrb[36].mxu1 %vm11257_vm12, %v10960_v43  ;;  %vm11263_vm12 = vnez %v11262_v56 }
 0x322   : > { %2692 = vmatprep.mubr.f32.mxu0 %v10760_v1  ;;  %5066 = vmatprep.mubr.f32.mxu1 %v10760_v1 }
 0x325   : > { %5795 = vmatmul.mubr.msk.f32.gmra.mrb[38].mxu0 %vm11259_vm4, %v10960_v43  ;;  %5891 = vmatmul.mubr.msk.f32.gmra.mrb[38].mxu1 %vm11259_vm4, %v10960_v43  ;;  %vm11265_vm4 = vnez %v11264_v57 }
 0x326   : > { %2699 = vmatprep.mubr.f32.mxu0 %v10760_v1  ;;  %5073 = vmatprep.mubr.f32.mxu1 %v10760_v1 }
 0x329   : > { %5796 = vmatmul.mubr.msk.f32.gmra.mrb[40].mxu0 %vm11261_vm9, %v10960_v43  ;;  %5892 = vmatmul.mubr.msk.f32.gmra.mrb[40].mxu1 %vm11261_vm9, %v10960_v43  ;;  %vm11267_vm9 = vnez %v11266_v45 }
 0x32a   : > { %2706 = vmatprep.mubr.f32.mxu0 %v10760_v1  ;;  %5080 = vmatprep.mubr.f32.mxu1 %v10760_v1 }
 0x32d   : > { %5797 = vmatmul.mubr.msk.f32.gmra.mrb[42].mxu0 %vm11263_vm12, %v10960_v43  ;;  %5893 = vmatmul.mubr.msk.f32.gmra.mrb[42].mxu1 %vm11263_vm12, %v10960_v43  ;;  %vm11269_vm12 = vnez %v11268_v62 }
 0x32e   : > { %2713 = vmatprep.mubr.f32.mxu0 %v10760_v1  ;;  %5087 = vmatprep.mubr.f32.mxu1 %v10760_v1 }
 0x331   : > { %5798 = vmatmul.mubr.msk.f32.gmra.mrb[44].mxu0 %vm11265_vm4, %v10960_v43  ;;  %5894 = vmatmul.mubr.msk.f32.gmra.mrb[44].mxu1 %vm11265_vm4, %v10960_v43  ;;  %vm11271_vm4 = vnez %v11270_v16 }
 0x332   : > { %2720 = vmatprep.mubr.f32.mxu0 %v10760_v1  ;;  %5094 = vmatprep.mubr.f32.mxu1 %v10760_v1 }
 0x335   : > { %5799 = vmatmul.mubr.msk.f32.gmra.mrb[46].mxu0 %vm11267_vm9, %v10960_v43  ;;  %5895 = vmatmul.mubr.msk.f32.gmra.mrb[46].mxu1 %vm11267_vm9, %v10960_v43  ;;  %vm11273_vm9 = vnez %v11272_v17 }
 0x336   : > { %2727 = vmatprep.mubr.f32.mxu0 %v10760_v1  ;;  %5101 = vmatprep.mubr.f32.mxu1 %v10760_v1 }
 0x339   : > { %5800 = vmatmul.mubr.msk.f32.gmra.mrb[48].mxu0 %vm11269_vm12, %v10960_v43  ;;  %5896 = vmatmul.mubr.msk.f32.gmra.mrb[48].mxu1 %vm11269_vm12, %v10960_v43 }
 0x33a   : > { %2734 = vmatprep.mubr.f32.mxu0 %v10760_v1  ;;  %5108 = vmatprep.mubr.f32.mxu1 %v10760_v1 }
 0x33d   : > { %5801 = vmatmul.mubr.msk.f32.gmra.mrb[50].mxu0 %vm11271_vm4, %v10960_v43  ;;  %5897 = vmatmul.mubr.msk.f32.gmra.mrb[50].mxu1 %vm11271_vm4, %v10960_v43 }
 0x33e   : > { %2741 = vmatprep.mubr.f32.mxu0 %v10760_v1  ;;  %5115 = vmatprep.mubr.f32.mxu1 %v10760_v1 }
 0x341   : > { %5802 = vmatmul.mubr.msk.f32.gmra.mrb[52].mxu0 %vm11273_vm9, %v10960_v43  ;;  %5898 = vmatmul.mubr.msk.f32.gmra.mrb[52].mxu1 %vm11273_vm9, %v10960_v43 }
 0x342   : > { %2748 = vmatprep.mubr.f32.mxu0 %v10760_v1  ;;  %5122 = vmatprep.mubr.f32.mxu1 %v10760_v1 }
 0x345   : > { %5803 = vmatmul.mubr.msk.f32.gmra.mrb[54].mxu0 %vm11016_vm15, %v10960_v43  ;;  %5899 = vmatmul.mubr.msk.f32.gmra.mrb[54].mxu1 %vm11016_vm15, %v10960_v43 }
 0x346   : > { %2755 = vmatprep.mubr.f32.mxu0 %v10760_v1  ;;  %5129 = vmatprep.mubr.f32.mxu1 %v10760_v1 }
 0x349   : > { %5804 = vmatmul.mubr.msk.f32.gmra.mrb[56].mxu0 %vm11017_vm7, %v10960_v43  ;;  %5900 = vmatmul.mubr.msk.f32.gmra.mrb[56].mxu1 %vm11017_vm7, %v10960_v43 }
 0x34a   : > { %2762 = vmatprep.mubr.f32.mxu0 %v10760_v1  ;;  %5136 = vmatprep.mubr.f32.mxu1 %v10760_v1 }
 0x34d   : > { %5805 = vmatmul.mubr.msk.f32.gmra.mrb[58].mxu0 %vm11018_vm11, %v10960_v43  ;;  %5901 = vmatmul.mubr.msk.f32.gmra.mrb[58].mxu1 %vm11018_vm11, %v10960_v43 }
 0x34e   : > { %2769 = vmatprep.mubr.f32.mxu0 %v10760_v1  ;;  %5143 = vmatprep.mubr.f32.mxu1 %v10760_v1 }
 0x351   : > { %5806 = vmatmul.mubr.msk.f32.gmra.mrb[60].mxu0 %vm8610_vm14, %v10960_v43  ;;  %5902 = vmatmul.mubr.msk.f32.gmra.mrb[60].mxu1 %vm8610_vm14, %v10960_v43 }
 0x352   : > { %2776 = vmatprep.mubr.f32.mxu0 %v10760_v1  ;;  %5150 = vmatprep.mubr.f32.mxu1 %v10760_v1 }
 0x355   : > { %5807 = vmatmul.mubr.msk.f32.gmra.mrb[62].mxu0 %vm8627_vm13, %v10960_v43  ;;  %5903 = vmatmul.mubr.msk.f32.gmra.mrb[62].mxu1 %vm8627_vm13, %v10960_v43 }
 0x356   : > { %2880 = vmatprep.mubr.f32.mxu0 %v10760_v1  ;;  %5254 = vmatprep.mubr.f32.mxu1 %v10760_v1 }
 0x359   : > { %5808 = vmatmul.mubr.msk.f32.vlgmr.msra.gmra.mrb[0].mxu0 %vm7934_vm1, %v10960_v43  ;;  %5904 = vmatmul.mubr.msk.f32.vlgmr.msra.gmra.mrb[0].mxu1 %vm7934_vm1, %v10960_v43  ;;  %vm11280_vm1 = vnez %v11239_v24 }
 0x35a   : > { %2887 = vmatprep.mubr.f32.mxu0 %v10760_v1  ;;  %5261 = vmatprep.mubr.f32.mxu1 %v10760_v1 }
 0x35d   : > { %5809 = vmatmul.mubr.msk.f32.gmra.mrb[2].mxu0 %vm7972_vm2, %v10960_v43  ;;  %5905 = vmatmul.mubr.msk.f32.gmra.mrb[2].mxu1 %vm7972_vm2, %v10960_v43  ;;  %vm11282_vm2 = vnez %v11243_v42 }
 0x35e   : > { %2894 = vmatprep.mubr.f32.mxu0 %v10760_v1  ;;  %5268 = vmatprep.mubr.f32.mxu1 %v10760_v1 }
 0x361   : > { %5810 = vmatmul.mubr.msk.f32.gmra.mrb[4].mxu0 %vm7929_vm0, %v10960_v43  ;;  %5906 = vmatmul.mubr.msk.f32.gmra.mrb[4].mxu1 %vm7929_vm0, %v10960_v43  ;;  %vm11279_vm0 = vnez %v11236_v52 }
 0x362   : > { %2901 = vmatprep.mubr.f32.mxu0 %v10760_v1  ;;  %5275 = vmatprep.mubr.f32.mxu1 %v10760_v1 }
 0x365   : > { %5811 = vmatmul.mubr.msk.f32.gmra.mrb[6].mxu0 %vm7967_vm5, %v10960_v43  ;;  %5907 = vmatmul.mubr.msk.f32.gmra.mrb[6].mxu1 %vm7967_vm5, %v10960_v43  ;;  %vm11281_vm5 = vnez %v11241_v4 }
 0x366   : > { %2908 = vmatprep.mubr.f32.mxu0 %v10760_v1  ;;  %5282 = vmatprep.mubr.f32.mxu1 %v10760_v1 }
 0x369   : > { %5812 = vmatmul.mubr.msk.f32.gmra.mrb[8].mxu0 %vm8008_vm3, %v10960_v43  ;;  %5908 = vmatmul.mubr.msk.f32.gmra.mrb[8].mxu1 %vm8008_vm3, %v10960_v43  ;;  %vm11283_vm3 = vnez %v11245_v20 }
 0x36a   : > { %2915 = vmatprep.mubr.f32.mxu0 %v10760_v1  ;;  %5289 = vmatprep.mubr.f32.mxu1 %v10760_v1 }
 0x36d   : > { %5813 = vmatmul.mubr.msk.f32.gmra.mrb[10].mxu0 %vm8026_vm6, %v10960_v43  ;;  %5909 = vmatmul.mubr.msk.f32.gmra.mrb[10].mxu1 %vm8026_vm6, %v10960_v43  ;;  %vm11284_vm6 = vnez %v11246_v46 }
 0x36e   : > { %2922 = vmatprep.mubr.f32.mxu0 %v10760_v1  ;;  %5296 = vmatprep.mubr.f32.mxu1 %v10760_v1 }
 0x371   : > { %5814 = vmatmul.mubr.msk.f32.gmra.mrb[12].mxu0 %vm8065_vm8, %v10960_v43  ;;  %5910 = vmatmul.mubr.msk.f32.gmra.mrb[12].mxu1 %vm8065_vm8, %v10960_v43  ;;  %vm11285_vm8 = vnez %v11248_v34 }
 0x372   : > { %2929 = vmatprep.mubr.f32.mxu0 %v10760_v1  ;;  %5303 = vmatprep.mubr.f32.mxu1 %v10760_v1 }
 0x375   : > { %5815 = vmatmul.mubr.msk.f32.gmra.mrb[14].mxu0 %vm11279_vm0, %v10960_v43  ;;  %5911 = vmatmul.mubr.msk.f32.gmra.mrb[14].mxu1 %vm11279_vm0, %v10960_v43  ;;  %vm11287_vm0 = vnez %v11252_v32 }
 0x376   : > { %2936 = vmatprep.mubr.f32.mxu0 %v10760_v1  ;;  %5310 = vmatprep.mubr.f32.mxu1 %v10760_v1 }
 0x379   : > { %5816 = vmatmul.mubr.msk.f32.gmra.mrb[16].mxu0 %vm11280_vm1, %v10960_v43  ;;  %5912 = vmatmul.mubr.msk.f32.gmra.mrb[16].mxu1 %vm11280_vm1, %v10960_v43  ;;  %vm11288_vm1 = vnez %v11254_v19 }
 0x37a   : > { %2943 = vmatprep.mubr.f32.mxu0 %v10760_v1  ;;  %5317 = vmatprep.mubr.f32.mxu1 %v10760_v1 }
 0x37d   : > { %5817 = vmatmul.mubr.msk.f32.gmra.mrb[18].mxu0 %vm8140_vm10, %v10960_v43  ;;  %5913 = vmatmul.mubr.msk.f32.gmra.mrb[18].mxu1 %vm8140_vm10, %v10960_v43  ;;  %vm11286_vm10 = vnez %v11250_v15 }
 0x37e   : > { %2950 = vmatprep.mubr.f32.mxu0 %v10760_v1  ;;  %5324 = vmatprep.mubr.f32.mxu1 %v10760_v1 }
 0x381   : > { %5818 = vmatmul.mubr.msk.f32.gmra.mrb[20].mxu0 %vm11281_vm5, %v10960_v43  ;;  %5914 = vmatmul.mubr.msk.f32.gmra.mrb[20].mxu1 %vm11281_vm5, %v10960_v43  ;;  %vm11289_vm5 = vnez %v11256_v11 }
 0x382   : > { %2957 = vmatprep.mubr.f32.mxu0 %v10760_v1  ;;  %5331 = vmatprep.mubr.f32.mxu1 %v10760_v1 }
 0x385   : > { %5819 = vmatmul.mubr.msk.f32.gmra.mrb[22].mxu0 %vm11282_vm2, %v10960_v43  ;;  %5915 = vmatmul.mubr.msk.f32.gmra.mrb[22].mxu1 %vm11282_vm2, %v10960_v43  ;;  %vm11290_vm2 = vnez %v11258_v61 }
 0x386   : > { %2964 = vmatprep.mubr.f32.mxu0 %v10760_v1  ;;  %5338 = vmatprep.mubr.f32.mxu1 %v10760_v1 }
 0x389   : > { %5820 = vmatmul.mubr.msk.f32.gmra.mrb[24].mxu0 %vm11283_vm3, %v10960_v43  ;;  %5916 = vmatmul.mubr.msk.f32.gmra.mrb[24].mxu1 %vm11283_vm3, %v10960_v43  ;;  %vm11291_vm3 = vnez %v11260_v26 }
 0x38a   : > { %2971 = vmatprep.mubr.f32.mxu0 %v10760_v1  ;;  %5345 = vmatprep.mubr.f32.mxu1 %v10760_v1 }
 0x38d   : > { %5821 = vmatmul.mubr.msk.f32.gmra.mrb[26].mxu0 %vm11284_vm6, %v10960_v43  ;;  %5917 = vmatmul.mubr.msk.f32.gmra.mrb[26].mxu1 %vm11284_vm6, %v10960_v43  ;;  %vm11292_vm6 = vnez %v11262_v56 }
 0x38e   : > { %2978 = vmatprep.mubr.f32.mxu0 %v10760_v1  ;;  %5352 = vmatprep.mubr.f32.mxu1 %v10760_v1 }
 0x391   : > { %5822 = vmatmul.mubr.msk.f32.gmra.mrb[28].mxu0 %vm11285_vm8, %v10960_v43  ;;  %5918 = vmatmul.mubr.msk.f32.gmra.mrb[28].mxu1 %vm11285_vm8, %v10960_v43  ;;  %vm11293_vm8 = vnez %v11264_v57 }
 0x392   : > { %2985 = vmatprep.mubr.f32.mxu0 %v10760_v1  ;;  %5359 = vmatprep.mubr.f32.mxu1 %v10760_v1 }
 0x395   : > { %5823 = vmatmul.mubr.msk.f32.gmra.mrb[30].mxu0 %vm11286_vm10, %v10960_v43  ;;  %5919 = vmatmul.mubr.msk.f32.gmra.mrb[30].mxu1 %vm11286_vm10, %v10960_v43  ;;  %vm11294_vm10 = vnez %v11266_v45 }
 0x396   : > { %2992 = vmatprep.mubr.f32.mxu0 %v10760_v1  ;;  %5366 = vmatprep.mubr.f32.mxu1 %v10760_v1 }
 0x399   : > { %5824 = vmatmul.mubr.msk.f32.gmra.mrb[32].mxu0 %vm11287_vm0, %v10960_v43  ;;  %5920 = vmatmul.mubr.msk.f32.gmra.mrb[32].mxu1 %vm11287_vm0, %v10960_v43 }
 0x39a   : > { %2999 = vmatprep.mubr.f32.mxu0 %v10760_v1  ;;  %5373 = vmatprep.mubr.f32.mxu1 %v10760_v1 }
 0x39d   : > { %5825 = vmatmul.mubr.msk.f32.gmra.mrb[34].mxu0 %vm11288_vm1, %v10960_v43  ;;  %5921 = vmatmul.mubr.msk.f32.gmra.mrb[34].mxu1 %vm11288_vm1, %v10960_v43 }
 0x39e   : > { %3006 = vmatprep.mubr.f32.mxu0 %v10760_v1  ;;  %5380 = vmatprep.mubr.f32.mxu1 %v10760_v1 }
 0x3a1   : > { %5826 = vmatmul.mubr.msk.f32.gmra.mrb[36].mxu0 %vm11289_vm5, %v10960_v43  ;;  %5922 = vmatmul.mubr.msk.f32.gmra.mrb[36].mxu1 %vm11289_vm5, %v10960_v43 }
 0x3a2   : > { %3013 = vmatprep.mubr.f32.mxu0 %v10760_v1  ;;  %5387 = vmatprep.mubr.f32.mxu1 %v10760_v1 }
 0x3a5   : > { %5827 = vmatmul.mubr.msk.f32.gmra.mrb[38].mxu0 %vm11290_vm2, %v10960_v43  ;;  %5923 = vmatmul.mubr.msk.f32.gmra.mrb[38].mxu1 %vm11290_vm2, %v10960_v43 }
 0x3a6   : > { %3020 = vmatprep.mubr.f32.mxu0 %v10760_v1  ;;  %5394 = vmatprep.mubr.f32.mxu1 %v10760_v1 }
 0x3a9   : > { %5828 = vmatmul.mubr.msk.f32.gmra.mrb[40].mxu0 %vm11291_vm3, %v10960_v43  ;;  %5924 = vmatmul.mubr.msk.f32.gmra.mrb[40].mxu1 %vm11291_vm3, %v10960_v43 }
 0x3aa   : > { %3027 = vmatprep.mubr.f32.mxu0 %v10760_v1  ;;  %5401 = vmatprep.mubr.f32.mxu1 %v10760_v1 }
 0x3ad   : > { %5829 = vmatmul.mubr.msk.f32.gmra.mrb[42].mxu0 %vm11292_vm6, %v10960_v43  ;;  %5925 = vmatmul.mubr.msk.f32.gmra.mrb[42].mxu1 %vm11292_vm6, %v10960_v43 }
 0x3ae   : > { %3034 = vmatprep.mubr.f32.mxu0 %v10760_v1  ;;  %5408 = vmatprep.mubr.f32.mxu1 %v10760_v1 }
 0x3b1   : > { %5830 = vmatmul.mubr.msk.f32.gmra.mrb[44].mxu0 %vm11293_vm8, %v10960_v43  ;;  %5926 = vmatmul.mubr.msk.f32.gmra.mrb[44].mxu1 %vm11293_vm8, %v10960_v43 }
 0x3b2   : > { %3041 = vmatprep.mubr.f32.mxu0 %v10760_v1  ;;  %5415 = vmatprep.mubr.f32.mxu1 %v10760_v1 }
 0x3b5   : > { %5831 = vmatmul.mubr.msk.f32.gmra.mrb[46].mxu0 %vm11294_vm10, %v10960_v43  ;;  %5927 = vmatmul.mubr.msk.f32.gmra.mrb[46].mxu1 %vm11294_vm10, %v10960_v43 }
 0x3b6   : > { %3048 = vmatprep.mubr.f32.mxu0 %v10760_v1  ;;  %5422 = vmatprep.mubr.f32.mxu1 %v10760_v1 }
 0x3b9   : > { %5832 = vmatmul.mubr.msk.f32.gmra.mrb[48].mxu0 %vm11269_vm12, %v10960_v43  ;;  %5928 = vmatmul.mubr.msk.f32.gmra.mrb[48].mxu1 %vm11269_vm12, %v10960_v43 }
 0x3ba   : > { %3055 = vmatprep.mubr.f32.mxu0 %v10760_v1  ;;  %5429 = vmatprep.mubr.f32.mxu1 %v10760_v1 }
 0x3bd   : > { %5833 = vmatmul.mubr.msk.f32.gmra.mrb[50].mxu0 %vm11271_vm4, %v10960_v43  ;;  %5929 = vmatmul.mubr.msk.f32.gmra.mrb[50].mxu1 %vm11271_vm4, %v10960_v43 }
 0x3be   : > { %3062 = vmatprep.mubr.f32.mxu0 %v10760_v1  ;;  %5436 = vmatprep.mubr.f32.mxu1 %v10760_v1 }
 0x3c1   : > { %5834 = vmatmul.mubr.msk.f32.gmra.mrb[52].mxu0 %vm11273_vm9, %v10960_v43  ;;  %5930 = vmatmul.mubr.msk.f32.gmra.mrb[52].mxu1 %vm11273_vm9, %v10960_v43 }
 0x3c2   : > { %3069 = vmatprep.mubr.f32.mxu0 %v10760_v1  ;;  %5443 = vmatprep.mubr.f32.mxu1 %v10760_v1 }
 0x3c5   : > { %5835 = vmatmul.mubr.msk.f32.gmra.mrb[54].mxu0 %vm11016_vm15, %v10960_v43  ;;  %5931 = vmatmul.mubr.msk.f32.gmra.mrb[54].mxu1 %vm11016_vm15, %v10960_v43 }
 0x3c6   : > { %3076 = vmatprep.mubr.f32.mxu0 %v10760_v1  ;;  %5450 = vmatprep.mubr.f32.mxu1 %v10760_v1 }
 0x3c9   : > { %5836 = vmatmul.mubr.msk.f32.gmra.mrb[56].mxu0 %vm11017_vm7, %v10960_v43  ;;  %5932 = vmatmul.mubr.msk.f32.gmra.mrb[56].mxu1 %vm11017_vm7, %v10960_v43 }
 0x3ca   : > { %3083 = vmatprep.mubr.f32.mxu0 %v10760_v1  ;;  %5457 = vmatprep.mubr.f32.mxu1 %v10760_v1 }
 0x3cd   : > { %5837 = vmatmul.mubr.msk.f32.gmra.mrb[58].mxu0 %vm11018_vm11, %v10960_v43  ;;  %5933 = vmatmul.mubr.msk.f32.gmra.mrb[58].mxu1 %vm11018_vm11, %v10960_v43 }
 0x3ce   : > { %3090 = vmatprep.mubr.f32.mxu0 %v10760_v1  ;;  %5464 = vmatprep.mubr.f32.mxu1 %v10760_v1 }
 0x3d1   : > { %5838 = vmatmul.mubr.msk.f32.gmra.mrb[60].mxu0 %vm8610_vm14, %v10960_v43  ;;  %5934 = vmatmul.mubr.msk.f32.gmra.mrb[60].mxu1 %vm8610_vm14, %v10960_v43 }
 0x3d2   : > { %3097 = vmatprep.mubr.f32.mxu0 %v10760_v1  ;;  %5471 = vmatprep.mubr.f32.mxu1 %v10760_v1 }
 0x3d5   : > { %5839 = vmatmul.mubr.msk.f32.gmra.mrb[62].mxu0 %vm8627_vm13, %v10960_v43  ;;  %5935 = vmatmul.mubr.msk.f32.gmra.mrb[62].mxu1 %vm8627_vm13, %v10960_v43 }
 0x42c   : > { %v2883_v41 = vpop.f32.mrb[0].mxu0  ;;  %v5257_v51 = vpop.f32.mrb[0].mxu1 }
 0x42d   : > { %5479 = vst [vmem:[%s9963_s26] sm:$0xff] %v2883_v41  ;;  %5481 = vst [vmem:[%s9963_s26 + $0x10] sm:$0xff] %v5257_v51  ;;  %v2885_v1 = vpop.f32.mrb[1].mxu0  ;;  %v5259_v43 = vpop.f32.mrb[1].mxu1 }
 0x42e   : > { %5480 = vst [vmem:[%s9963_s26 + $0x8] sm:$0xff] %v2885_v1  ;;  %5482 = vst [vmem:[%s9963_s26 + $0x18] sm:$0xff] %v5259_v43 }
 0x430   : > { %v2890_v5 = vpop.f32.mrb[2].mxu0  ;;  %v5264_v33 = vpop.f32.mrb[2].mxu1 }
 0x431   : > { %5483 = vst [vmem:[%s9963_s26 + $0x20] sm:$0xff] %v2890_v5  ;;  %5485 = vst [vmem:[%s9963_s26 + $0x30] sm:$0xff] %v5264_v33  ;;  %v2892_v35 = vpop.f32.mrb[3].mxu0  ;;  %v5266_v30 = vpop.f32.mrb[3].mxu1 }
 0x432   : > { %5484 = vst [vmem:[%s9963_s26 + $0x28] sm:$0xff] %v2892_v35  ;;  %5486 = vst [vmem:[%s9963_s26 + $0x38] sm:$0xff] %v5266_v30 }
 0x434   : > { %v2897_v40 = vpop.f32.mrb[4].mxu0  ;;  %v5271_v8 = vpop.f32.mrb[4].mxu1 }
 0x435   : > { %5487 = vst [vmem:[%s9963_s26 + $0x40] sm:$0xff] %v2897_v40  ;;  %5489 = vst [vmem:[%s9963_s26 + $0x50] sm:$0xff] %v5271_v8  ;;  %v2899_v13 = vpop.f32.mrb[5].mxu0  ;;  %v5273_v38 = vpop.f32.mrb[5].mxu1 }
 0x436   : > { %5488 = vst [vmem:[%s9963_s26 + $0x48] sm:$0xff] %v2899_v13  ;;  %5490 = vst [vmem:[%s9963_s26 + $0x58] sm:$0xff] %v5273_v38 }
 0x438   : > { %v2904_v27 = vpop.f32.mrb[6].mxu0  ;;  %v5278_v37 = vpop.f32.mrb[6].mxu1 }
 0x439   : > { %5491 = vst [vmem:[%s9963_s26 + $0x60] sm:$0xff] %v2904_v27  ;;  %5493 = vst [vmem:[%s9963_s26 + $0x70] sm:$0xff] %v5278_v37  ;;  %v2906_v53 = vpop.f32.mrb[7].mxu0  ;;  %v5280_v9 = vpop.f32.mrb[7].mxu1 }
 0x43a   : > { %5492 = vst [vmem:[%s9963_s26 + $0x68] sm:$0xff] %v2906_v53  ;;  %5494 = vst [vmem:[%s9963_s26 + $0x78] sm:$0xff] %v5280_v9 }
 0x43c   : > { %v2911_v22 = vpop.f32.mrb[8].mxu0  ;;  %v5285_v48 = vpop.f32.mrb[8].mxu1 }
 0x43d   : > { %5495 = vst [vmem:[%s9963_s26 + $0x80] sm:$0xff] %v2911_v22  ;;  %5497 = vst [vmem:[%s9963_s26 + $0x90] sm:$0xff] %v5285_v48  ;;  %v2913_v60 = vpop.f32.mrb[9].mxu0  ;;  %v5287_v0 = vpop.f32.mrb[9].mxu1 }
 0x43e   : > { %5496 = vst [vmem:[%s9963_s26 + $0x88] sm:$0xff] %v2913_v60  ;;  %5498 = vst [vmem:[%s9963_s26 + $0x98] sm:$0xff] %v5287_v0 }
 0x440   : > { %v2918_v29 = vpop.f32.mrb[10].mxu0  ;;  %v5292_v54 = vpop.f32.mrb[10].mxu1 }
 0x441   : > { %5499 = vst [vmem:[%s9963_s26 + $0xa0] sm:$0xff] %v2918_v29  ;;  %5501 = vst [vmem:[%s9963_s26 + $0xb0] sm:$0xff] %v5292_v54  ;;  %v2920_v21 = vpop.f32.mrb[11].mxu0  ;;  %v5294_v7 = vpop.f32.mrb[11].mxu1 }
 0x442   : > { %5500 = vst [vmem:[%s9963_s26 + $0xa8] sm:$0xff] %v2920_v21  ;;  %5502 = vst [vmem:[%s9963_s26 + $0xb8] sm:$0xff] %v5294_v7 }
 0x444   : > { %v2925_v36 = vpop.f32.mrb[12].mxu0  ;;  %v5299_v58 = vpop.f32.mrb[12].mxu1 }
 0x445   : > { %5503 = vst [vmem:[%s9963_s26 + $0xc0] sm:$0xff] %v2925_v36  ;;  %5505 = vst [vmem:[%s9963_s26 + $0xd0] sm:$0xff] %v5299_v58  ;;  %v2927_v39 = vpop.f32.mrb[13].mxu0  ;;  %v5301_v63 = vpop.f32.mrb[13].mxu1 }
 0x446   : > { %5504 = vst [vmem:[%s9963_s26 + $0xc8] sm:$0xff] %v2927_v39  ;;  %5506 = vst [vmem:[%s9963_s26 + $0xd8] sm:$0xff] %v5301_v63 }
 0x448   : > { %v2932_v18 = vpop.f32.mrb[14].mxu0  ;;  %v5306_v14 = vpop.f32.mrb[14].mxu1 }
 0x449   : > { %5507 = vst [vmem:[%s9963_s26 + $0xe0] sm:$0xff] %v2932_v18  ;;  %5509 = vst [vmem:[%s9963_s26 + $0xf0] sm:$0xff] %v5306_v14  ;;  %v2934_v3 = vpop.f32.mrb[15].mxu0  ;;  %v5308_v47 = vpop.f32.mrb[15].mxu1 }
 0x44a   : > { %5508 = vst [vmem:[%s9963_s26 + $0xe8] sm:$0xff] %v2934_v3  ;;  %5510 = vst [vmem:[%s9963_s26 + $0xf8] sm:$0xff] %v5308_v47 }
 0x44c   : > { %v2939_v25 = vpop.f32.mrb[16].mxu0  ;;  %v5313_v28 = vpop.f32.mrb[16].mxu1 }
 0x44d   : > { %5511 = vst [vmem:[%s9963_s26 + $0x100] sm:$0xff] %v2939_v25  ;;  %5513 = vst [vmem:[%s9963_s26 + $0x110] sm:$0xff] %v5313_v28  ;;  %v2941_v55 = vpop.f32.mrb[17].mxu0  ;;  %v5315_v50 = vpop.f32.mrb[17].mxu1 }
 0x44e   : > { %5512 = vst [vmem:[%s9963_s26 + $0x108] sm:$0xff] %v2941_v55  ;;  %5514 = vst [vmem:[%s9963_s26 + $0x118] sm:$0xff] %v5315_v50 }
 0x450   : > { %v2946_v49 = vpop.f32.mrb[18].mxu0  ;;  %v5320_v52 = vpop.f32.mrb[18].mxu1 }
 0x451   : > { %5515 = vst [vmem:[%s9963_s26 + $0x120] sm:$0xff] %v2946_v49  ;;  %5517 = vst [vmem:[%s9963_s26 + $0x130] sm:$0xff] %v5320_v52  ;;  %v2948_v10 = vpop.f32.mrb[19].mxu0  ;;  %v5322_v59 = vpop.f32.mrb[19].mxu1 }
 0x452   : > { %5516 = vst [vmem:[%s9963_s26 + $0x128] sm:$0xff] %v2948_v10  ;;  %5518 = vst [vmem:[%s9963_s26 + $0x138] sm:$0xff] %v5322_v59 }
 0x454   : > { %v2953_v24 = vpop.f32.mrb[20].mxu0  ;;  %v5327_v23 = vpop.f32.mrb[20].mxu1 }
 0x455   : > { %5519 = vst [vmem:[%s9963_s26 + $0x140] sm:$0xff] %v2953_v24  ;;  %5521 = vst [vmem:[%s9963_s26 + $0x150] sm:$0xff] %v5327_v23  ;;  %v2955_v4 = vpop.f32.mrb[21].mxu0  ;;  %v5329_v42 = vpop.f32.mrb[21].mxu1 }
 0x456   : > { %5520 = vst [vmem:[%s9963_s26 + $0x148] sm:$0xff] %v2955_v4  ;;  %5522 = vst [vmem:[%s9963_s26 + $0x158] sm:$0xff] %v5329_v42 }
 0x458   : > { %v2960_v20 = vpop.f32.mrb[22].mxu0  ;;  %v5334_v46 = vpop.f32.mrb[22].mxu1 }
 0x459   : > { %5523 = vst [vmem:[%s9963_s26 + $0x160] sm:$0xff] %v2960_v20  ;;  %5525 = vst [vmem:[%s9963_s26 + $0x170] sm:$0xff] %v5334_v46  ;;  %v2962_v34 = vpop.f32.mrb[23].mxu0  ;;  %v5336_v15 = vpop.f32.mrb[23].mxu1 }
 0x45a   : > { %5524 = vst [vmem:[%s9963_s26 + $0x168] sm:$0xff] %v2962_v34  ;;  %5526 = vst [vmem:[%s9963_s26 + $0x178] sm:$0xff] %v5336_v15 }
 0x45c   : > { %v2967_v32 = vpop.f32.mrb[24].mxu0  ;;  %v5341_v19 = vpop.f32.mrb[24].mxu1 }
 0x45d   : > { %5527 = vst [vmem:[%s9963_s26 + $0x180] sm:$0xff] %v2967_v32  ;;  %5529 = vst [vmem:[%s9963_s26 + $0x190] sm:$0xff] %v5341_v19  ;;  %v2969_v11 = vpop.f32.mrb[25].mxu0  ;;  %v5343_v61 = vpop.f32.mrb[25].mxu1 }
 0x45e   : > { %5528 = vst [vmem:[%s9963_s26 + $0x188] sm:$0xff] %v2969_v11  ;;  %5530 = vst [vmem:[%s9963_s26 + $0x198] sm:$0xff] %v5343_v61 }
 0x460   : > { %v2974_v26 = vpop.f32.mrb[26].mxu0  ;;  %v5348_v56 = vpop.f32.mrb[26].mxu1 }
 0x461   : > { %5531 = vst [vmem:[%s9963_s26 + $0x1a0] sm:$0xff] %v2974_v26  ;;  %5533 = vst [vmem:[%s9963_s26 + $0x1b0] sm:$0xff] %v5348_v56  ;;  %v2976_v57 = vpop.f32.mrb[27].mxu0  ;;  %v5350_v45 = vpop.f32.mrb[27].mxu1 }
 0x462   : > { %5532 = vst [vmem:[%s9963_s26 + $0x1a8] sm:$0xff] %v2976_v57  ;;  %5534 = vst [vmem:[%s9963_s26 + $0x1b8] sm:$0xff] %v5350_v45 }
 0x464   : > { %v2981_v62 = vpop.f32.mrb[28].mxu0  ;;  %v5355_v16 = vpop.f32.mrb[28].mxu1 }
 0x465   : > { %5535 = vst [vmem:[%s9963_s26 + $0x1c0] sm:$0xff] %v2981_v62  ;;  %5537 = vst [vmem:[%s9963_s26 + $0x1d0] sm:$0xff] %v5355_v16  ;;  %v2983_v17 = vpop.f32.mrb[29].mxu0  ;;  %v5357_v12 = vpop.f32.mrb[29].mxu1 }
 0x466   : > { %5536 = vst [vmem:[%s9963_s26 + $0x1c8] sm:$0xff] %v2983_v17  ;;  %5538 = vst [vmem:[%s9963_s26 + $0x1d8] sm:$0xff] %v5357_v12 }
 0x468   : > { %v2988_v2 = vpop.f32.mrb[30].mxu0  ;;  %v5362_v31 = vpop.f32.mrb[30].mxu1 }
 0x469   : > { %5539 = vst [vmem:[%s9963_s26 + $0x1e0] sm:$0xff] %v2988_v2  ;;  %5541 = vst [vmem:[%s9963_s26 + $0x1f0] sm:$0xff] %v5362_v31  ;;  %v2990_v44 = vpop.f32.mrb[31].mxu0  ;;  %v5364_v6 = vpop.f32.mrb[31].mxu1 }
 0x46a   : > { %5540 = vst [vmem:[%s9963_s26 + $0x1e8] sm:$0xff] %v2990_v44  ;;  %5542 = vst [vmem:[%s9963_s26 + $0x1f8] sm:$0xff] %v5364_v6 }
 0x46c   : > { %v2995_v41 = vpop.f32.mrb[32].mxu0  ;;  %v5369_v51 = vpop.f32.mrb[32].mxu1 }
 0x46d   : > { %5543 = vst [vmem:[%s9963_s26 + $0x200] sm:$0xff] %v2995_v41  ;;  %5545 = vst [vmem:[%s9963_s26 + $0x210] sm:$0xff] %v5369_v51  ;;  %v2997_v1 = vpop.f32.mrb[33].mxu0  ;;  %v5371_v43 = vpop.f32.mrb[33].mxu1 }
 0x46e   : > { %5544 = vst [vmem:[%s9963_s26 + $0x208] sm:$0xff] %v2997_v1  ;;  %5546 = vst [vmem:[%s9963_s26 + $0x218] sm:$0xff] %v5371_v43 }
 0x470   : > { %v3002_v5 = vpop.f32.mrb[34].mxu0  ;;  %v5376_v33 = vpop.f32.mrb[34].mxu1 }
 0x471   : > { %5547 = vst [vmem:[%s9963_s26 + $0x220] sm:$0xff] %v3002_v5  ;;  %5549 = vst [vmem:[%s9963_s26 + $0x230] sm:$0xff] %v5376_v33  ;;  %v3004_v35 = vpop.f32.mrb[35].mxu0  ;;  %v5378_v30 = vpop.f32.mrb[35].mxu1 }
 0x472   : > { %5548 = vst [vmem:[%s9963_s26 + $0x228] sm:$0xff] %v3004_v35  ;;  %5550 = vst [vmem:[%s9963_s26 + $0x238] sm:$0xff] %v5378_v30 }
 0x474   : > { %v3009_v40 = vpop.f32.mrb[36].mxu0  ;;  %v5383_v8 = vpop.f32.mrb[36].mxu1 }
 0x475   : > { %5551 = vst [vmem:[%s9963_s26 + $0x240] sm:$0xff] %v3009_v40  ;;  %5553 = vst [vmem:[%s9963_s26 + $0x250] sm:$0xff] %v5383_v8  ;;  %v3011_v13 = vpop.f32.mrb[37].mxu0  ;;  %v5385_v38 = vpop.f32.mrb[37].mxu1 }
 0x476   : > { %5552 = vst [vmem:[%s9963_s26 + $0x248] sm:$0xff] %v3011_v13  ;;  %5554 = vst [vmem:[%s9963_s26 + $0x258] sm:$0xff] %v5385_v38 }
 0x478   : > { %v3016_v27 = vpop.f32.mrb[38].mxu0  ;;  %v5390_v37 = vpop.f32.mrb[38].mxu1 }
 0x479   : > { %5555 = vst [vmem:[%s9963_s26 + $0x260] sm:$0xff] %v3016_v27  ;;  %5557 = vst [vmem:[%s9963_s26 + $0x270] sm:$0xff] %v5390_v37  ;;  %v3018_v53 = vpop.f32.mrb[39].mxu0  ;;  %v5392_v9 = vpop.f32.mrb[39].mxu1 }
 0x47a   : > { %5556 = vst [vmem:[%s9963_s26 + $0x268] sm:$0xff] %v3018_v53  ;;  %5558 = vst [vmem:[%s9963_s26 + $0x278] sm:$0xff] %v5392_v9 }
 0x47c   : > { %v3023_v22 = vpop.f32.mrb[40].mxu0  ;;  %v5397_v48 = vpop.f32.mrb[40].mxu1 }
 0x47d   : > { %5559 = vst [vmem:[%s9963_s26 + $0x280] sm:$0xff] %v3023_v22  ;;  %5561 = vst [vmem:[%s9963_s26 + $0x290] sm:$0xff] %v5397_v48  ;;  %v3025_v60 = vpop.f32.mrb[41].mxu0  ;;  %v5399_v0 = vpop.f32.mrb[41].mxu1 }
 0x47e   : > { %5560 = vst [vmem:[%s9963_s26 + $0x288] sm:$0xff] %v3025_v60  ;;  %5562 = vst [vmem:[%s9963_s26 + $0x298] sm:$0xff] %v5399_v0 }
 0x480   : > { %v3030_v29 = vpop.f32.mrb[42].mxu0  ;;  %v5404_v54 = vpop.f32.mrb[42].mxu1 }
 0x481   : > { %5563 = vst [vmem:[%s9963_s26 + $0x2a0] sm:$0xff] %v3030_v29  ;;  %5565 = vst [vmem:[%s9963_s26 + $0x2b0] sm:$0xff] %v5404_v54  ;;  %v3032_v21 = vpop.f32.mrb[43].mxu0  ;;  %v5406_v7 = vpop.f32.mrb[43].mxu1 }
 0x482   : > { %5564 = vst [vmem:[%s9963_s26 + $0x2a8] sm:$0xff] %v3032_v21  ;;  %5566 = vst [vmem:[%s9963_s26 + $0x2b8] sm:$0xff] %v5406_v7 }
 0x484   : > { %v3037_v36 = vpop.f32.mrb[44].mxu0  ;;  %v5411_v58 = vpop.f32.mrb[44].mxu1 }
 0x485   : > { %5567 = vst [vmem:[%s9963_s26 + $0x2c0] sm:$0xff] %v3037_v36  ;;  %5569 = vst [vmem:[%s9963_s26 + $0x2d0] sm:$0xff] %v5411_v58  ;;  %v3039_v39 = vpop.f32.mrb[45].mxu0  ;;  %v5413_v63 = vpop.f32.mrb[45].mxu1 }
 0x486   : > { %5568 = vst [vmem:[%s9963_s26 + $0x2c8] sm:$0xff] %v3039_v39  ;;  %5570 = vst [vmem:[%s9963_s26 + $0x2d8] sm:$0xff] %v5413_v63 }
 0x488   : > { %v3044_v18 = vpop.f32.mrb[46].mxu0  ;;  %v5418_v14 = vpop.f32.mrb[46].mxu1 }
 0x489   : > { %5571 = vst [vmem:[%s9963_s26 + $0x2e0] sm:$0xff] %v3044_v18  ;;  %5573 = vst [vmem:[%s9963_s26 + $0x2f0] sm:$0xff] %v5418_v14  ;;  %v3046_v3 = vpop.f32.mrb[47].mxu0  ;;  %v5420_v47 = vpop.f32.mrb[47].mxu1 }
 0x48a   : > { %5572 = vst [vmem:[%s9963_s26 + $0x2e8] sm:$0xff] %v3046_v3  ;;  %5574 = vst [vmem:[%s9963_s26 + $0x2f8] sm:$0xff] %v5420_v47 }
 0x48c   : > { %v3051_v25 = vpop.f32.mrb[48].mxu0  ;;  %v5425_v28 = vpop.f32.mrb[48].mxu1 }
 0x48d   : > { %5575 = vst [vmem:[%s9963_s26 + $0x300] sm:$0xff] %v3051_v25  ;;  %5577 = vst [vmem:[%s9963_s26 + $0x310] sm:$0xff] %v5425_v28  ;;  %v3053_v55 = vpop.f32.mrb[49].mxu0  ;;  %v5427_v50 = vpop.f32.mrb[49].mxu1 }
 0x48e   : > { %5576 = vst [vmem:[%s9963_s26 + $0x308] sm:$0xff] %v3053_v55  ;;  %5578 = vst [vmem:[%s9963_s26 + $0x318] sm:$0xff] %v5427_v50 }
 0x490   : > { %v3058_v49 = vpop.f32.mrb[50].mxu0  ;;  %v5432_v52 = vpop.f32.mrb[50].mxu1 }
 0x491   : > { %5579 = vst [vmem:[%s9963_s26 + $0x320] sm:$0xff] %v3058_v49  ;;  %5581 = vst [vmem:[%s9963_s26 + $0x330] sm:$0xff] %v5432_v52  ;;  %v3060_v10 = vpop.f32.mrb[51].mxu0  ;;  %v5434_v59 = vpop.f32.mrb[51].mxu1 }
 0x492   : > { %5580 = vst [vmem:[%s9963_s26 + $0x328] sm:$0xff] %v3060_v10  ;;  %5582 = vst [vmem:[%s9963_s26 + $0x338] sm:$0xff] %v5434_v59 }
 0x494   : > { %v3065_v24 = vpop.f32.mrb[52].mxu0  ;;  %v5439_v23 = vpop.f32.mrb[52].mxu1 }
 0x495   : > { %5583 = vst [vmem:[%s9963_s26 + $0x340] sm:$0xff] %v3065_v24  ;;  %5585 = vst [vmem:[%s9963_s26 + $0x350] sm:$0xff] %v5439_v23  ;;  %v3067_v4 = vpop.f32.mrb[53].mxu0  ;;  %v5441_v42 = vpop.f32.mrb[53].mxu1 }
 0x496   : > { %5584 = vst [vmem:[%s9963_s26 + $0x348] sm:$0xff] %v3067_v4  ;;  %5586 = vst [vmem:[%s9963_s26 + $0x358] sm:$0xff] %v5441_v42 }
 0x498   : > { %v3072_v20 = vpop.f32.mrb[54].mxu0  ;;  %v5446_v46 = vpop.f32.mrb[54].mxu1 }
 0x499   : > { %5587 = vst [vmem:[%s9963_s26 + $0x360] sm:$0xff] %v3072_v20  ;;  %5589 = vst [vmem:[%s9963_s26 + $0x370] sm:$0xff] %v5446_v46  ;;  %v3074_v34 = vpop.f32.mrb[55].mxu0  ;;  %v5448_v15 = vpop.f32.mrb[55].mxu1 }
 0x49a   : > { %5588 = vst [vmem:[%s9963_s26 + $0x368] sm:$0xff] %v3074_v34  ;;  %5590 = vst [vmem:[%s9963_s26 + $0x378] sm:$0xff] %v5448_v15 }
 0x49c   : > { %v3079_v32 = vpop.f32.mrb[56].mxu0  ;;  %v5453_v19 = vpop.f32.mrb[56].mxu1 }
 0x49d   : > { %5591 = vst [vmem:[%s9963_s26 + $0x380] sm:$0xff] %v3079_v32  ;;  %5593 = vst [vmem:[%s9963_s26 + $0x390] sm:$0xff] %v5453_v19  ;;  %v3081_v11 = vpop.f32.mrb[57].mxu0  ;;  %v5455_v61 = vpop.f32.mrb[57].mxu1 }
 0x49e   : > { %5592 = vst [vmem:[%s9963_s26 + $0x388] sm:$0xff] %v3081_v11  ;;  %5594 = vst [vmem:[%s9963_s26 + $0x398] sm:$0xff] %v5455_v61 }
 0x4a0   : > { %v3086_v26 = vpop.f32.mrb[58].mxu0  ;;  %v5460_v56 = vpop.f32.mrb[58].mxu1 }
 0x4a1   : > { %5595 = vst [vmem:[%s9963_s26 + $0x3a0] sm:$0xff] %v3086_v26  ;;  %5597 = vst [vmem:[%s9963_s26 + $0x3b0] sm:$0xff] %v5460_v56  ;;  %v3088_v57 = vpop.f32.mrb[59].mxu0  ;;  %v5462_v45 = vpop.f32.mrb[59].mxu1 }
 0x4a2   : > { %5596 = vst [vmem:[%s9963_s26 + $0x3a8] sm:$0xff] %v3088_v57  ;;  %5598 = vst [vmem:[%s9963_s26 + $0x3b8] sm:$0xff] %v5462_v45 }
 0x4a4   : > { %v3093_v62 = vpop.f32.mrb[60].mxu0  ;;  %v5467_v16 = vpop.f32.mrb[60].mxu1  ;;  %5614 = sbr.rel (!%p11295_p6) target bundleno = 1223 (0x4c7), region = 36 }
 0x4a5   : > { %5599 = vst [vmem:[%s9963_s26 + $0x3c0] sm:$0xff] %v3093_v62  ;;  %5601 = vst [vmem:[%s9963_s26 + $0x3d0] sm:$0xff] %v5467_v16  ;;  %v3095_v17 = vpop.f32.mrb[61].mxu0  ;;  %v5469_v12 = vpop.f32.mrb[61].mxu1 }
 0x4a6   : > { %5600 = vst [vmem:[%s9963_s26 + $0x3c8] sm:$0xff] %v3095_v17  ;;  %5602 = vst [vmem:[%s9963_s26 + $0x3d8] sm:$0xff] %v5469_v12 }
 0x4a8   : > { %v3100_v2 = vpop.f32.mrb[62].mxu0  ;;  %v5474_v31 = vpop.f32.mrb[62].mxu1 }
 0x4a9   : > { %5603 = vst [vmem:[%s9963_s26 + $0x3e0] sm:$0xff] %v3100_v2  ;;  %5605 = vst [vmem:[%s9963_s26 + $0x3f0] sm:$0xff] %v5474_v31  ;;  %v3102_v44 = vpop.f32.mrb[63].mxu0  ;;  %v5476_v6 = vpop.f32.mrb[63].mxu1 }
 0x4aa   : > { %5604 = vst [vmem:[%s9963_s26 + $0x3e8] sm:$0xff] %v3102_v44  ;;  %5606 = vst [vmem:[%s9963_s26 + $0x3f8] sm:$0xff] %v5476_v6 }
 0x4ab   : > { %s11302_s28 = smov (!%p5617_p9, %s5616_s28), 32 }
 0x4ac   : > { %s10100_s29 = sshll.u32 %s11302_s28, 9 }
 0x4ad   : > { %s5622_s30 = ssub.s32 16384, %s10100_s29 }
 0x4ae   : > { %5623 = vsyncadd %s10095_s27, %s5622_s30  ;;  %p5940_p10 = scmp.ne.s32.totalorder %s10100_s29, 0  ;;  %s5949_s3 = sshll.u32 %s7237_s13, 14 }
 0x4af   : > { %s10109_s5 = scalar_lea.hbm %s10158_s2, %s5949_s3  ;;  %s5629_s6 = sshll.u32 %s9963_s26, 4  ;;  %s10112_s6 = int_to_ptr.vmem [resolvable:$true] %s5629_s6 }
 0x4b0   : > { %s7124_s7 = scalar_lea.vmem %s10112_s6, %s10100_s29  ;;  %s7198_s8 = smov [#allocation5]  }
 0x4b1   : > { %p7125_p12 = scmp.ne.s32.totalorder %s10112_s6, %s7124_s7  ;;  %s7128_s14 = sshll.u32 %s7198_s8, 4  ;;  %s7129_s14 = int_to_ptr.vmem [resolvable:$false] %s7128_s14 }
 0x4b2   : > { %s7130_s13 = scalar_lea.vmem %s7129_s14, 32768  ;;  %p7131_p4 = scmp.lt.s32.totalorder %s10112_s6, %s7129_s14 }
 0x4b3   : > { %p7126_p2 = pnand %p7125_p12, %p5940_p10  ;;  %p7132_p7 = scmp.lt.s32.totalorder %s7130_s13, %s7124_s7 }
 0x4b5   : > { %p7127_p3 = pneg %p7126_p2  ;;  %p7133_p8 = por %p7132_p7, %p7131_p4 }
 0x4b7   : > { %p7134_p11 = pnand %p7133_p8, %p7127_p3 }
 0x4b9   : > { %7137 = shalt.err (!%p7134_p11)
}
 0x4ba   : > { %s7138_s16 = scalar_lea.hbm %s10109_s5, %s10100_s29  ;;  %s7142_s21 = scalar_lea.hbm %s10158_s2, 25600 }
 0x4bb   : > { %p7139_p13 = scmp.ne.s32.totalorder %s10109_s5, %s7138_s16  ;;  %p7143_p5 = scmp.lt.u32.totalorder %s10109_s5, %s10158_s2 }
 0x4bc   : > { %p7144_p6 = scmp.lt.u32.totalorder %s7142_s21, %s7138_s16  ;;  %p7146_p12 = scmp.lt.u32.totalorder %s7138_s16, %s10109_s5 }
 0x4bd   : > { %p7140_p1 = pnand %p7139_p13, %p5940_p10 }
 0x4be   : > { %p7145_p9 = por %p7144_p6, %p7143_p5 }
 0x4bf   : > { %p7141_p0 = pneg %p7140_p1 }
 0x4c0   : > { %p7147_p2 = por %p7146_p12, %p7145_p9 }
 0x4c2   : > { %p7148_p3 = pnand %p7147_p2, %p7141_p0 }
 0x4c4   : > { %7151 = shalt.err (!%p7148_p3)
}
 0x4c5   : > { %s7199_s25 = smov 512   ;;  %s7200_s26 = smov 32  }
 0x4c6   : > { %5635 = dma.vmem_to_hbm [thread:$0]  (%p5940_p10), %s10112_s6, %s10100_s29, %s10109_s5, %s10095_s27, %s7199_s25, %s7199_s25, %s7200_s26  }
 0x4c7 PF: > { %p7053_p4 = scmp.ge.s32.totalorder %s7190_s12, 2  ;;  %s5644_s28 = sand.u32 1, %s7178_s9  }
 0x4c8   : > { %p11296_p7 = scmp.ne.s32.totalorder %s10627_s20, 0  ;;  %s5645_s30 = scalar_lea.sflag [#allocation4], %s5644_s28 }
 0x4ca   : > { %p7048_p8 = pnand %p7053_p4, %p11296_p7 }
 0x4cc   : > { %7173 = dma.done.wait (!%p7048_p8), %s5645_s30, 16384  }
 0x4cd   : > { %7175 = vsyncadd (!%p7048_p8), %s5645_s30, 4294950912  ;;  %p13_p11 = scmp.ge.s32.totalorder %s7241_s15, 4   ;;  %s11297_s9 = smov %s7182_s10 }
 0x4ce   : > { %s11298_s10 = smov %s7186_s11  ;;  %s11299_s11 = smov %s7252_s18 }
 0x4cf   : > { %s11300_s12 = smov %s7241_s15  ;;  %15 = sbr.rel (!%p13_p11) target bundleno = 4 (0x4), region = 68 }
 0x4d6   :  { %5650 = vsyncpa [#allocation3], 1 }
 0x4d7   :  { %5652 = vsyncpa [#allocation3 + $0x1], 1 }
 0x4d8   :  { %5653 = vsyncpa [#allocation4], 1 }
 0x4d9   :  { %5655 = vsyncpa [#allocation4 + $0x1], 1 }

</bundles_post_ra>
